<compile_context>
chip_gen: v5e
topology: v5e:2x2
jax: 0.10.0
libtpu: 0.0.40
codegen_flags: <defaults>
</compile_context>

<pallas_src>
import functools

import jax
import jax.numpy as jnp
from jax import lax
from jax.experimental import pallas as pl
from jax.experimental.pallas import tpu as pltpu


def _res_layer_kernel(x_hbm, p_ref, w1_ref, w2_ref, o_ref, slab_ref, sem,
                      *, H, W, C, K, SH, matmul_dtype):
    """One grid step = SH output rows of one image.

    x_hbm   : (N*(H+4P), W+2P, C) f32 in HBM (zero-padded, N/H folded together)
    p_ref   : (5, C) f32   rows: s1, t1, b1, s2, t2 (folded BN + conv1 bias)
    w1_ref  : (K*K*C, C) matmul_dtype   row = (dy*K + dx)*C + cin
    w2_ref  : (K*K*C, C) matmul_dtype
    o_ref   : (1, SH, W, C) f32 output strip
    slab_ref: (SH+4P, W+2P, C) f32 VMEM scratch (halo'd input strip)
    """
    P = K // 2
    Wp = W + 2 * P
    Hp = H + 4 * P          # padded rows per image in x_hbm
    SH_IN = SH + 4 * P      # fetched rows   (conv1 input needs a 2P halo)
    SH_MID = SH + 2 * P     # conv1-out rows (conv2 input needs a  P halo)

    n = pl.program_id(0)
    s = pl.program_id(1)
    row0 = pl.multiple_of(s * SH, SH)

    # Fixed-size halo'd strip fetch (manual DMA).  The wrapper's 2P-row zero
    # padding per image keeps the copy in-bounds for every strip.
    cp = pltpu.make_async_copy(
        x_hbm.at[pl.ds(n * Hp + row0, SH_IN)], slab_ref, sem)
    cp.start()

    # Per-channel params: one (5, C) block, read once, broadcast as (1, 1, C).
    s1 = p_ref[0].reshape(1, 1, C)
    t1 = p_ref[1].reshape(1, 1, C)
    b1 = p_ref[2].reshape(1, 1, C)
    s2 = p_ref[3].reshape(1, 1, C)
    t2 = p_ref[4].reshape(1, 1, C)

    def conv_same(src, rows, w_ref):
        # Fused im2col MXU matmul: (rows*W, K*K*C) @ (K*K*C, C), f32 accumulate.
        # The lane concat lands on C (multiple-of-128) boundaries.
        # TODO(synk): per-dy decomposition if the K*K sublane-shifted slices ever
        # become the binding XLU slot.
        taps = jnp.concatenate(
            [src[dy:dy + rows, dx:dx + W, :]
             for dy in range(K) for dx in range(K)], axis=-1)
        taps = taps.reshape(rows * W, K * K * C)
        out = jnp.dot(taps, w_ref[...], preferred_element_type=jnp.float32)
        return out.reshape(rows, W, C)

    cp.wait()

    # ---- BN1 (folded) + LeakyReLU(0.1); Dropout = identity (eval mode) ------
    y = slab_ref[...] * s1 + t1
    y = jnp.where(y >= 0, y, 0.1 * y)
    # Conv1 'same' zero padding: slab row a is image row (row0 + a - 2P), slab
    # col c is image col (c - P); positions outside the image must be zero
    # *after* BN/LeakyReLU (BN maps the wrapper's zero padding to t1, not 0).
    rr = lax.broadcasted_iota(jnp.int32, (SH_IN, Wp, C), 0) + (row0 - 2 * P)
    cc = lax.broadcasted_iota(jnp.int32, (SH_IN, Wp, C), 1) - P
    inside = (rr >= 0) & (rr < H) & (cc >= 0) & (cc < W)
    y = jnp.where(inside, y, 0.0).astype(matmul_dtype)

    # ---- Conv1 ('same', bias) + BN2 (folded) + LeakyReLU(0.1) ----------------
    h = conv_same(y, SH_MID, w1_ref) + b1
    h = h * s2 + t2
    h = jnp.where(h >= 0, h, 0.1 * h)
    # Conv2 'same' zero padding: conv1-out row o is image row (row0 - P + o);
    # out-of-image rows are zeroed, and the P halo columns are re-attached with
    # a lane-dense concat (no masked / thin scratch stores).
    rr2 = lax.broadcasted_iota(jnp.int32, (SH_MID, W, C), 0) + (row0 - P)
    h = jnp.where((rr2 >= 0) & (rr2 < H), h, 0.0).astype(matmul_dtype)
    zcol = jnp.zeros((SH_MID, P, C), matmul_dtype)
    h = jnp.concatenate([zcol, h, zcol], axis=1)              # (SH_MID, Wp, C)

    # ---- Conv2 ('same', no bias) + residual ----------------------------------
    y2 = conv_same(h, SH, w2_ref)
    # Residual: re-read this strip of x from the already-resident VMEM slab.
    x_res = slab_ref[2 * P:2 * P + SH, P:P + W, :]
    o_ref[0] = (x_res + y2).astype(o_ref.dtype)


def res_layer2d(x_nhwc, s1, t1, w1_hwio, b1, s2, t2, w2_hwio, *, kernel_size,
                strip_rows=8, matmul_dtype=jnp.bfloat16, lane_multiple=128):
    """ResLayer2d forward.  x_nhwc: (N, H, W, C) f32.  Returns (N, H, W, C) f32.

    strip_rows   : output rows per grid step; bounds the per-step im2col taps
                   temporary ((strip_rows + 2P) * W * K*K*Cpad elements).
    matmul_dtype : MXU operand dtype (bf16 on v5e/v6e/v7x; accumulation is f32).
    lane_multiple: channels zero-padded to a multiple of this (lane-dense).
    """
    N, H, W, C = x_nhwc.shape
    K = kernel_size
    assert K % 2 == 1, "PyTorch 'same' padding is asymmetric for even K"
    P = K // 2

    SH = min(strip_rows, H)
    # TODO(synk): ragged last strip not implemented.
    assert H % SH == 0, "H must be divisible by strip_rows"

    Cp = -(-C // lane_multiple) * lane_multiple
    cpad = Cp - C
    Wp = W + 2 * P
    Hp = H + 4 * P

    # Lane-dense channel padding: zero scale/shift/bias and zero weight rows /
    # cols keep the padded output channels exactly zero (sliced off on return).
    params = jnp.stack([jnp.pad(v, (0, cpad)) for v in (s1, t1, b1, s2, t2)])

    def flatten_w(w):  # HWIO (K,K,C,C) -> (K*K*Cp, Cp); row = (dy*K+dx)*Cp + cin
        w = jnp.pad(w, ((0, 0), (0, 0), (0, cpad), (0, cpad)))
        return w.reshape(K * K * Cp, Cp).astype(matmul_dtype)

    w1_flat = flatten_w(w1_hwio)
    w2_flat = flatten_w(w2_hwio)

    # Zero-pad 2P halo rows / P halo cols / lane padding, and fold (N, Hp) into
    # one leading axis so the per-strip halo fetch is a single dynamic slice.
    x_pad = jnp.pad(x_nhwc, ((0, 0), (2 * P, 2 * P), (P, P), (0, cpad)))
    x_flat = x_pad.reshape(N * Hp, Wp, Cp)

    kernel = functools.partial(_res_layer_kernel, H=H, W=W, C=Cp, K=K, SH=SH,
                               matmul_dtype=matmul_dtype)

    out = pl.pallas_call(
        kernel,
        out_shape=jax.ShapeDtypeStruct((N, H, W, Cp), x_nhwc.dtype),
        grid=(N, H // SH),
        in_specs=[
            pl.BlockSpec(memory_space=pl.ANY),                    # x stays in HBM
            pl.BlockSpec((5, Cp), lambda n, s: (0, 0)),           # BN/bias params
            pl.BlockSpec((K * K * Cp, Cp), lambda n, s: (0, 0)),  # conv1 weights
            pl.BlockSpec((K * K * Cp, Cp), lambda n, s: (0, 0)),  # conv2 weights
        ],
        out_specs=pl.BlockSpec((1, SH, W, Cp), lambda n, s: (n, s, 0, 0)),
        scratch_shapes=[
            pltpu.VMEM((SH + 4 * P, Wp, Cp), jnp.float32),        # halo'd strip
            pltpu.SemaphoreType.DMA(()),
        ],
        compiler_params=pltpu.CompilerParams(
            dimension_semantics=("parallel", "parallel"),
            vmem_limit_bytes=48 * 1024 * 1024),
    )(x_flat, params, w1_flat, w2_flat)
    return out[..., :C] if cpad else out


def reference(x_nhwc, s1, t1, w1_hwio, b1, s2, t2, w2_hwio):
    dn = ("NHWC", "HWIO", "NHWC")
    y = x_nhwc * s1 + t1
    y = jnp.where(y >= 0, y, 0.1 * y)
    y = lax.conv_general_dilated(y, w1_hwio, (1, 1), "SAME",
                                 dimension_numbers=dn) + b1
    y = y * s2 + t2
    y = jnp.where(y >= 0, y, 0.1 * y)
    y = lax.conv_general_dilated(y, w2_hwio, (1, 1), "SAME",
                                 dimension_numbers=dn)
    return x_nhwc + y


if __name__ == "__main__":
    # Small shapes consistent with the module: batch=2, dim=4, 16x16 spatial;
    # both UNet ResLayer2d kernel sizes (3 and 5) are exercised.
    N, C, H, W = 2, 4, 16, 16
    EPS = 0.01

    key = jax.random.PRNGKey(0)
    kx, kp3, kp5 = jax.random.split(key, 3)

    x_nchw = jax.random.normal(kx, (N, C, H, W), jnp.float32)   # PyTorch NCHW
    x_nhwc = jnp.transpose(x_nchw, (0, 2, 3, 1))                # kernel layout

    def make_params(k, K):
        ks = jax.random.split(k, 11)
        g1 = 1.0 + 0.1 * jax.random.normal(ks[0], (C,), jnp.float32)
        be1 = 0.1 * jax.random.normal(ks[1], (C,), jnp.float32)
        rm1 = 0.1 * jax.random.normal(ks[2], (C,), jnp.float32)
        rv1 = jnp.abs(jax.random.normal(ks[3], (C,), jnp.float32)) + 0.5
        s1 = g1 / jnp.sqrt(rv1 + EPS)
        t1 = be1 - rm1 * s1
        w1 = 0.1 * jax.random.normal(ks[4], (C, C, K, K), jnp.float32)  # OIHW
        b1 = 0.1 * jax.random.normal(ks[5], (C,), jnp.float32)
        g2 = 1.0 + 0.1 * jax.random.normal(ks[6], (C,), jnp.float32)
        be2 = 0.1 * jax.random.normal(ks[7], (C,), jnp.float32)
        rm2 = 0.1 * jax.random.normal(ks[8], (C,), jnp.float32)
        rv2 = jnp.abs(jax.random.normal(ks[9], (C,), jnp.float32)) + 0.5
        s2 = g2 / jnp.sqrt(rv2 + EPS)
        t2 = be2 - rm2 * s2
        w2 = 0.1 * jax.random.normal(ks[10], (C, C, K, K), jnp.float32)
        return (s1, t1, jnp.transpose(w1, (2, 3, 1, 0)), b1,
                s2, t2, jnp.transpose(w2, (2, 3, 1, 0)))

    # (kernel size, param key, strip_rows, MXU dtype, tolerance)
    configs = [
        (3, kp3, 8, jnp.float32, 1e-4),
        (3, kp3, 4, jnp.bfloat16, 2.5e-1),  # loose: bf16 MXU operands, f32 accum
        (5, kp5, 8, jnp.float32, 1e-4),
    ]
    for K, kp, sh, mmdt, tol in configs:
        p = make_params(kp, K)
        out = jax.block_until_ready(
            res_layer2d(x_nhwc, *p, kernel_size=K, strip_rows=sh,
                        matmul_dtype=mmdt))
        ref = jax.block_until_ready(reference(x_nhwc, *p))
        assert out.shape == (N, H, W, C)
        err = float(jnp.max(jnp.abs(out - ref)))
        assert err < tol, (
            f"K={K} {jnp.dtype(mmdt).name}: max err {err} >= {tol}")
    print("KERNEL_OK")
</pallas_src>

<mosaic_0001>
module attributes {stable_mosaic.version = 11 : i64} {
  func.func @_res_layer_kernel(%arg0: i32, %arg1: i32, %arg2: memref<40x18x128xf32, #tpu.memory_space<any>>, %arg3: memref<5x128xf32, #tpu.memory_space<vmem>>, %arg4: memref<1152x128xf32, #tpu.memory_space<vmem>>, %arg5: memref<1152x128xf32, #tpu.memory_space<vmem>>, %arg6: memref<1x8x16x128xf32, #tpu.memory_space<vmem>>, %arg7: memref<12x18x128xf32, #tpu.memory_space<vmem>>, %arg8: memref<!tpu.dma_semaphore, #tpu.memory_space<semaphore_mem>>) attributes {dimension_semantics = [#tpu.dimension_semantics<parallel>, #tpu.dimension_semantics<parallel>], iteration_bounds = array<i64: 2, 2>, scalar_prefetch = 0 : i64, scratch_operands = 2 : i64, tpu.core_type = #tpu.core_type<tc>, window_params = [{}, {pipeline_mode = #tpu.pipeline_mode<synchronous>, transform_indices = @transform_1, window_bounds = array<i64: 5, 128>}, {pipeline_mode = #tpu.pipeline_mode<synchronous>, transform_indices = @transform_2, window_bounds = array<i64: 1152, 128>}, {pipeline_mode = #tpu.pipeline_mode<synchronous>, transform_indices = @transform_3, window_bounds = array<i64: 1152, 128>}, {transform_indices = @transform_4, window_bounds = array<i64: 1, 8, 16, 128>}]} {
    %c8_i32 = arith.constant 8 : i32
    %0 = arith.muli %arg1, %c8_i32 : i32
    %1 = tpu.assume_multiple %0, 8 : i32
    %c20_i32 = arith.constant 20 : i32
    %2 = arith.muli %arg0, %c20_i32 : i32
    %3 = arith.addi %2, %1 : i32
    %c0_i32 = arith.constant 0 : i32
    %c0_i32_0 = arith.constant 0 : i32
    %4 = tpu.memref_slice %arg2[%3, %c0_i32, %c0_i32_0] : memref<40x18x128xf32, #tpu.memory_space<any>> -> memref<12x18x128xf32, #tpu.memory_space<any>>
    tpu.enqueue_dma source(%4 : memref<12x18x128xf32, #tpu.memory_space<any>>) target(%arg7 : memref<12x18x128xf32, #tpu.memory_space<vmem>>) target_semaphore(%arg8 : memref<!tpu.dma_semaphore, #tpu.memory_space<semaphore_mem>>)
    %c0 = arith.constant 0 : index
    %c0_1 = arith.constant 0 : index
    %5 = vector.load %arg3[%c0, %c0_1] : memref<5x128xf32, #tpu.memory_space<vmem>>, vector<1x128xf32>
    %6 = vector.shape_cast %5 : vector<1x128xf32> to vector<128xf32>
    %7 = vector.shape_cast %6 : vector<128xf32> to vector<1x1x128xf32>
    %c1 = arith.constant 1 : index
    %c0_2 = arith.constant 0 : index
    %8 = vector.load %arg3[%c1, %c0_2] : memref<5x128xf32, #tpu.memory_space<vmem>>, vector<1x128xf32>
    %9 = vector.shape_cast %8 : vector<1x128xf32> to vector<128xf32>
    %10 = vector.shape_cast %9 : vector<128xf32> to vector<1x1x128xf32>
    %c2 = arith.constant 2 : index
    %c0_3 = arith.constant 0 : index
    %11 = vector.load %arg3[%c2, %c0_3] : memref<5x128xf32, #tpu.memory_space<vmem>>, vector<1x128xf32>
    %12 = vector.shape_cast %11 : vector<1x128xf32> to vector<128xf32>
    %13 = vector.shape_cast %12 : vector<128xf32> to vector<1x1x128xf32>
    %c3 = arith.constant 3 : index
    %c0_4 = arith.constant 0 : index
    %14 = vector.load %arg3[%c3, %c0_4] : memref<5x128xf32, #tpu.memory_space<vmem>>, vector<1x128xf32>
    %15 = vector.shape_cast %14 : vector<1x128xf32> to vector<128xf32>
    %16 = vector.shape_cast %15 : vector<128xf32> to vector<1x1x128xf32>
    %c4 = arith.constant 4 : index
    %c0_5 = arith.constant 0 : index
    %17 = vector.load %arg3[%c4, %c0_5] : memref<5x128xf32, #tpu.memory_space<vmem>>, vector<1x128xf32>
    %18 = vector.shape_cast %17 : vector<1x128xf32> to vector<128xf32>
    %19 = vector.shape_cast %18 : vector<128xf32> to vector<1x1x128xf32>
    %c0_i32_6 = arith.constant 0 : i32
    %c0_i32_7 = arith.constant 0 : i32
    %20 = tpu.memref_slice %arg2[%3, %c0_i32_6, %c0_i32_7] : memref<40x18x128xf32, #tpu.memory_space<any>> -> memref<12x18x128xf32, #tpu.memory_space<any>>
    tpu.wait_dma2 semaphore(%arg8 : memref<!tpu.dma_semaphore, #tpu.memory_space<semaphore_mem>>) src(%20 : memref<12x18x128xf32, #tpu.memory_space<any>>) dst(%arg7 : memref<12x18x128xf32, #tpu.memory_space<vmem>>)
    %c0_8 = arith.constant 0 : index
    %c0_9 = arith.constant 0 : index
    %c0_10 = arith.constant 0 : index
    %21 = vector.load %arg7[%c0_8, %c0_9, %c0_10] : memref<12x18x128xf32, #tpu.memory_space<vmem>>, vector<12x18x128xf32>
    %22 = vector.broadcast %7 : vector<1x1x128xf32> to vector<12x18x128xf32>
    %23 = arith.mulf %21, %22 : vector<12x18x128xf32>
    %24 = vector.broadcast %10 : vector<1x1x128xf32> to vector<12x18x128xf32>
    %25 = arith.addf %23, %24 : vector<12x18x128xf32>
    %cst = arith.constant 0.000000e+00 : f32
    %26 = vector.broadcast %cst : f32 to vector<12x18x128xf32>
    %27 = arith.cmpf oge, %25, %26 : vector<12x18x128xf32>
    %cst_11 = arith.constant 1.000000e-01 : f32
    %28 = vector.broadcast %cst_11 : f32 to vector<12x18x128xf32>
    %29 = arith.mulf %28, %25 : vector<12x18x128xf32>
    %30 = arith.select %27, %25, %29 : vector<12x18x128xi1>, vector<12x18x128xf32>
    %31 = tpu.iota {dimensions = array<i32: 0>} : vector<12x18x128xi32>
    %c2_i32 = arith.constant 2 : i32
    %32 = arith.subi %1, %c2_i32 : i32
    %33 = vector.broadcast %32 : i32 to vector<12x18x128xi32>
    %34 = arith.addi %31, %33 : vector<12x18x128xi32>
    %35 = tpu.iota {dimensions = array<i32: 1>} : vector<12x18x128xi32>
    %c1_i32 = arith.constant 1 : i32
    %36 = vector.broadcast %c1_i32 : i32 to vector<12x18x128xi32>
    %37 = arith.subi %35, %36 : vector<12x18x128xi32>
    %c0_i32_12 = arith.constant 0 : i32
    %38 = vector.broadcast %c0_i32_12 : i32 to vector<12x18x128xi32>
    %39 = arith.cmpi sge, %34, %38 : vector<12x18x128xi32>
    %c16_i32 = arith.constant 16 : i32
    %40 = vector.broadcast %c16_i32 : i32 to vector<12x18x128xi32>
    %41 = arith.cmpi slt, %34, %40 : vector<12x18x128xi32>
    %42 = arith.andi %39, %41 : vector<12x18x128xi1>
    %c0_i32_13 = arith.constant 0 : i32
    %43 = vector.broadcast %c0_i32_13 : i32 to vector<12x18x128xi32>
    %44 = arith.cmpi sge, %37, %43 : vector<12x18x128xi32>
    %45 = arith.andi %42, %44 : vector<12x18x128xi1>
    %c16_i32_14 = arith.constant 16 : i32
    %46 = vector.broadcast %c16_i32_14 : i32 to vector<12x18x128xi32>
    %47 = arith.cmpi slt, %37, %46 : vector<12x18x128xi32>
    %48 = arith.andi %45, %47 : vector<12x18x128xi1>
    %cst_15 = arith.constant 0.000000e+00 : f32
    %49 = vector.broadcast %cst_15 : f32 to vector<12x18x128xf32>
    %50 = arith.select %48, %30, %49 : vector<12x18x128xi1>, vector<12x18x128xf32>
    %51 = vector.extract_strided_slice %50 {offsets = [0, 0, 0], sizes = [10, 16, 128], strides = [1, 1, 1]} : vector<12x18x128xf32> to vector<10x16x128xf32>
    %52 = vector.extract_strided_slice %50 {offsets = [0, 1, 0], sizes = [10, 16, 128], strides = [1, 1, 1]} : vector<12x18x128xf32> to vector<10x16x128xf32>
    %53 = vector.extract_strided_slice %50 {offsets = [0, 2, 0], sizes = [10, 16, 128], strides = [1, 1, 1]} : vector<12x18x128xf32> to vector<10x16x128xf32>
    %54 = vector.extract_strided_slice %50 {offsets = [1, 0, 0], sizes = [10, 16, 128], strides = [1, 1, 1]} : vector<12x18x128xf32> to vector<10x16x128xf32>
    %55 = vector.extract_strided_slice %50 {offsets = [1, 1, 0], sizes = [10, 16, 128], strides = [1, 1, 1]} : vector<12x18x128xf32> to vector<10x16x128xf32>
    %56 = vector.extract_strided_slice %50 {offsets = [1, 2, 0], sizes = [10, 16, 128], strides = [1, 1, 1]} : vector<12x18x128xf32> to vector<10x16x128xf32>
    %57 = vector.extract_strided_slice %50 {offsets = [2, 0, 0], sizes = [10, 16, 128], strides = [1, 1, 1]} : vector<12x18x128xf32> to vector<10x16x128xf32>
    %58 = vector.extract_strided_slice %50 {offsets = [2, 1, 0], sizes = [10, 16, 128], strides = [1, 1, 1]} : vector<12x18x128xf32> to vector<10x16x128xf32>
    %59 = vector.extract_strided_slice %50 {offsets = [2, 2, 0], sizes = [10, 16, 128], strides = [1, 1, 1]} : vector<12x18x128xf32> to vector<10x16x128xf32>
    %60 = tpu.concatenate %51, %52, %53, %54, %55, %56, %57, %58, %59 in 2 : vector<10x16x128xf32>, vector<10x16x128xf32>, vector<10x16x128xf32>, vector<10x16x128xf32>, vector<10x16x128xf32>, vector<10x16x128xf32>, vector<10x16x128xf32>, vector<10x16x128xf32>, vector<10x16x128xf32> -> vector<10x16x1152xf32>
    %61 = vector.shape_cast %60 : vector<10x16x1152xf32> to vector<160x1152xf32>
    %c0_16 = arith.constant 0 : index
    %c0_17 = arith.constant 0 : index
    %62 = vector.load %arg4[%c0_16, %c0_17] : memref<1152x128xf32, #tpu.memory_space<vmem>>, vector<1152x128xf32>
    %cst_18 = arith.constant dense<0.000000e+00> : vector<160x128xf32>
    %63 = tpu.matmul %61, %62, %cst_18 {dimension_numbers = #tpu.dot_dimension_numbers<[1], [0], [0], [1], [0, 0, 1, 1], [], []>} : vector<160x1152xf32>, vector<1152x128xf32>, vector<160x128xf32> -> vector<160x128xf32>
    %64 = vector.shape_cast %63 : vector<160x128xf32> to vector<10x16x128xf32>
    %65 = vector.broadcast %13 : vector<1x1x128xf32> to vector<10x16x128xf32>
    %66 = arith.addf %64, %65 : vector<10x16x128xf32>
    %67 = vector.broadcast %16 : vector<1x1x128xf32> to vector<10x16x128xf32>
    %68 = arith.mulf %66, %67 : vector<10x16x128xf32>
    %69 = vector.broadcast %19 : vector<1x1x128xf32> to vector<10x16x128xf32>
    %70 = arith.addf %68, %69 : vector<10x16x128xf32>
    %cst_19 = arith.constant 0.000000e+00 : f32
    %71 = vector.broadcast %cst_19 : f32 to vector<10x16x128xf32>
    %72 = arith.cmpf oge, %70, %71 : vector<10x16x128xf32>
    %cst_20 = arith.constant 1.000000e-01 : f32
    %73 = vector.broadcast %cst_20 : f32 to vector<10x16x128xf32>
    %74 = arith.mulf %73, %70 : vector<10x16x128xf32>
    %75 = arith.select %72, %70, %74 : vector<10x16x128xi1>, vector<10x16x128xf32>
    %76 = tpu.iota {dimensions = array<i32: 0>} : vector<10x16x128xi32>
    %c1_i32_21 = arith.constant 1 : i32
    %77 = arith.subi %1, %c1_i32_21 : i32
    %78 = vector.broadcast %77 : i32 to vector<10x16x128xi32>
    %79 = arith.addi %76, %78 : vector<10x16x128xi32>
    %c0_i32_22 = arith.constant 0 : i32
    %80 = vector.broadcast %c0_i32_22 : i32 to vector<10x16x128xi32>
    %81 = arith.cmpi sge, %79, %80 : vector<10x16x128xi32>
    %c16_i32_23 = arith.constant 16 : i32
    %82 = vector.broadcast %c16_i32_23 : i32 to vector<10x16x128xi32>
    %83 = arith.cmpi slt, %79, %82 : vector<10x16x128xi32>
    %84 = arith.andi %81, %83 : vector<10x16x128xi1>
    %cst_24 = arith.constant 0.000000e+00 : f32
    %85 = vector.broadcast %cst_24 : f32 to vector<10x16x128xf32>
    %86 = arith.select %84, %75, %85 : vector<10x16x128xi1>, vector<10x16x128xf32>
    %cst_25 = arith.constant 0.000000e+00 : f32
    %87 = vector.broadcast %cst_25 : f32 to vector<10x1x128xf32>
    %88 = tpu.concatenate %87, %86, %87 in 1 : vector<10x1x128xf32>, vector<10x16x128xf32>, vector<10x1x128xf32> -> vector<10x18x128xf32>
    %89 = vector.extract_strided_slice %88 {offsets = [0, 0, 0], sizes = [8, 16, 128], strides = [1, 1, 1]} : vector<10x18x128xf32> to vector<8x16x128xf32>
    %90 = vector.extract_strided_slice %88 {offsets = [0, 1, 0], sizes = [8, 16, 128], strides = [1, 1, 1]} : vector<10x18x128xf32> to vector<8x16x128xf32>
    %91 = vector.extract_strided_slice %88 {offsets = [0, 2, 0], sizes = [8, 16, 128], strides = [1, 1, 1]} : vector<10x18x128xf32> to vector<8x16x128xf32>
    %92 = vector.extract_strided_slice %88 {offsets = [1, 0, 0], sizes = [8, 16, 128], strides = [1, 1, 1]} : vector<10x18x128xf32> to vector<8x16x128xf32>
    %93 = vector.extract_strided_slice %88 {offsets = [1, 1, 0], sizes = [8, 16, 128], strides = [1, 1, 1]} : vector<10x18x128xf32> to vector<8x16x128xf32>
    %94 = vector.extract_strided_slice %88 {offsets = [1, 2, 0], sizes = [8, 16, 128], strides = [1, 1, 1]} : vector<10x18x128xf32> to vector<8x16x128xf32>
    %95 = vector.extract_strided_slice %88 {offsets = [2, 0, 0], sizes = [8, 16, 128], strides = [1, 1, 1]} : vector<10x18x128xf32> to vector<8x16x128xf32>
    %96 = vector.extract_strided_slice %88 {offsets = [2, 1, 0], sizes = [8, 16, 128], strides = [1, 1, 1]} : vector<10x18x128xf32> to vector<8x16x128xf32>
    %97 = vector.extract_strided_slice %88 {offsets = [2, 2, 0], sizes = [8, 16, 128], strides = [1, 1, 1]} : vector<10x18x128xf32> to vector<8x16x128xf32>
    %98 = tpu.concatenate %89, %90, %91, %92, %93, %94, %95, %96, %97 in 2 : vector<8x16x128xf32>, vector<8x16x128xf32>, vector<8x16x128xf32>, vector<8x16x128xf32>, vector<8x16x128xf32>, vector<8x16x128xf32>, vector<8x16x128xf32>, vector<8x16x128xf32>, vector<8x16x128xf32> -> vector<8x16x1152xf32>
    %99 = vector.shape_cast %98 : vector<8x16x1152xf32> to vector<128x1152xf32>
    %c0_26 = arith.constant 0 : index
    %c0_27 = arith.constant 0 : index
    %100 = vector.load %arg5[%c0_26, %c0_27] : memref<1152x128xf32, #tpu.memory_space<vmem>>, vector<1152x128xf32>
    %cst_28 = arith.constant dense<0.000000e+00> : vector<128x128xf32>
    %101 = tpu.matmul %99, %100, %cst_28 {dimension_numbers = #tpu.dot_dimension_numbers<[1], [0], [0], [1], [0, 0, 1, 1], [], []>} : vector<128x1152xf32>, vector<1152x128xf32>, vector<128x128xf32> -> vector<128x128xf32>
    %102 = vector.shape_cast %101 : vector<128x128xf32> to vector<8x16x128xf32>
    %c2_29 = arith.constant 2 : index
    %c1_30 = arith.constant 1 : index
    %c0_31 = arith.constant 0 : index
    %103 = vector.load %arg7[%c2_29, %c1_30, %c0_31] : memref<12x18x128xf32, #tpu.memory_space<vmem>>, vector<8x16x128xf32>
    %104 = arith.addf %103, %102 : vector<8x16x128xf32>
    %c0_32 = arith.constant 0 : index
    %c0_33 = arith.constant 0 : index
    %c0_34 = arith.constant 0 : index
    %c0_35 = arith.constant 0 : index
    %105 = vector.load %arg6[%c0_32, %c0_33, %c0_34, %c0_35] : memref<1x8x16x128xf32, #tpu.memory_space<vmem>>, vector<1x8x16x128xf32>
    %106 = vector.shape_cast %105 : vector<1x8x16x128xf32> to vector<8x16x128xf32>
    %107 = vector.shape_cast %104 : vector<8x16x128xf32> to vector<1x8x16x128xf32>
    tpu.vector_store %arg6[%c0_32, %c0_33, %c0_34, %c0_35], %107 {strides = array<i32>} : memref<1x8x16x128xf32, #tpu.memory_space<vmem>>, vector<1x8x16x128xf32>,
    return
  }
  func.func @transform_1(%arg0: i32, %arg1: i32) -> (i32, i32) {
    %c0_i32 = arith.constant 0 : i32
    %c0_i32_0 = arith.constant 0 : i32
    %c0_i32_1 = arith.constant 0 : i32
    return %c0_i32, %c0_i32_0 : i32, i32
  }
  func.func @transform_2(%arg0: i32, %arg1: i32) -> (i32, i32) {
    %c0_i32 = arith.constant 0 : i32
    %c0_i32_0 = arith.constant 0 : i32
    %c0_i32_1 = arith.constant 0 : i32
    return %c0_i32, %c0_i32_0 : i32, i32
  }
  func.func @transform_3(%arg0: i32, %arg1: i32) -> (i32, i32) {
    %c0_i32 = arith.constant 0 : i32
    %c0_i32_0 = arith.constant 0 : i32
    %c0_i32_1 = arith.constant 0 : i32
    return %c0_i32, %c0_i32_0 : i32, i32
  }
  func.func @transform_4(%arg0: i32, %arg1: i32) -> (i32, i32, i32, i32) {
    %c0_i32 = arith.constant 0 : i32
    %c0_i32_0 = arith.constant 0 : i32
    %c0_i32_1 = arith.constant 0 : i32
    return %arg0, %arg1, %c0_i32, %c0_i32_0 : i32, i32, i32, i32
  }
}

</mosaic_0001>

<bundles_post_ra>
// kernel: tpu_custom_call.1
= control target key start
LH: loop header
LB: loop body
LE: loop exit
PB: predicated region body
PF: predicated region fallthrough
CT: control target
= control target key end

     0   :  { %9 = vsyncpa [#allocation5], 0  ;;  %s6436_s0 = inlined_call_operand.vmem [shape: f32[40,18,128], index: 0, kind: input, shape index: {}]   ;;  %s6437_s1 = inlined_call_operand.vmem [shape: f32[5,128], index: 1, kind: input, shape index: {}]   ;;  %s6438_s2 = inlined_call_operand.vmem [shape: f32[1152,128], index: 2, kind: input, shape index: {}]   ;;  %s6439_s3 = inlined_call_operand.hbm [shape: f32[1152,128], index: 3, kind: input, shape index: {}]   ;;  %s6440_s4 = inlined_call_operand.hbm [shape: f32[2,16,16,128], index: 4, kind: output, shape index: {}]  }
   0x1   :  { %10 = vsyncpa [#allocation6], 0 }
   0x2   :  { %12 = vsyncpa [#allocation6 + $0x1], 0  ;;  %s3516_s15 = smov 0   ;;  %s3518_s16 = smov 0  }
   0x3   :  { %s3520_s17 = smov 0   ;;  %s3522_s18 = smov 0  }
   0x4   :  { %s3524_s19 = smov 0   ;;  %s3526_s20 = smov 0  }
   0x5   :  { %s3528_s21 = smov 0   ;;  %s3530_s22 = smov 0  }
   0x6 LB: > { %s3062_s23 = sadd.s32 4294967295, %s3484_s22   ;;  %s3063_s24 = sadd.s32 4294967294, %s3484_s22   ;;  %s3484_s22 = sphi %s3530_s22, %s18_s22   ;;  %s3480_s21 = sphi %s3528_s21, %s6948_s21   ;;  %s3476_s20 = sphi %s3526_s20, %s6947_s20   ;;  %s3472_s19 = sphi %s3524_s19, %s6946_s19   ;;  %s3468_s18 = sphi %s3522_s18, %s6945_s18   ;;  %s3464_s17 = sphi %s3520_s17, %s6944_s17   ;;  %s3460_s16 = sphi %s3518_s16, %s6943_s16   ;;  %s3456_s15 = sphi %s3516_s15, %s6942_s15  }
   0x7   : > { %s27_s25 = sadd.s32 1, %s3476_s20  ;;  %s30_s26 = sadd.s32 1, %s3480_s21 }
   0x8   : > { %p28_p0 = scmp.ge.s32.totalorder %s27_s25, 2  ;;  %s102_s27 = sadd.s32 1, %s3464_s17 }
   0x9   : > { %p112_p1 = scmp.ne.s32.totalorder %s3464_s17, %s3460_s16  ;;  %p113_p2 = scmp.eq.s32.totalorder %s3062_s23, 3 }
   0xa   : > { %s6950_s25 = smov (%p28_p0, %s27_s25), 0  ;;  %s6952_s26 = smov (!%p28_p0, %s30_s26), %s3480_s21 }
   0xb   : > { %s98_s28 = ssub.s32 %s3476_s20, %s6950_s25  ;;  %p3568_p3 = por %p113_p2, %p112_p1 }
   0xc   : > { %p32_p4 = scmp.ge.s32.totalorder %s6952_s26, 2  ;;  %p118_p5 = scmp.ne.s32.totalorder %s3460_s16, %s3456_s15 }
   0xd   : > { %p119_p6 = scmp.eq.s32.totalorder %s3063_s24, 3  ;;  %p3064_p7 = scmp.ge.s32.totalorder %s3484_s22, 1 }
   0xe   : > { %s6954_s26 = smov (%p32_p4, %s6952_s26), 0  ;;  %p126_p9 = scmp.lt.s32.totalorder %s3484_s22, 5 }
   0xf   : > { %p3577_p8 = por %p119_p6, %p118_p5  ;;  %s97_s5 = ssub.s32 %s3480_s21, %s6954_s26 }
  0x10   : > { %s99_s6 = sor.u32 %s98_s28, %s97_s5  ;;  %p3584_p10 = pnand %p3064_p7, %p126_p9 }
  0x11   : > { %p100_p11 = scmp.eq.s32.totalorder %s99_s6, 0  ;;  %p3588_p12 = scmp.eq.s32.totalorder %s3062_s23, 0 }
  0x12   : > { %p3258_p13 = pneg %p3584_p10  ;;  %s143_s11 = sshll.u32 %s6439_s3, 4  ;;  %s144_s11 = int_to_ptr.hbm [resolvable:$true] %s143_s11 }
  0x13   : > { %s3598_s12 = scalar_select %p100_p11, %s3464_s17, %s102_s27  }
  0x14   : > { %s3486_s13 = smov [#allocation4]   ;;  %p3259_p0 = pnand %p3588_p12, %p3258_p13 }
  0x15   : > { %s145_s14 = sshll.u32 %s3486_s13, 4  ;;  %s3487_s24 = smov 128   ;;  %s146_s14 = int_to_ptr.vmem [resolvable:$true] %s145_s14 }
  0x16   : > { %s3488_s23 = smov 8   ;;  %161 = sbr.rel (%p3584_p10) target bundleno = 1155 (0x483), region = 32 }
  0x17   : > { %3261 = dma.hbm_to_vmem [thread:$0]  (!%p3259_p0), %s144_s11, 18432, %s146_s14, [#allocation5], %s3487_s24, %s3487_s24, %s3488_s23  }
  0x1b   : > { %3445 = dma.done.wait (%p3588_p12), [#allocation5], 18432  }
  0x1c   : > { %3447 = vsyncadd (%p3588_p12), [#allocation5], 4294948864  ;;  %s178_s27 = sand.u32 1, %s3460_s16   ;;  %s3610_s28 = sshll.u32 %s3468_s18, 3 }
  0x1d   : > { %s3614_s5 = sshll.u32 %s178_s27, 7  ;;  %s183_s6 = smul.u32 20, %s3472_s19 }
  0x1e   : > { %s3660_s8 = scalar_lea.vmem [#allocation7], %s3614_s5 }
  0x1f   : > { %s184_s7 = sadd.s32 %s3610_s28, %s183_s6 }
  0x20   : > { %s185_s9 = smul.u32 24, %s184_s7 }
  0x22   : > { %s3621_s13 = scalar_lea.vmem %s6436_s0, %s185_s9 }
  0x23   : > { %v199_v0 = vld [vmem:[%s3621_s13] sm:$0xff]  ;;  %v201_v1 = vld [vmem:[%s3621_s13 + $0x8] sm:$0xff]  ;;  %v203_v2 = vld [vmem:[%s3621_s13 + $0x18] sm:$0xff] }
  0x24   : > { %200 = vst [vmem:[#allocation2] sm:$0xff] %v199_v0  ;;  %v205_v3 = vld [vmem:[%s3621_s13 + $0x20] sm:$0xff]  ;;  %v207_v4 = vld [vmem:[%s3621_s13 + $0x30] sm:$0xff]  ;;  %v209_v5 = vld [vmem:[%s3621_s13 + $0x38] sm:$0xff] }
  0x25   : > { %202 = vst [vmem:[#allocation2 + $0x8] sm:$0xff] %v201_v1  ;;  %v211_v6 = vld [vmem:[%s3621_s13 + $0x48] sm:$0xff]  ;;  %v213_v7 = vld [vmem:[%s3621_s13 + $0x50] sm:$0xff]  ;;  %v215_v8 = vld [vmem:[%s3621_s13 + $0x60] sm:$0xff] }
  0x26   : > { %204 = vst [vmem:[#allocation2 + $0x18] sm:$0xff] %v203_v2  ;;  %v217_v9 = vld [vmem:[%s3621_s13 + $0x68] sm:$0xff]  ;;  %v219_v10 = vld [vmem:[%s3621_s13 + $0x78] sm:$0xff]  ;;  %v221_v11 = vld [vmem:[%s3621_s13 + $0x80] sm:$0xff] }
  0x27   : > { %206 = vst [vmem:[#allocation2 + $0x20] sm:$0xff] %v205_v3  ;;  %v223_v12 = vld [vmem:[%s3621_s13 + $0x90] sm:$0xff]  ;;  %v225_v13 = vld [vmem:[%s3621_s13 + $0x98] sm:$0xff]  ;;  %v227_v14 = vld [vmem:[%s3621_s13 + $0xa8] sm:$0xff] }
  0x28   : > { %208 = vst [vmem:[#allocation2 + $0x30] sm:$0xff] %v207_v4  ;;  %v229_v15 = vld [vmem:[%s3621_s13 + $0xb0] sm:$0xff]  ;;  %v231_v16 = vld [vmem:[%s3621_s13 + $0xc0] sm:$0xff]  ;;  %v233_v17 = vld [vmem:[%s3621_s13 + $0xc8] sm:$0xff] }
  0x29   : > { %210 = vst [vmem:[#allocation2 + $0x38] sm:$0xff] %v209_v5  ;;  %v235_v18 = vld [vmem:[%s3621_s13 + $0xd8] sm:$0xff]  ;;  %v237_v19 = vld [vmem:[%s3621_s13 + $0xe0] sm:$0xff]  ;;  %v239_v20 = vld [vmem:[%s3621_s13 + $0xf0] sm:$0xff] }
  0x2a   : > { %212 = vst [vmem:[#allocation2 + $0x48] sm:$0xff] %v211_v6  ;;  %v241_v21 = vld [vmem:[%s3621_s13 + $0xf8] sm:$0xff]  ;;  %v243_v22 = vld [vmem:[%s3621_s13 + $0x108] sm:$0xff]  ;;  %v245_v23 = vld [vmem:[%s3621_s13 + $0x110] sm:$0xff] }
  0x2b   : > { %214 = vst [vmem:[#allocation2 + $0x50] sm:$0xff] %v213_v7  ;;  %v3070_v24 = vld [vmem:[%s3621_s13 + $0x10] sm:$0x3]  ;;  %v3071_v25 = vld [vmem:[%s3621_s13 + $0x28] sm:$0x3] }
  0x2c   : > { %216 = vst [vmem:[#allocation2 + $0x60] sm:$0xff] %v215_v8  ;;  %v3072_v26 = vld [vmem:[%s3621_s13 + $0x40] sm:$0x3]  ;;  %v3073_v27 = vld [vmem:[%s3621_s13 + $0x58] sm:$0x3] }
  0x2d   : > { %218 = vst [vmem:[#allocation2 + $0x68] sm:$0xff] %v217_v9  ;;  %v3074_v28 = vld [vmem:[%s3621_s13 + $0x70] sm:$0x3]  ;;  %v3075_v29 = vld [vmem:[%s3621_s13 + $0x88] sm:$0x3] }
  0x2e   : > { %220 = vst [vmem:[#allocation2 + $0x78] sm:$0xff] %v219_v10  ;;  %v3076_v30 = vld [vmem:[%s3621_s13 + $0xa0] sm:$0x3]  ;;  %v3077_v31 = vld [vmem:[%s3621_s13 + $0xb8] sm:$0x3] }
  0x2f   : > { %222 = vst [vmem:[#allocation2 + $0x80] sm:$0xff] %v221_v11  ;;  %v3078_v32 = vld [vmem:[%s3621_s13 + $0xd0] sm:$0x3]  ;;  %v3079_v33 = vld [vmem:[%s3621_s13 + $0xe8] sm:$0x3] }
  0x30   : > { %224 = vst [vmem:[#allocation2 + $0x90] sm:$0xff] %v223_v12  ;;  %v3080_v34 = vld [vmem:[%s3621_s13 + $0x100] sm:$0x3]  ;;  %v3081_v35 = vld [vmem:[%s3621_s13 + $0x118] sm:$0x3] }
  0x31   : > { %226 = vst [vmem:[#allocation2 + $0x98] sm:$0xff] %v225_v13 }
  0x32   : > { %228 = vst [vmem:[#allocation2 + $0xa8] sm:$0xff] %v227_v14 }
  0x33   : > { %230 = vst [vmem:[#allocation2 + $0xb0] sm:$0xff] %v229_v15 }
  0x34   : > { %232 = vst [vmem:[#allocation2 + $0xc0] sm:$0xff] %v231_v16 }
  0x35   : > { %234 = vst [vmem:[#allocation2 + $0xc8] sm:$0xff] %v233_v17 }
  0x36   : > { %236 = vst [vmem:[#allocation2 + $0xd8] sm:$0xff] %v235_v18 }
  0x37   : > { %238 = vst [vmem:[#allocation2 + $0xe0] sm:$0xff] %v237_v19 }
  0x38   : > { %240 = vst [vmem:[#allocation2 + $0xf0] sm:$0xff] %v239_v20 }
  0x39   : > { %242 = vst [vmem:[#allocation2 + $0xf8] sm:$0xff] %v241_v21 }
  0x3a   : > { %244 = vst [vmem:[#allocation2 + $0x108] sm:$0xff] %v243_v22 }
  0x3b   : > { %246 = vst [vmem:[#allocation2 + $0x110] sm:$0xff] %v245_v23 }
  0x3c   : > { %258 = vst [vmem:[#allocation2 + $0x10] sm:$0x3] %v3070_v24 }
  0x3d   : > { %260 = vst [vmem:[#allocation2 + $0x28] sm:$0x3] %v3071_v25 }
  0x3e   : > { %262 = vst [vmem:[#allocation2 + $0x40] sm:$0x3] %v3072_v26 }
  0x3f   : > { %264 = vst [vmem:[#allocation2 + $0x58] sm:$0x3] %v3073_v27 }
  0x40   : > { %266 = vst [vmem:[#allocation2 + $0x70] sm:$0x3] %v3074_v28 }
  0x41   : > { %268 = vst [vmem:[#allocation2 + $0x88] sm:$0x3] %v3075_v29 }
  0x42   : > { %270 = vst [vmem:[#allocation2 + $0xa0] sm:$0x3] %v3076_v30 }
  0x43   : > { %272 = vst [vmem:[#allocation2 + $0xb8] sm:$0x3] %v3077_v31 }
  0x44   : > { %274 = vst [vmem:[#allocation2 + $0xd0] sm:$0x3] %v3078_v32 }
  0x45   : > { %276 = vst [vmem:[#allocation2 + $0xe8] sm:$0x3] %v3079_v33 }
  0x46   : > { %278 = vst [vmem:[#allocation2 + $0x100] sm:$0x3] %v3080_v34 }
  0x47   : > { %280 = vst [vmem:[#allocation2 + $0x118] sm:$0x3] %v3081_v35 }
  0x48   : > { %284 = vsyncadd [#allocation3], 3456  ;;  %v285_v36 = vld [vmem:[%s6437_s1] sm:$0x1]  ;;  %v286_v37 = vld [vmem:[%s6437_s1 + $0x1] sm:$0x1] }
  0x49   : > { %v3671_v38 = vld [vmem:[%s6437_s1 + $0x2] sm:$0x1]  ;;  %v3676_v39 = vld [vmem:[%s6437_s1 + $0x3] sm:$0x1]  ;;  %v3681_v40 = vld [vmem:[%s6437_s1 + $0x4] sm:$0x1] }
  0x4a   : > { %6530 = vst [vmem:[#allocation12_spill] sm:$0xff] %v3671_v38 }
  0x4b   : > { %6531 = vst [vmem:[#allocation13_spill] sm:$0xff] %v3676_v39 }
  0x4c   : > { %6532 = vst [vmem:[#allocation14_spill] sm:$0xff] %v3681_v40 }
  0x4d   : > { %3448 = dma.done.wait [#allocation3], 3456 }
  0x4e   : > { %3449 = vsyncadd [#allocation3], 4294963840  ;;  %v525_v41 = vlaneseq  ;;  %v903_v42 = vld [vmem:[%s6438_s2 + $0x78] sm:$0xff]  ;;  %v902_v44 = vld [vmem:[%s6438_s2 + $0x70] sm:$0xff]  ;;  %s3082_s5 = sadd.s32 4294967294, %s3610_s28  ;;  %v3716_v55 = vperm.slane %v285_v36, 0 }
  0x4f   : > { %v919_v43 = vld [vmem:[%s6438_s2 + $0xf8] sm:$0xff]  ;;  %1032 = vmatpush.msra.mxu0 %v903_v42  ;;  %v918_v46 = vld [vmem:[%s6438_s2 + $0xf0] sm:$0xff]  ;;  %v901_v47 = vld [vmem:[%s6438_s2 + $0x68] sm:$0xff]  ;;  %v3708_v51 = vstv %s3082_s5  ;;  %v3736_v62 = vperm.slane %v286_v37, 0  ;;  %vm6441_vm15 = vcmask 1046528   ;;  %s3146_s14 = sadd.s32 4294967295, %s3610_s28 }
  0x50   : > { %v526_v45 = vshrl.u32 %v525_v41, 7  ;;  %1109 = vmatpush.msra.mxu1 %v919_v43  ;;  %3204 = vmatpush.msra.mxu3 %v919_v43  ;;  %v917_v48 = vld [vmem:[%s6438_s2 + $0xe8] sm:$0xff]  ;;  %v900_v49 = vld [vmem:[%s6438_s2 + $0x60] sm:$0xff]  ;;  %6533 = vst [vmem:[#allocation15_spill] sm:$0xff] %v3708_v51  ;;  %v899_v53 = vld [vmem:[%s6438_s2 + $0x58] sm:$0xff]  ;;  %v3721_v57 = vadd.s32 6, %v3708_v51 }
  0x51   : > { %1033 = vmatpush.msra.mxu0 %v902_v44  ;;  %v916_v50 = vld [vmem:[%s6438_s2 + $0xe0] sm:$0xff]  ;;  %v915_v54 = vld [vmem:[%s6438_s2 + $0xd8] sm:$0xff]  ;;  %v898_v58 = vld [vmem:[%s6438_s2 + $0x50] sm:$0xff]  ;;  %vm532_vm0 = vcmp.ge.s32.totalorder %v3708_v51, 0  ;;  %vm544_vm1 = vcmp.lt.s32.totalorder %v3708_v51, 16  ;;  %v3734_v61 = vadd.s32 7, %v3708_v51 }
  0x52   : > { %1110 = vmatpush.msra.mxu1 %v918_v46  ;;  %3205 = vmatpush.msra.mxu3 %v918_v46  ;;  %v528_v52 = vadd.s32 16, %v526_v45  ;;  %v3718_v56 = vadd.s32 4294967295, %v526_v45  ;;  %v914_v59 = vld [vmem:[%s6438_s2 + $0xd0] sm:$0xff]  ;;  %v897_v63 = vld [vmem:[%s6438_s2 + $0x48] sm:$0xff]  ;;  %v294_v1 = vld [vmem:[#allocation2] sm:$0xff]  ;;  %vm538_vm4 = vcmp.ge.s32.totalorder %v3721_v57, 0 }
  0x53   : > { %1034 = vmatpush.msra.mxu0 %v901_v47  ;;  %v913_v0 = vld [vmem:[%s6438_s2 + $0xc8] sm:$0xff]  ;;  %v331_v2 = vmul.f32 %v3716_v55, %v294_v1  ;;  %vm3745_vm2 = vmand %vm532_vm0, %vm544_vm1  ;;  %v313_v5 = vld [vmem:[#allocation2 + $0x98] sm:$0xff]  ;;  %vm550_vm5 = vcmp.lt.s32.totalorder %v3721_v57, 16  ;;  %vm539_vm7 = vcmp.ge.s32.totalorder %v3734_v61, 0  ;;  %vm551_vm8 = vcmp.lt.s32.totalorder %v3734_v61, 16  ;;  %s3203_s28 = sshll.u32 %s3468_s18, 4 }
  0x54   : > { %1111 = vmatpush.msra.mxu1 %v917_v48  ;;  %3206 = vmatpush.msra.mxu3 %v917_v48  ;;  %v3729_v60 = vadd.s32 4294967295, %v528_v52  ;;  %vm6456_vm3 = vcmp.ge.s32.totalorder %v3718_v56, 0  ;;  %v295_v4 = vld [vmem:[#allocation2 + $0x8] sm:$0xff]  ;;  %v896_v6 = vld [vmem:[%s6438_s2 + $0x40] sm:$0xff]  ;;  %v350_v10 = vmul.f32 %v3716_v55, %v313_v5  ;;  %v3767_v13 = vld [vmem:[%s6438_s2 + $0x178] sm:$0xff]  ;;  %v3771_v16 = vadd.s32 1, %v3708_v51 }
  0x55   : > { %1035 = vmatpush.msra.mxu0 %v900_v49  ;;  %v912_v7 = vld [vmem:[%s6438_s2 + $0xc0] sm:$0xff]  ;;  %v332_v8 = vmul.f32 %v3716_v55, %v295_v4  ;;  %v368_v11 = vadd.f32 %v3736_v62, %v331_v2  ;;  %v296_v14 = vld [vmem:[#allocation2 + $0x10] sm:$0x3]  ;;  %v315_v15 = vld [vmem:[#allocation2 + $0xa8] sm:$0xff]  ;;  %3220 = vmatpush.msra.mxu2 %v3767_v13  ;;  %s3198_s24 = sshll.u32 %s3472_s19, 5  ;;  %s2964_s7 = sshll.u32 %s3660_s8, 4  ;;  %s2965_s7 = int_to_ptr.vmem [resolvable:$true] %s2964_s7 }
  0x56   : > { %1112 = vmatpush.msra.mxu1 %v916_v50  ;;  %3207 = vmatpush.msra.mxu3 %v916_v50  ;;  %6534 = vst [vmem:[#allocation16_spill] sm:$0xff] %v3729_v60  ;;  %vm6457_vm6 = vcmp.lt.s32.totalorder %v3729_v60, 16  ;;  %v314_v9 = vld [vmem:[#allocation2 + $0xa0] sm:$0x3]  ;;  %v895_v17 = vld [vmem:[%s6438_s2 + $0x38] sm:$0xff]  ;;  %v387_v20 = vadd.f32 %v3736_v62, %v350_v10  ;;  %v333_v21 = vmul.f32 %v3716_v55, %v296_v14  ;;  %v316_v22 = vld [vmem:[#allocation2 + $0xb0] sm:$0xff]  ;;  %s2961_s5 = sadd.s32 %s3203_s28, %s3198_s24 }
  0x57   : > { %1036 = vmatpush.msra.mxu0 %v899_v53  ;;  %v351_v12 = vmul.f32 %v3716_v55, %v314_v9  ;;  %v911_v18 = vld [vmem:[%s6438_s2 + $0xb8] sm:$0xff]  ;;  %v369_v19 = vadd.f32 %v3736_v62, %v332_v8  ;;  %v352_v23 = vmul.f32 %v3716_v55, %v315_v15  ;;  %v894_v24 = vld [vmem:[%s6438_s2 + $0x30] sm:$0xff]  ;;  %vm404_vm9 = vcmp.ge.f32.partialorder %v368_v11, 0.0  ;;  %vm3800_vm12 = vmand %vm538_vm4, %vm550_vm5  ;;  %s3199_s23 = sshll.u32 %s2961_s5, 3  ;;  %s2949_s10 = scalar_lea.sflag [#allocation6], %s178_s27 }
  0x58   : > { %1113 = vmatpush.msra.mxu1 %v915_v54  ;;  %3208 = vmatpush.msra.mxu3 %v915_v54  ;;  %v910_v25 = vld [vmem:[%s6438_s2 + $0xb0] sm:$0xff]  ;;  %v440_v26 = vmul.f32 0.1, %v368_v11  ;;  %v353_v28 = vmul.f32 %v3716_v55, %v316_v22  ;;  %vm423_vm11 = vcmp.ge.f32.partialorder %v387_v20, 0.0  ;;  %v459_v31 = vmul.f32 0.1, %v387_v20  ;;  %vm3811_vm13 = vmand %vm3745_vm2, %vm6456_vm3  ;;  %s2963_s19 = scalar_lea.hbm %s6440_s4, %s3199_s23 }
  0x59   : > { %1037 = vmatpush.msra.mxu0 %v898_v58  ;;  %v388_v27 = vadd.f32 %v3736_v62, %v351_v12  ;;  %v3794_v29 = vld [vmem:[%s6438_s2 + $0x170] sm:$0xff]  ;;  %vm405_vm10 = vcmp.ge.f32.partialorder %v369_v19, 0.0  ;;  %v441_v30 = vmul.f32 0.1, %v369_v19  ;;  %v370_v36 = vadd.f32 %v3736_v62, %v333_v21  ;;  %v3819_v37 = vld [vmem:[%s6438_s2 + $0x168] sm:$0xff]  ;;  %v892_v46 = vld [vmem:[%s6438_s2 + $0x20] sm:$0xff] }
  0x5a   : > { %1114 = vmatpush.msra.mxu1 %v914_v59  ;;  %3209 = vmatpush.msra.mxu3 %v914_v59  ;;  %v3805_v33 = vsel %vm404_vm9, %v368_v11, %v440_v26  ;;  %v893_v41 = vld [vmem:[%s6438_s2 + $0x28] sm:$0xff]  ;;  %v3831_v44 = vsel %vm423_vm11, %v387_v20, %v459_v31  ;;  %v389_v45 = vadd.f32 %v3736_v62, %v352_v23  ;;  %vm3842_vm0 = vmand %vm3800_vm12, %vm6457_vm6  ;;  %v297_v49 = vld [vmem:[#allocation2 + $0x18] sm:$0xff]  ;;  %v6544_v54 = vmov 0  ;;  %s2966_s9 = sshll.u32 %s2963_s19, 4  ;;  %s3404_s24 = scalar_lea.hbm %s6440_s4, 512  ;;  %s2967_s9 = int_to_ptr.hbm [resolvable:$true] %s2966_s9 }
  0x5b   : > { %1038 = vmatpush.msra.mxu0 %v897_v63  ;;  %vm424_vm14 = vcmp.ge.f32.partialorder %v388_v27, 0.0  ;;  %v460_v35 = vmul.f32 0.1, %v388_v27  ;;  %v909_v42 = vld [vmem:[%s6438_s2 + $0xa8] sm:$0xff]  ;;  %v3828_v43 = vsel %vm405_vm10, %v369_v19, %v441_v30  ;;  %3221 = vmatpush.msra.mxu2 %v3794_v29  ;;  %v908_v50 = vld [vmem:[%s6438_s2 + $0xa0] sm:$0xff]  ;;  %v891_v52 = vld [vmem:[%s6438_s2 + $0x18] sm:$0xff]  ;;  %v390_v63 = vadd.f32 %v3736_v62, %v353_v28 }
  0x5c   : > { %1115 = vmatpush.msra.mxu1 %v913_v0  ;;  %3210 = vmatpush.msra.mxu3 %v913_v0  ;;  %v3855_v53 = vsel %vm3811_vm13, %v3805_v33, 0.0  ;;  %vm406_vm1 = vcmp.ge.f32.partialorder %v370_v36, 0.0  ;;  %vm3861_vm4 = vmand %vm539_vm7, %vm551_vm8  ;;  %vm533_vm5 = vcmp.ge.s32.totalorder %v3771_v16, 0  ;;  %vm545_vm9 = vcmp.lt.s32.totalorder %v3771_v16, 16  ;;  %v907_v57 = vld [vmem:[%s6438_s2 + $0x98] sm:$0xff]  ;;  %v298_v0 = vld [vmem:[#allocation2 + $0x20] sm:$0xff] }
  0x5d   : > { %1039 = vmatpush.msra.mxu0 %v896_v6  ;;  %v496_v47 = vsel %vm424_vm14, %v388_v27, %v460_v35  ;;  %6543 = vst [vmem:[#allocation17_spill] sm:$0xff] %v3855_v53  ;;  %v6545_v54 = vsel %vm3861_vm4, 4294967295, %v6544_v54  ;;  %3222 = vmatpush.msra.mxu2 %v3819_v37  ;;  %v3874_v58 = vsel %vm3745_vm2, %v3828_v43, 0.0  ;;  %v3879_v59 = vsel %vm3800_vm12, %v3831_v44, 0.0  ;;  %vm3890_vm7 = vmand %vm3745_vm2, %vm6457_vm6  ;;  %v317_v6 = vld [vmem:[#allocation2 + $0xb8] sm:$0x3] }
  0x5e   : > { %1116 = vmatpush.msra.mxu1 %v912_v7  ;;  %3211 = vmatpush.msra.mxu3 %v912_v7  ;;  %6546 = vst [vmem:[#allocation18_spill] sm:$0xff] %v3874_v58  ;;  %v442_v61 = vmul.f32 0.1, %v370_v36  ;;  %v3884_v1 = vsel %vm3842_vm0, %v496_v47, 0.0  ;;  %vm425_vm8 = vcmp.ge.f32.partialorder %v389_v45, 0.0  ;;  %v334_v5 = vmul.f32 %v3716_v55, %v297_v49  ;;  %vm3901_vm11 = vmand %vm3861_vm4, %vm6456_vm3  ;;  %v890_v11 = vld [vmem:[%s6438_s2 + $0x10] sm:$0xff] }
  0x5f   : > { %1040 = vmatpush.msra.mxu0 %v895_v17  ;;  %v461_v4 = vmul.f32 0.1, %v389_v45  ;;  %v713_v7 = vrot.slane %v3855_v53, 1  ;;  %vm426_vm10 = vcmp.ge.f32.partialorder %v390_v63, 0.0  ;;  %v462_v9 = vmul.f32 0.1, %v390_v63  ;;  %vm3952_vm0 = vmand %vm533_vm5, %vm545_vm9 }
  0x60   : > { %1117 = vmatpush.msra.mxu1 %v911_v18  ;;  %3212 = vmatpush.msra.mxu3 %v911_v18  ;;  %v478_v8 = vsel %vm406_vm1, %v370_v36, %v442_v61  ;;  %v6549_v10 = vmov 0  ;;  %v906_v12 = vld [vmem:[%s6438_s2 + $0x90] sm:$0xff]  ;;  %v889_v14 = vld [vmem:[%s6438_s2 + $0x8] sm:$0xff]  ;;  %v714_v15 = vrot.slane %v3874_v58, 1  ;;  %v371_v18 = vadd.f32 %v3736_v62, %v334_v5  ;;  %v3928_v26 = vld [vmem:[%s6438_s2 + $0x160] sm:$0xff]  ;;  %s3398_s11 = sshra.s32 %s2967_s9, 4  ;;  %s3399_s11 = int_to_ptr.hbm [resolvable:$true] %s3398_s11 }
  0x61   : > { %1041 = vmatpush.msra.mxu0 %v894_v24  ;;  %v6550_v10 = vsel %vm3901_vm11, 4294967295, %v6549_v10  ;;  %v3916_v17 = vsel %vm425_vm8, %v389_v45, %v461_v4  ;;  %v335_v19 = vmul.f32 %v3716_v55, %v298_v0  ;;  %v6442_v20 = vrot.slane %v3879_v59, 1  ;;  %v299_v24 = vld [vmem:[#allocation2 + $0x28] sm:$0x3]  ;;  %3223 = vmatpush.msra.mxu2 %v3928_v26  ;;  %v888_v47 = vld [vmem:[%s6438_s2] sm:$0xff]  ;;  %vm3990_vm1 = vmand %vm3952_vm0, %vm6456_vm3  ;;  %s3400_s13 = scalar_lea.hbm %s3399_s11, 128  ;;  %p3405_p5 = scmp.lt.s32.totalorder %s3399_s11, %s6440_s4 }
  0x62   : > { %1118 = vmatpush.msra.mxu1 %v910_v25  ;;  %3213 = vmatpush.msra.mxu3 %v910_v25  ;;  %v746_v21 = vrot.slane %v3884_v1, 1  ;;  %v3922_v22 = vsel %vm426_vm10, %v390_v63, %v462_v9  ;;  %v354_v23 = vmul.f32 %v3716_v55, %v317_v6  ;;  %v318_v25 = vld [vmem:[#allocation2 + $0xc0] sm:$0xff]  ;;  %v905_v27 = vld [vmem:[%s6438_s2 + $0x88] sm:$0xff]  ;;  %v3935_v28 = vsel %vm3890_vm7, %v478_v8, 0.0  ;;  %v951_v9 = vld [vmem:[%s6438_s2 + $0x1f8] sm:$0xff]  ;;  %p3401_p1 = scmp.ne.s32.totalorder %s3399_s11, %s3400_s13  ;;  %p3406_p6 = scmp.lt.s32.totalorder %s3404_s24, %s3400_s13 }
  0x63   : > { %1042 = vmatpush.msra.mxu0 %v893_v41  ;;  %6551 = vst [vmem:[#allocation19_spill] sm:$0xff] %v3935_v28  ;;  %v3940_v30 = vsel %vm3901_vm11, %v3916_v17, 0.0  ;;  %v443_v31 = vmul.f32 0.1, %v371_v18  ;;  %v319_v35 = vld [vmem:[#allocation2 + $0xc8] sm:$0xff]  ;;  %v3946_v36 = vsel %vm3861_vm4, %v3922_v22, 0.0  ;;  %v715_v48 = vsel %vm6441_vm15, %v713_v7, %v714_v15 }
  0x64   : > { %1119 = vmatpush.msra.mxu1 %v909_v42  ;;  %3214 = vmatpush.msra.mxu3 %v909_v42  ;;  %vm407_vm14 = vcmp.ge.f32.partialorder %v371_v18, 0.0  ;;  %v372_v42 = vadd.f32 %v3736_v62, %v335_v19  ;;  %v391_v45 = vadd.f32 %v3736_v62, %v354_v23  ;;  %v904_v16 = vld [vmem:[%s6438_s2 + $0x80] sm:$0xff]  ;;  %v336_v49 = vmul.f32 %v3716_v55, %v299_v24  ;;  %v300_v19 = vld [vmem:[#allocation2 + $0x30] sm:$0xff]  ;;  %v301_v24 = vld [vmem:[#allocation2 + $0x38] sm:$0xff]  ;;  %p3402_p2 = pnand %p3401_p1, %p3568_p3  ;;  %p3407_p7 = por %p3406_p6, %p3405_p5 }
  0x65   : > { %1043 = vmatpush.msra.mxu0 %v892_v46  ;;  %v3961_v46 = vld [vmem:[%s6438_s2 + $0x158] sm:$0xff]  ;;  %v356_v63 = vmul.f32 %v3716_v55, %v319_v35  ;;  %v748_v0 = vrot.slane %v3940_v30, 1  ;;  %v749_v2 = vrot.slane %v3946_v36, 1  ;;  %v3984_v4 = vsel %vm407_vm14, %v371_v18, %v443_v31  ;;  %v950_v18 = vld [vmem:[%s6438_s2 + $0x1f0] sm:$0xff]  ;;  %v949_v35 = vld [vmem:[%s6438_s2 + $0x1e8] sm:$0xff] }
  0x66   : > { %1120 = vmatpush.msra.mxu1 %v908_v50  ;;  %3215 = vmatpush.msra.mxu3 %v908_v50  ;;  %v355_v50 = vmul.f32 %v3716_v55, %v318_v25  ;;  %v444_v61 = vmul.f32 0.1, %v372_v42  ;;  %vm408_vm5 = vcmp.ge.f32.partialorder %v372_v42, 0.0  ;;  %v463_v6 = vmul.f32 0.1, %v391_v45  ;;  %v4107_v3 = vld [vmem:[%s6438_s2 + $0x138] sm:$0xff]  ;;  %p3403_p4 = pneg %p3402_p2 }
  0x67   : > { %1044 = vmatpush.msra.mxu0 %v891_v52  ;;  %v3977_v52 = vsel %vm6441_vm15, %v6442_v20, %v746_v21  ;;  %3224 = vmatpush.msra.mxu2 %v3961_v46  ;;  %v373_v7 = vadd.f32 %v3736_v62, %v336_v49  ;;  %v521_v8 = vadd.s32 8, %v3708_v51  ;;  %vm427_vm9 = vcmp.ge.f32.partialorder %v391_v45, 0.0  ;;  %v320_v25 = vld [vmem:[#allocation2 + $0xd0] sm:$0x3]  ;;  %v303_v20 = vld [vmem:[#allocation2 + $0x48] sm:$0xff] }
  0x68   : > { %1121 = vmatpush.msra.mxu1 %v907_v57  ;;  %3216 = vmatpush.msra.mxu3 %v907_v57  ;;  %6554 = vst [vmem:[#allocation20_spill] sm:$0xff] %v3977_v52  ;;  %v716_v57 = vrot.slane %v3935_v28, 1  ;;  %v4018_v34 = vsel %vm408_vm5, %v372_v42, %v444_v61  ;;  %v4031_v23 = vsel %vm6441_vm15, %v748_v0, %v749_v2  ;;  %v302_v61 = vld [vmem:[#allocation2 + $0x40] sm:$0x3]  ;;  %v6562_v0 = vmov 0  ;;  %v942_v39 = vld [vmem:[%s6438_s2 + $0x1b0] sm:$0xff]  ;;  %p3408_p9 = pnand %p3407_p7, %p3403_p4 }
  0x69   : > { %1045 = vmatpush.msra.mxu0 %v890_v11  ;;  %v4004_v11 = vadd.f32 %v3736_v62, %v355_v50  ;;  %6558 = vst [vmem:[#allocation22_spill] sm:$0xff] %v4031_v23  ;;  %v499_v31 = vsel %vm427_vm9, %v391_v45, %v463_v6  ;;  %vm540_vm7 = vcmp.ge.s32.totalorder %v521_v8, 0  ;;  %vm552_vm8 = vcmp.lt.s32.totalorder %v521_v8, 16  ;;  %v4275_v28 = vld [vmem:[%s6438_s2 + $0x110] sm:$0xff] }
  0x6a   : > { %1122 = vmatpush.msra.mxu1 %v906_v12  ;;  %3217 = vmatpush.msra.mxu3 %v906_v12  ;;  %v4009_v12 = vld [vmem:[%s6438_s2 + $0x150] sm:$0xff]  ;;  %v717_v21 = vsel %vm6441_vm15, %v714_v15, %v716_v57  ;;  %v445_v15 = vmul.f32 0.1, %v373_v7  ;;  %v4055_v42 = vsel %vm3952_vm0, %v4018_v34, 0.0  ;;  %vm409_vm10 = vcmp.ge.f32.partialorder %v373_v7, 0.0  ;;  %vm4079_vm9 = vmand %vm540_vm7, %vm552_vm8 }
  0x6b   : > { %1046 = vmatpush.msra.mxu0 %v889_v14  ;;  %v4015_v14 = vsel %vm3990_vm1, %v3984_v4, 0.0  ;;  %3225 = vmatpush.msra.mxu2 %v4009_v12  ;;  %6561 = vst [vmem:[#allocation23_spill] sm:$0xff] %v4055_v42  ;;  %v337_v49 = vmul.f32 %v3716_v55, %v300_v19  ;;  %v515_v50 = vadd.s32 2, %v3708_v51  ;;  %v338_v57 = vmul.f32 %v3716_v55, %v301_v24  ;;  %vm4098_vm7 = vmand %vm3952_vm0, %vm6457_vm6 }
  0x6c   : > { %1123 = vmatpush.msra.mxu1 %v905_v27  ;;  %3218 = vmatpush.msra.mxu3 %v905_v27  ;;  %6557 = vst [vmem:[#allocation21_spill] sm:$0xff] %v4015_v14  ;;  %v4036_v27 = vld [vmem:[%s6438_s2 + $0x148] sm:$0xff]  ;;  %v718_v45 = vrot.slane %v4015_v14, 1  ;;  %vm428_vm14 = vcmp.ge.f32.partialorder %v4004_v11, 0.0  ;;  %v6563_v0 = vsel %vm4079_vm9, 4294967295, %v6562_v0  ;;  %v357_v6 = vmul.f32 %v3716_v55, %v320_v25  ;;  %v321_v25 = vld [vmem:[#allocation2 + $0xd8] sm:$0xff] }
  0x6d   : > { %1047 = vmatpush.msra.mxu0 %v888_v47  ;;  %v464_v47 = vmul.f32 0.1, %v4004_v11  ;;  %3226 = vmatpush.msra.mxu2 %v4036_v27  ;;  %6564 = vst [vmem:[#allocation24_spill] sm:$0xff] %v6563_v0  ;;  %vm546_vm15 = vcmp.lt.s32.totalorder %v515_v50, 16  ;;  %v6443_v8 = vrot.slane %v4055_v42, 1  ;;  %v375_v19 = vadd.f32 %v3736_v62, %v338_v57  ;;  %v936_v0 = vld [vmem:[%s6438_s2 + $0x180] sm:$0xff] }
  0x6e   : > { %1124 = vmatpush.msra.mxu1 %v904_v16  ;;  %3219 = vmatpush.msra.mxu3 %v904_v16  ;;  %v4062_v16 = vld [vmem:[%s6438_s2 + $0x140] sm:$0xff]  ;;  %v394_v24 = vadd.f32 %v3736_v62, %v357_v6  ;;  %v358_v57 = vmul.f32 %v3716_v55, %v321_v25  ;;  %v340_v38 = vmul.f32 %v3716_v55, %v303_v20  ;;  %v6593_v58 = vmov 0 }
  0x6f   : > { %3086 = vmatmul.msk.f32.vlgmr.msra.gmra.mxu0 %vm3811_vm13, %v3805_v33  ;;  %1125 = vmatmul.f32.vlgmr.msra.gmra.mxu1 %v715_v48  ;;  %v393_v33 = vadd.f32 %v3736_v62, %v356_v63  ;;  %vm4043_vm13 = vmand %vm3861_vm4, %vm6457_vm6 }
  0x70   : > { %1164 = vmatmul.f32.vlgmr.msra.gmra.mxu3 %v3977_v52  ;;  %1186 = vmatpush.msrb.mxu0 %v3767_v13  ;;  %v4073_v63 = vsel %vm4043_vm13, %v499_v31, 0.0  ;;  %vm534_vm13 = vcmp.ge.s32.totalorder %v515_v50, 0  ;;  %v4115_v13 = vsel %vm428_vm14, %v4004_v11, %v464_v47  ;;  %v4134_v11 = vld [vmem:[%s6438_s2 + $0x130] sm:$0xff]  ;;  %vm411_vm14 = vcmp.ge.f32.partialorder %v375_v19, 0.0  ;;  %v322_v50 = vld [vmem:[#allocation2 + $0xe0] sm:$0xff] }
  0x71   : > { %1263 = vmatpush.msrb.mxu3 %v951_v9  ;;  %v465_v48 = vmul.f32 0.1, %v393_v33  ;;  %vm429_vm5 = vcmp.ge.f32.partialorder %v393_v33, 0.0  ;;  %v481_v9 = vsel %vm409_vm10, %v373_v7, %v445_v15  ;;  %3227 = vmatpush.msra.mxu2 %v4062_v16  ;;  %v751_v31 = vrot.slane %v4073_v63, 1  ;;  %vm4139_vm10 = vmand %vm534_vm13, %vm546_vm15  ;;  %v4168_v7 = vld [vmem:[%s6438_s2 + $0x128] sm:$0xff] }
  0x72   : > { %1187 = vmatpush.msrb.mxu0 %v3794_v29  ;;  %v948_v29 = vld [vmem:[%s6438_s2 + $0x1e0] sm:$0xff]  ;;  %v447_v47 = vmul.f32 0.1, %v375_v19  ;;  %vm6573_vm15 = vcmask 1046528   ;;  %vm4184_vm13 = vmand %vm4139_vm10, %vm6456_vm3  ;;  %v323_v52 = vld [vmem:[#allocation2 + $0xe8] sm:$0x3] }
  0x73   : > { %1264 = vmatpush.msrb.mxu3 %v950_v18  ;;  %v374_v18 = vadd.f32 %v3736_v62, %v337_v49  ;;  %v4118_v15 = vsel %vm429_vm5, %v393_v33, %v465_v48  ;;  %v466_v48 = vmul.f32 0.1, %v394_v24  ;;  %v4145_v49 = vsel %vm4098_vm7, %v481_v9, 0.0  ;;  %3228 = vmatpush.msra.mxu2 %v4107_v3  ;;  %vm6577_vm7 = vmmov %vm6573_vm15 }
  0x74   : > { %1188 = vmatpush.msrb.mxu0 %v3819_v37  ;;  %v947_v37 = vld [vmem:[%s6438_s2 + $0x1d8] sm:$0xff]  ;;  %6567 = vst [vmem:[#allocation25_spill] sm:$0xff] %v4118_v15  ;;  %vm430_vm5 = vcmp.ge.f32.partialorder %v394_v24, 0.0  ;;  %v4160_v6 = vsel %vm4079_vm9, %v4118_v15, 0.0  ;;  %v4175_v25 = vsel %vm6573_vm15, %v718_v45, %v6443_v8  ;;  %v944_v45 = vld [vmem:[%s6438_s2 + $0x1c0] sm:$0xff]  ;;  %v721_v8 = vrot.slane %v4145_v49, 1 }
  0x75   : > { %1265 = vmatpush.msrb.mxu3 %v949_v35  ;;  %v6568_v35 = vmov 0  ;;  %vm410_vm8 = vcmp.ge.f32.partialorder %v374_v18, 0.0  ;;  %6572 = vst [vmem:[#allocation26_spill] sm:$0xff] %v4145_v49  ;;  %3229 = vmatpush.msra.mxu2 %v4134_v11  ;;  %v6584_v20 = vrot.slane %v4160_v6, 1  ;;  %v360_v53 = vmul.f32 %v3716_v55, %v323_v52 }
  0x76   : > { %1189 = vmatpush.msrb.mxu0 %v3928_v26  ;;  %v945_v26 = vld [vmem:[%s6438_s2 + $0x1c8] sm:$0xff]  ;;  %6574 = vst [vmem:[#allocation27_spill] sm:$0xff] %v4175_v25  ;;  %v518_v15 = vadd.s32 5, %v3708_v51 }
  0x77   : > { %3087 = vmatmul.msk.f32.gmra.mxu0 %vm3745_vm2, %v3828_v43  ;;  %1266 = vmatpush.msrb.mxu3 %v948_v29  ;;  %v339_v43 = vmul.f32 %v3716_v55, %v302_v61  ;;  %vm4124_vm2 = vmand %vm4079_vm9, %vm6456_vm3  ;;  %v946_v29 = vld [vmem:[%s6438_s2 + $0x1d0] sm:$0xff] }
  0x78   : > { %1128 = vmatmul.f32.gmra.mxu1 %v717_v21  ;;  %1167 = vmatmul.f32.gmra.mxu3 %v4031_v23  ;;  %v6569_v35 = vsel %vm4124_vm2, 4294967295, %v6568_v35  ;;  %v446_v21 = vmul.f32 0.1, %v374_v18  ;;  %v4155_v61 = vsel %vm4124_vm2, %v4115_v13, 0.0  ;;  %vm549_vm11 = vcmp.lt.s32.totalorder %v518_v15, 16 }
  0x79   : > { %1267 = vmatpush.msrb.mxu3 %v947_v37  ;;  %v376_v9 = vadd.f32 %v3736_v62, %v339_v43  ;;  %v522_v37 = vadd.s32 9, %v3708_v51  ;;  %1190 = vmatpush.msrb.mxu0 %v3961_v46  ;;  %v4189_v43 = vsel %vm411_vm14, %v375_v19, %v447_v47  ;;  %v359_v47 = vmul.f32 %v3716_v55, %v322_v50 }
  0x7a   : > { %3230 = vmatpush.msra.mxu2 %v4168_v7  ;;  %v516_v19 = vadd.s32 3, %v3708_v51 }
  0x7b   : > { %1268 = vmatpush.msrb.mxu3 %v946_v29  ;;  %v4178_v29 = vsel %vm410_vm8, %v374_v18, %v446_v21  ;;  %v4198_v18 = vsel %vm6577_vm7, %v749_v2, %v751_v31  ;;  %v502_v21 = vsel %vm430_vm5, %v394_v24, %v466_v48  ;;  %vm4205_vm8 = vmand %vm4079_vm9, %vm6457_vm6  ;;  %1191 = vmatpush.msrb.mxu0 %v4009_v12  ;;  %v753_v2 = vrot.slane %v4155_v61, 1  ;;  %v943_v48 = vld [vmem:[%s6438_s2 + $0x1b8] sm:$0xff]  ;;  %v304_v12 = vld [vmem:[#allocation2 + $0x50] sm:$0xff] }
  0x7c   : > { %6578 = vst [vmem:[#allocation28_spill] sm:$0xff] %v4198_v18  ;;  %v395_v31 = vadd.f32 %v3736_v62, %v358_v57  ;;  %v4230_v50 = vsel %vm4184_vm13, %v4178_v29, 0.0  ;;  %v4235_v57 = vsel %vm4139_vm10, %v4189_v43, 0.0  ;;  %v448_v24 = vmul.f32 0.1, %v376_v9 }
  0x7d   : > { %1269 = vmatpush.msrb.mxu3 %v945_v26  ;;  %v4222_v26 = vld [vmem:[%s6438_s2 + $0x120] sm:$0xff]  ;;  %6581 = vst [vmem:[#allocation29_spill] sm:$0xff] %v4230_v50  ;;  %vm541_vm14 = vcmp.ge.s32.totalorder %v522_v37, 0  ;;  %v4241_v40 = vsel %vm4205_vm8, %v502_v21, 0.0  ;;  %vm412_vm5 = vcmp.ge.f32.partialorder %v376_v9, 0.0  ;;  %vm553_vm15 = vcmp.lt.s32.totalorder %v522_v37, 16  ;;  %vm6585_vm8 = vmmov %vm6577_vm7  ;;  %1192 = vmatpush.msrb.mxu0 %v4036_v27 }
  0x7e   : > { %v4253_v23 = vadd.f32 %v3736_v62, %v359_v47  ;;  %3231 = vmatpush.msra.mxu2 %v4222_v26  ;;  %v941_v21 = vld [vmem:[%s6438_s2 + $0x1a8] sm:$0xff]  ;;  %v4269_v47 = vsel %vm6585_vm8, %v753_v2, %v6584_v20  ;;  %v467_v14 = vmul.f32 0.1, %v395_v31  ;;  %vm4283_vm8 = vmand %vm541_vm14, %vm553_vm15  ;;  %v6587_v2 = vmov 0  ;;  %v306_v20 = vld [vmem:[#allocation2 + $0x60] sm:$0xff] }
  0x7f   : > { %3088 = vmatmul.msk.f32.gmra.mxu0 %vm3990_vm1, %v3984_v4  ;;  %1270 = vmatpush.msrb.mxu3 %v944_v45  ;;  %v4249_v45 = vld [vmem:[%s6438_s2 + $0x118] sm:$0xff]  ;;  %6586 = vst [vmem:[#allocation31_spill] sm:$0xff] %v4269_v47  ;;  %v6588_v2 = vsel %vm4283_vm8, 4294967295, %v6587_v2  ;;  %v940_v27 = vld [vmem:[%s6438_s2 + $0x1a0] sm:$0xff]  ;;  %vm547_vm3 = vcmp.lt.s32.totalorder %v516_v19, 16  ;;  %vm4300_vm14 = vmand %vm4139_vm10, %vm6457_vm6  ;;  %vm6592_vm15 = vcmp.ge.s32.totalorder %v3718_v56, 0 }
  0x80   : > { %1131 = vmatmul.f32.gmra.mxu1 %v4175_v25  ;;  %1170 = vmatmul.f32.gmra.mxu3 %v4198_v18  ;;  %v341_v18 = vmul.f32 %v3716_v55, %v304_v12  ;;  %v6582_v25 = vrot.slane %v4055_v42, 1  ;;  %v305_v12 = vld [vmem:[#allocation2 + $0x58] sm:$0x3]  ;;  %v4292_v42 = vadd.f32 %v3736_v62, %v340_v38  ;;  %v468_v37 = vmul.f32 0.1, %v4253_v23  ;;  %vm4316_vm6 = vmand %vm4283_vm8, %vm6592_vm15 }
  0x81   : > { %1271 = vmatpush.msrb.mxu3 %v943_v48  ;;  %v723_v48 = vrot.slane %v4230_v50, 1  ;;  %3232 = vmatpush.msra.mxu2 %v4249_v45  ;;  %v307_v50 = vld [vmem:[#allocation2 + $0x68] sm:$0xff]  ;;  %v342_v38 = vmul.f32 %v3716_v55, %v305_v12  ;;  %v6594_v58 = vsel %vm4316_vm6, 4294967295, %v6593_v58 }
  0x82   : > { %v4264_v49 = vsel %vm6577_vm7, %v6582_v25, %v721_v8  ;;  %v756_v8 = vrot.slane %v4241_v40, 1  ;;  %v484_v25 = vsel %vm412_vm5, %v376_v9, %v448_v24  ;;  %vm431_vm7 = vcmp.ge.f32.partialorder %v395_v31, 0.0  ;;  %1193 = vmatpush.msrb.mxu0 %v4062_v16  ;;  %6595 = vst [vmem:[#allocation33_spill] sm:$0xff] %v6594_v58  ;;  %v4324_v12 = vld [vmem:[%s6438_s2 + $0x108] sm:$0xff] }
  0x83   : > { %6583 = vst [vmem:[#allocation30_spill] sm:$0xff] %v4264_v49  ;;  %1272 = vmatpush.msrb.mxu3 %v942_v39  ;;  %v378_v9 = vadd.f32 %v3736_v62, %v341_v18  ;;  %3233 = vmatpush.msra.mxu2 %v4275_v28  ;;  %v343_v24 = vmul.f32 %v3716_v55, %v306_v20  ;;  %vm6599_vm5 = vcmp.ge.s32.totalorder %v516_v19, 0  ;;  %v4360_v19 = vld [vmem:[%s6438_s2 + $0x100] sm:$0xff] }
  0x84   : > { %v344_v18 = vmul.f32 %v3716_v55, %v307_v50  ;;  %v4310_v16 = vsel %vm431_vm7, %v395_v31, %v467_v14  ;;  %v939_v14 = vld [vmem:[%s6438_s2 + $0x198] sm:$0xff]  ;;  %1194 = vmatpush.msrb.mxu0 %v4107_v3  ;;  %v6596_v31 = vrot.slane %v4235_v57, 1  ;;  %vm6597_vm7 = vcmask 1046528   ;;  %vm4341_vm9 = vmand %vm6599_vm5, %vm547_vm3 }
  0x85   : > { %1273 = vmatpush.msrb.mxu3 %v941_v21  ;;  %6591 = vst [vmem:[#allocation32_spill] sm:$0xff] %v4310_v16  ;;  %v450_v21 = vmul.f32 0.1, %v378_v9  ;;  %v379_v3 = vadd.f32 %v3736_v62, %v342_v38  ;;  %v380_v20 = vadd.f32 %v3736_v62, %v343_v24  ;;  %vm6604_vm15 = vcmp.ge.f32.partialorder %v378_v9, 0.0  ;;  %v938_v38 = vld [vmem:[%s6438_s2 + $0x190] sm:$0xff]  ;;  %3234 = vmatpush.msra.mxu2 %v4324_v12 }
  0x86   : > { %v4336_v50 = vsel %vm6597_vm7, %v723_v48, %v6596_v31  ;;  %v6602_v48 = vrot.slane %v4160_v6, 1  ;;  %v381_v24 = vadd.f32 %v3736_v62, %v344_v18  ;;  %v397_v39 = vadd.f32 %v3736_v62, %v360_v53  ;;  %1195 = vmatpush.msrb.mxu0 %v4134_v11 }
  0x87   : > { %3089 = vmatmul.msk.f32.gmra.mxu0 %vm3952_vm0, %v4018_v34  ;;  %6598 = vst [vmem:[#allocation34_spill] sm:$0xff] %v4336_v50  ;;  %1274 = vmatpush.msrb.mxu3 %v940_v27  ;;  %v4355_v27 = vsel %vm6604_vm15, %v378_v9, %v450_v21  ;;  %v4374_v9 = vsel %vm4316_vm6, %v4310_v16, 0.0  ;;  %vm415_vm5 = vcmp.ge.f32.partialorder %v379_v3, 0.0  ;;  %vm6606_vm15 = vcmp.ge.f32.partialorder %v4253_v23, 0.0 }
  0x88   : > { %1134 = vmatmul.f32.gmra.mxu1 %v4264_v49  ;;  %1173 = vmatmul.f32.gmra.mxu3 %v4269_v47  ;;  %v4352_v31 = vsel %vm6597_vm7, %v6602_v48, %v756_v8  ;;  %v517_v47 = vadd.s32 4, %v3708_v51  ;;  %v4369_v8 = vsel %vm4300_vm14, %v484_v25, 0.0  ;;  %v4381_v18 = vsel %vm6606_vm15, %v4253_v23, %v468_v37  ;;  %v937_v23 = vld [vmem:[%s6438_s2 + $0x188] sm:$0xff]  ;;  %v308_v37 = vld [vmem:[#allocation2 + $0x70] sm:$0x3] }
  0x89   : > { %6603 = vst [vmem:[#allocation35_spill] sm:$0xff] %v4352_v31  ;;  %1275 = vmatpush.msrb.mxu3 %v939_v14  ;;  %v4386_v25 = vsel %vm4341_vm9, %v4355_v27, 0.0  ;;  %v451_v21 = vmul.f32 0.1, %v379_v3  ;;  %vm6609_vm14 = vcmp.lt.s32.totalorder %v3729_v60, 16  ;;  %3235 = vmatpush.msra.mxu2 %v4360_v19  ;;  %vm417_vm3 = vcmp.ge.f32.partialorder %v381_v24, 0.0 }
  0x8a   : > { %6605 = vst [vmem:[#allocation36_spill] sm:$0xff] %v4369_v8  ;;  %vm4393_vm7 = vmand %vm4341_vm9, %vm6609_vm14  ;;  %v452_v53 = vmul.f32 0.1, %v380_v20  ;;  %v453_v48 = vmul.f32 0.1, %v381_v24  ;;  %1196 = vmatpush.msrb.mxu0 %v4168_v7  ;;  %v4412_v11 = vsel %vm4283_vm8, %v4381_v18, 0.0  ;;  %v345_v7 = vmul.f32 %v3716_v55, %v308_v37 }
  0x8b   : > { %6607 = vst [vmem:[#allocation37_spill] sm:$0xff] %v4381_v18  ;;  %1276 = vmatpush.msrb.mxu3 %v938_v38  ;;  %v449_v49 = vmul.f32 0.1, %v4292_v42  ;;  %v487_v58 = vsel %vm415_vm5, %v379_v3, %v451_v21  ;;  %vm6482_vm15 = vcmask 1045504   ;;  %vm6612_vm5 = vcmp.ge.f32.partialorder %v380_v20, 0.0 }
  0x8c   : > { %6608 = vst [vmem:[#allocation38_spill] sm:$0xff] %v4386_v25  ;;  %v4416_v38 = vsel %vm4393_vm7, %v487_v58, 0.0  ;;  %v4418_v3 = vsel %vm417_vm3, %v381_v24, %v453_v48  ;;  %v4422_v16 = vsel %vm6612_vm5, %v380_v20, %v452_v53  ;;  %vm548_vm14 = vcmp.lt.s32.totalorder %v517_v47, 16  ;;  %1197 = vmatpush.msrb.mxu0 %v4222_v26  ;;  %v309_v53 = vld [vmem:[#allocation2 + $0x78] sm:$0xff]  ;;  %v310_v48 = vld [vmem:[#allocation2 + $0x80] sm:$0xff] }
  0x8d   : > { %1277 = vmatpush.msrb.mxu3 %v937_v23  ;;  %v802_v21 = vrot.slane %v4416_v38, 2  ;;  %v726_v58 = vrot.slane %v4369_v8, 1  ;;  %v758_v14 = vrot.slane %v4374_v9, 1  ;;  %v469_v24 = vmul.f32 0.1, %v397_v39 }
  0x8e   : > { %vm6613_vm3 = vcmp.ge.s32.totalorder %v517_v47, 0  ;;  %vm433_vm5 = vcmp.ge.f32.partialorder %v397_v39, 0.0  ;;  %v6616_v26 = vrot.slane %v4386_v25, 2  ;;  %vm6618_vm6 = vcmp.ge.s32.totalorder %v3718_v56, 0  ;;  %1198 = vmatpush.msrb.mxu0 %v4249_v45 }
  0x8f   : > { %3090 = vmatmul.msk.f32.gmra.mxu0 %vm4184_vm13, %v4178_v29  ;;  %1278 = vmatpush.msrb.mxu3 %v936_v0  ;;  %vm4432_vm7 = vmand %vm6613_vm3, %vm548_vm14  ;;  %v382_v37 = vadd.f32 %v3736_v62, %v345_v7  ;;  %vm6621_vm14 = vcmp.ge.f32.partialorder %v4292_v42, 0.0  ;;  %v505_v18 = vsel %vm433_vm5, %v397_v39, %v469_v24  ;;  %v6626_v24 = vrot.slane %v4235_v57, 1 }
  0x90   : > { %1137 = vmatmul.f32.gmra.mxu1 %v4336_v50  ;;  %1176 = vmatmul.f32.gmra.mxu3 %v4352_v31  ;;  %v4441_v20 = vsel %vm6482_vm15, %v6616_v26, %v802_v21  ;;  %vm4447_vm2 = vmand %vm4432_vm7, %vm6618_vm6  ;;  %v4454_v47 = vsel %vm4432_vm7, %v4418_v3, 0.0  ;;  %v759_v21 = vrot.slane %v4412_v11, 1  ;;  %v4461_v26 = vsel %vm6621_vm14, %v4292_v42, %v449_v49 }
  0x91   : > { %6617 = vst [vmem:[#allocation39_spill] sm:$0xff] %v4441_v20  ;;  %vm4467_vm3 = vmand %vm4341_vm9, %vm6618_vm6  ;;  %1223 = vmatmul.f32.vlgmr.msra.gmra.mxu2 %v4441_v20  ;;  %v4475_v7 = vsel %vm4447_vm2, %v4422_v16, 0.0  ;;  %v346_v50 = vmul.f32 %v3716_v55, %v309_v53  ;;  %v805_v49 = vrot.slane %v4454_v47, 2  ;;  %vm418_vm14 = vcmp.ge.f32.partialorder %v382_v37, 0.0  ;;  %1199 = vmatpush.msrb.mxu0 %v4275_v28  ;;  %v6699_v46 = vld [vmem:[#allocation36_spill] sm:$0xff] }
  0x92   : > { %v804_v42 = vrot.slane %v4475_v7, 2  ;;  %v454_v8 = vmul.f32 0.1, %v382_v37  ;;  %vm6624_vm6 = vcmp.lt.s32.totalorder %v3729_v60, 16  ;;  %v347_v20 = vmul.f32 %v3716_v55, %v310_v48 }
  0x93   : > { %vm639_vm15 = vmand %vm4283_vm8, %vm6624_vm6  ;;  %v4492_v45 = vsel %vm4467_vm3, %v4461_v26, 0.0  ;;  %v383_v39 = vadd.f32 %v3736_v62, %v346_v50  ;;  %1200 = vmatpush.msrb.mxu0 %v4324_v12 }
  0x94   : > { %v490_v53 = vsel %vm418_vm14, %v382_v37, %v454_v8  ;;  %vm6625_vm4 = vmmov %vm6624_vm6  ;;  %vm6627_vm6 = vcmask 1046528   ;;  %v384_v51 = vadd.f32 %v3736_v62, %v347_v20  ;;  %v4509_v8 = vsel %vm639_vm15, %v505_v18, 0.0  ;;  %v311_v20 = vld [vmem:[#allocation2 + $0x88] sm:$0x3] }
  0x95   : > { %vm624_vm5 = vmand %vm4432_vm7, %vm6625_vm4  ;;  %v4502_v48 = vsel %vm6627_vm6, %v6626_v24, %v726_v58  ;;  %vm6631_vm14 = vcmask 1045504   ;;  %vm537_vm4 = vcmp.ge.s32.totalorder %v518_v15, 0  ;;  %v728_v50 = vrot.slane %v4492_v45, 1  ;;  %1201 = vmatpush.msrb.mxu0 %v4360_v19  ;;  %v1024_v24 = vld [vmem:[%s6438_s2 + $0x440] sm:$0xff] }
  0x96   : > { %6628 = vst [vmem:[#allocation40_spill] sm:$0xff] %v4502_v48  ;;  %vm6629_vm8 = vmmov %vm6627_vm6  ;;  %v4512_v37 = vsel %vm6631_vm14, %v804_v42, %v805_v49  ;;  %v729_v58 = vrot.slane %v4386_v25, 1  ;;  %v455_v12 = vmul.f32 0.1, %v383_v39  ;;  %v456_v18 = vmul.f32 0.1, %v384_v51 }
  0x97   : > { %v4505_v28 = vsel %vm6629_vm8, %v758_v14, %v759_v21  ;;  %6632 = vst [vmem:[#allocation42_spill] sm:$0xff] %v4512_v37  ;;  %3091 = vmatmul.msk.f32.gmra.mxu0 %vm4139_vm10, %v4189_v43  ;;  %v4519_v14 = vsel %vm624_vm5, %v490_v53, 0.0  ;;  %v761_v42 = vrot.slane %v4509_v8, 1  ;;  %vm419_vm8 = vcmp.ge.f32.partialorder %v383_v39, 0.0  ;;  %vm4526_vm6 = vmand %vm537_vm4, %vm549_vm11 }
  0x98   : > { %6630 = vst [vmem:[#allocation41_spill] sm:$0xff] %v4505_v28  ;;  %1140 = vmatmul.f32.gmra.mxu1 %v4502_v48  ;;  %1179 = vmatmul.f32.gmra.mxu3 %v4505_v28  ;;  %vm420_vm15 = vcmp.ge.f32.partialorder %v384_v51, 0.0  ;;  %v348_v53 = vmul.f32 %v3716_v55, %v311_v20  ;;  %v807_v28 = vrot.slane %v4519_v14, 2  ;;  %v4533_v48 = vsel %vm419_vm8, %v383_v39, %v455_v12  ;;  %v6720_v0 = vld [vmem:[#allocation39_spill] sm:$0xff] }
  0x99   : > { %1226 = vmatmul.f32.gmra.mxu2 %v4512_v37  ;;  %v4535_v25 = vsel %vm420_vm15, %v384_v51, %v456_v18  ;;  %vm6635_vm5 = vcmp.ge.s32.totalorder %v3718_v56, 0  ;;  %vm6638_vm11 = vcmask 1046528   ;;  %vm6642_vm8 = vcmask 1045504  }
  0x9a   : > { %vm4541_vm14 = vmand %vm4526_vm6, %vm6635_vm5  ;;  %v385_v37 = vadd.f32 %v3736_v62, %v348_v53  ;;  %v4547_v20 = vsel %vm6638_vm11, %v728_v50, %v729_v58  ;;  %v4553_v39 = vsel %vm6642_vm8, %v805_v49, %v807_v28  ;;  %v662_v12 = vsel %vm4526_vm6, %v4535_v25, 0.0  ;;  %v312_v50 = vld [vmem:[#allocation2 + $0x90] sm:$0xff] }
  0x9b   : > { %6639 = vst [vmem:[#allocation43_spill] sm:$0xff] %v4547_v20  ;;  %vm6640_vm4 = vmmov %vm6638_vm11  ;;  %v661_v51 = vsel %vm4541_vm14, %v4533_v48, 0.0  ;;  %v731_v49 = vrot.slane %v4416_v38, 1  ;;  %v349_v28 = vmul.f32 %v3716_v55, %v312_v50  ;;  %vm6643_vm5 = vcmp.lt.s32.totalorder %v3729_v60, 16  ;;  %v996_v60 = vld [vmem:[%s6438_s2 + $0x360] sm:$0xff] }
  0x9c   : > { %v4550_v19 = vsel %vm6640_vm4, %v759_v21, %v761_v42  ;;  %v457_v21 = vmul.f32 0.1, %v385_v37  ;;  %vm421_vm15 = vcmp.ge.f32.partialorder %v385_v37, 0.0  ;;  %v809_v18 = vrot.slane %v661_v51, 2  ;;  %vm627_vm11 = vmand %vm4526_vm6, %vm6643_vm5 }
  0x9d   : > { %6641 = vst [vmem:[#allocation44_spill] sm:$0xff] %v4550_v19  ;;  %v810_v42 = vrot.slane %v662_v12, 2  ;;  %vm6644_vm5 = vcmp.ge.s32.totalorder %v3718_v56, 0  ;;  %v738_v41 = vrot.slane %v661_v51, 1  ;;  %v799_v33 = vrot.slane %v4492_v45, 2  ;;  %v1028_v45 = vld [vmem:[%s6438_s2 + $0x460] sm:$0xff] }
  0x9e   : > { %v493_v53 = vsel %vm421_vm15, %v385_v37, %v457_v21  ;;  %v733_v21 = vrot.slane %v4475_v7, 1  ;;  %v736_v7 = vrot.slane %v4519_v14, 1  ;;  %v817_v14 = vrot.slane %v3884_v1, 2 }
  0x9f   : > { %3092 = vmatmul.msk.f32.gmra.mxu0 %vm4467_vm3, %v4461_v26  ;;  %v4578_v38 = vsel %vm6642_vm8, %v809_v18, %v810_v42  ;;  %v663_v50 = vsel %vm627_vm11, %v493_v53, 0.0  ;;  %vm4596_vm11 = vmand %vm3800_vm12, %vm6644_vm5  ;;  %v819_v1 = vrot.slane %v3940_v30, 2  ;;  %v822_v30 = vrot.slane %v4073_v63, 2 }
  0xa0   : > { %1143 = vmatmul.f32.gmra.mxu1 %v4547_v20  ;;  %1182 = vmatmul.f32.gmra.mxu3 %v4550_v19  ;;  %v386_v20 = vadd.f32 %v3736_v62, %v349_v28  ;;  %v4575_v19 = vsel %vm6640_vm4, %v729_v58, %v731_v49  ;;  %v734_v58 = vrot.slane %v4454_v47, 1  ;;  %v812_v49 = vrot.slane %v663_v50, 2 }
  0xa1   : > { %1229 = vmatmul.f32.gmra.mxu2 %v4553_v39  ;;  %v741_v51 = vrot.slane %v663_v50, 1  ;;  %v825_v63 = vrot.slane %v4160_v6, 2  ;;  %v830_v6 = vrot.slane %v4412_v11, 2  ;;  %v967_v11 = vld [vmem:[%s6438_s2 + $0x278] sm:$0xff] }
  0xa2   : > { %v458_v37 = vmul.f32 0.1, %v386_v20  ;;  %vm422_vm15 = vcmp.ge.f32.partialorder %v386_v20, 0.0  ;;  %1340 = vmatpush.msra.mxu0 %v967_v11 }
  0xa4   : > { %v4590_v28 = vsel %vm422_vm15, %v386_v20, %v458_v37 }
  0xa5   : > { %v664_v47 = vsel %vm4596_vm11, %v4590_v28, 0.0 }
  0xa6   : > { %v814_v20 = vrot.slane %v664_v47, 2  ;;  %v743_v50 = vrot.slane %v664_v47, 1 }
  0xa7   : > { %3093 = vmatmul.msk.f32.gmra.mxu0 %vm4341_vm9, %v4355_v27 }
  0xa8   : > { %1146 = vmatmul.f32.gmra.mxu1 %v4575_v19  ;;  %3106 = vmatmul.msk.f32.vlgmr.msrb.gmra.mxu3 %vm3990_vm1, %v3984_v4  ;;  %vm6647_vm1 = vmmov %vm6640_vm4 }
  0xa9   : > { %1232 = vmatmul.f32.gmra.mxu2 %v4578_v38  ;;  %v4601_v4 = vsel %vm6647_vm1, %v733_v21, %v734_v58  ;;  %vm6648_vm4 = vmmov %vm6642_vm8 }
  0xaa   : > { %v4604_v5 = vsel %vm6648_vm4, %v810_v42, %v812_v49  ;;  %v815_v42 = vrot.slane %v3879_v59, 2  ;;  %vm6649_vm8 = vmmov %vm6647_vm1 }
  0xab   : > { %v4620_v53 = vsel %vm6649_vm8, %v734_v58, %v736_v7  ;;  %vm6650_vm15 = vmmov %vm6648_vm4 }
  0xac   : > { %v4623_v37 = vsel %vm6650_vm15, %v814_v20, %v815_v42  ;;  %vm6652_vm5 = vmmov %vm6648_vm4 }
  0xad   : > { %v4638_v58 = vsel %vm6652_vm5, %v815_v42, %v817_v14  ;;  %vm6656_vm15 = vmmov %vm6648_vm4 }
  0xaf   : > { %3094 = vmatmul.msk.f32.gmra.mxu0 %vm4447_vm2, %v4422_v16 }
  0xb0   : > { %1149 = vmatmul.f32.gmra.mxu1 %v4601_v4  ;;  %3107 = vmatmul.msk.f32.gmra.mxu3 %vm3952_vm0, %v4018_v34  ;;  %v739_v34 = vrot.slane %v662_v12, 1  ;;  %vm6651_vm0 = vmmov %vm6647_vm1  ;;  %v820_v12 = vrot.slane %v3946_v36, 2  ;;  %v6654_v36 = vrot.slane %v3879_v59, 1  ;;  %v824_v59 = vrot.slane %v4155_v61, 2 }
  0xb1   : > { %1235 = vmatmul.f32.gmra.mxu2 %v4604_v5  ;;  %vm6653_vm1 = vmmov %vm6651_vm0  ;;  %v829_v61 = vrot.slane %v4374_v9, 2 }
  0xb2   : > { %v4635_v21 = vsel %vm6651_vm0, %v738_v41, %v739_v34  ;;  %v4651_v49 = vsel %vm6653_vm1, %v739_v34, %v741_v51  ;;  %v4654_v7 = vsel %vm6648_vm4, %v819_v1, %v820_v12  ;;  %vm6655_vm8 = vmmov %vm6651_vm0  ;;  %v4671_v42 = vsel %vm6656_vm15, %v820_v12, %v822_v30  ;;  %v965_v12 = vld [vmem:[%s6438_s2 + $0x268] sm:$0xff]  ;;  %v6671_v30 = vld [vmem:[#allocation24_spill] sm:$0xff] }
  0xb3   : > { %v4668_v20 = vsel %vm6655_vm8, %v743_v50, %v6654_v36  ;;  %vm6657_vm0 = vmmov %vm6648_vm4  ;;  %v827_v41 = vrot.slane %v4241_v40, 2  ;;  %vm6661_vm1 = vnez %v6550_v10  ;;  %vm6664_vm8 = vnez %v6545_v54  ;;  %v6670_v50 = vld [vmem:[#allocation25_spill] sm:$0xff]  ;;  %v964_v36 = vld [vmem:[%s6438_s2 + $0x260] sm:$0xff] }
  0xb4   : > { %v4684_v47 = vsel %vm6657_vm0, %v824_v59, %v825_v63  ;;  %vm6659_vm5 = vmmov %vm6657_vm0  ;;  %v832_v40 = vrot.slane %v4509_v8, 2  ;;  %v966_v8 = vld [vmem:[%s6438_s2 + $0x270] sm:$0xff] }
  0xb5   : > { %6658 = vst [vmem:[#allocation45_spill] sm:$0xff] %v4684_v47  ;;  %v4695_v34 = vsel %vm6659_vm5, %v825_v63, %v827_v41  ;;  %vm6662_vm4 = vmmov %vm6657_vm0  ;;  %1341 = vmatpush.msra.mxu0 %v966_v8  ;;  %vm6672_vm5 = vnez %v6671_v30  ;;  %v963_v63 = vld [vmem:[%s6438_s2 + $0x258] sm:$0xff]  ;;  %v6674_v41 = vld [vmem:[#allocation32_spill] sm:$0xff] }
  0xb6   : > { %6660 = vst [vmem:[#allocation46_spill] sm:$0xff] %v4695_v34  ;;  %v4707_v14 = vsel %vm6662_vm4, %v829_v61, %v830_v6  ;;  %vm6666_vm15 = vmmov %vm6657_vm0  ;;  %vm6668_vm0 = vnez %v6569_v35  ;;  %v6675_v61 = vld [vmem:[#allocation33_spill] sm:$0xff] }
  0xb7   : > { %3095 = vmatmul.msk.f32.gmra.mxu0 %vm4432_vm7, %v4418_v3  ;;  %6663 = vst [vmem:[#allocation47_spill] sm:$0xff] %v4707_v14  ;;  %v4720_v9 = vsel %vm6666_vm15, %v830_v6, %v832_v40  ;;  %vm6676_vm4 = vnez %v6675_v61  ;;  %v962_v6 = vld [vmem:[%s6438_s2 + $0x250] sm:$0xff]  ;;  %v961_v8 = vld [vmem:[%s6438_s2 + $0x248] sm:$0xff]  ;;  %vm6680_vm15 = vnez %v6588_v2 }
  0xb8   : > { %1152 = vmatmul.f32.gmra.mxu1 %v4620_v53  ;;  %3108 = vmatmul.msk.f32.gmra.mxu3 %vm4184_vm13, %v4178_v29  ;;  %6667 = vst [vmem:[#allocation49_spill] sm:$0xff] %v4720_v9 }
  0xb9   : > { %1238 = vmatmul.f32.gmra.mxu2 %v4623_v37  ;;  %1342 = vmatpush.msra.mxu0 %v965_v12  ;;  %v999_v12 = vld [vmem:[%s6438_s2 + $0x378] sm:$0xff] }
  0xba   : > { %1494 = vmatpush.msrb.mxu2 %v999_v12  ;;  %v1015_v12 = vld [vmem:[%s6438_s2 + $0x3f8] sm:$0xff] }
  0xbb   : > { %1343 = vmatpush.msra.mxu0 %v964_v36  ;;  %v6679_v36 = vld [vmem:[#allocation37_spill] sm:$0xff]  ;;  %1571 = vmatpush.msra.mxu3 %v1015_v12 }
  0xbd   : > { %1344 = vmatpush.msra.mxu0 %v963_v63  ;;  %v6681_v63 = vld [vmem:[#allocation17_spill] sm:$0xff] }
  0xbf   : > { %3096 = vmatmul.msk.f32.gmra.mxu0 %vm4541_vm14, %v4533_v48 }
  0xc0   : > { %1155 = vmatmul.f32.gmra.mxu1 %v4635_v21  ;;  %3109 = vmatmul.msk.f32.gmra.mxu3 %vm4139_vm10, %v4189_v43 }
  0xc1   : > { %1241 = vmatmul.f32.gmra.mxu2 %v4638_v58  ;;  %1345 = vmatpush.msra.mxu0 %v962_v6  ;;  %v6682_v6 = vld [vmem:[#allocation18_spill] sm:$0xff] }
  0xc3   : > { %1346 = vmatpush.msra.mxu0 %v961_v8  ;;  %v997_v8 = vld [vmem:[%s6438_s2 + $0x368] sm:$0xff] }
  0xc7   : > { %3097 = vmatmul.msk.f32.gmra.mxu0 %vm4526_vm6, %v4535_v25 }
  0xc8   : > { %1158 = vmatmul.f32.gmra.mxu1 %v4651_v49  ;;  %3110 = vmatmul.msk.f32.gmra.mxu3 %vm4467_vm3, %v4461_v26 }
  0xc9   : > { %1244 = vmatmul.f32.gmra.mxu2 %v4654_v7 }
  0xcf   : > { %3098 = vmatmul.msk.f32.gmra.mxu0 %vm4596_vm11, %v4590_v28 }
  0xd0   : > { %1161 = vmatmul.f32.gmra.mxu1 %v4668_v20  ;;  %3111 = vmatmul.msk.f32.gmra.mxu3 %vm4341_vm9, %v4355_v27 }
  0xd1   : > { %1247 = vmatmul.f32.gmra.mxu2 %v4671_v42 }
  0xd7   : > { %3099 = vmatmul.msk.f32.gmra.mxu0 %vm3800_vm12, %v3831_v44 }
  0xd8   : > { %3112 = vmatmul.msk.f32.gmra.mxu3 %vm4447_vm2, %v4422_v16 }
  0xd9   : > { %1250 = vmatmul.f32.gmra.mxu2 %v4684_v47 }
  0xdf   : > { %3100 = vmatmul.msk.f32.gmra.mxu0 %vm6661_vm1, %v3916_v17 }
  0xe0   : > { %3113 = vmatmul.msk.f32.gmra.mxu3 %vm4432_vm7, %v4418_v3 }
  0xe1   : > { %1253 = vmatmul.f32.gmra.mxu2 %v4695_v34  ;;  %v986_v34 = vld [vmem:[%s6438_s2 + $0x310] sm:$0xff] }
  0xe7   : > { %3101 = vmatmul.msk.f32.gmra.mxu0 %vm6664_vm8, %v3922_v22 }
  0xe8   : > { %3114 = vmatmul.msk.f32.gmra.mxu3 %vm4541_vm14, %v4533_v48 }
  0xe9   : > { %1256 = vmatmul.f32.gmra.mxu2 %v4707_v14 }
  0xec   : > { %v4717_v51 = vpop.f32.mrf.mxu0  ;;  %v5146_v18 = vpop.f32.mrf.mxu1 }
  0xed   : > { %6665 = vst [vmem:[#allocation48_spill] sm:$0xff] %v4717_v51  ;;  %v982_v51 = vld [vmem:[%s6438_s2 + $0x2f0] sm:$0xff] }
  0xef   : > { %3102 = vmatmul.msk.f32.gmra.mxu0 %vm6668_vm0, %v4115_v13 }
  0xf0   : > { %3115 = vmatmul.msk.f32.gmra.mxu3 %vm4526_vm6, %v4535_v25 }
  0xf1   : > { %1259 = vmatmul.f32.gmra.mxu2 %v4720_v9  ;;  %v992_v9 = vld [vmem:[%s6438_s2 + $0x340] sm:$0xff] }
  0xf3   : > { %v4763_v40 = vpop.f32.mrf.mxu3 }
  0xf4   : > { %v4735_v1 = vpop.f32.mrf.mxu0  ;;  %6677 = vst [vmem:[#allocation24_spill] sm:$0xff] %v4763_v40  ;;  %v785_v40 = vrot.slane %v6682_v6, 2  ;;  %v1014_v6 = vld [vmem:[%s6438_s2 + $0x3f0] sm:$0xff] }
  0xf5   : > { %6669 = vst [vmem:[#allocation50_spill] sm:$0xff] %v4735_v1  ;;  %v998_v1 = vld [vmem:[%s6438_s2 + $0x370] sm:$0xff]  ;;  %1572 = vmatpush.msra.mxu3 %v1014_v6  ;;  %v995_v6 = vld [vmem:[%s6438_s2 + $0x358] sm:$0xff] }
  0xf6   : > { %1495 = vmatpush.msrb.mxu2 %v998_v1  ;;  %v959_v1 = vld [vmem:[%s6438_s2 + $0x238] sm:$0xff] }
  0xf7   : > { %3103 = vmatmul.msk.f32.gmra.mxu0 %vm6672_vm5, %v6670_v50 }
  0xf8   : > { %3116 = vmatmul.msk.f32.gmra.mxu3 %vm4596_vm11, %v4590_v28  ;;  %1496 = vmatpush.msrb.mxu2 %v997_v8 }
  0xfa   : > { %1497 = vmatpush.msrb.mxu2 %v996_v60  ;;  %v6686_v60 = vld [vmem:[#allocation19_spill] sm:$0xff] }
  0xfb   : > { %v4814_v8 = vpop.f32.mrf.mxu3 }
  0xfc   : > { %v4749_v59 = vpop.f32.mrf.mxu0  ;;  %6685 = vst [vmem:[#allocation37_spill] sm:$0xff] %v4814_v8  ;;  %1498 = vmatpush.msrb.mxu2 %v995_v6  ;;  %v980_v8 = vld [vmem:[%s6438_s2 + $0x2e0] sm:$0xff]  ;;  %v979_v6 = vld [vmem:[%s6438_s2 + $0x2d8] sm:$0xff] }
  0xfd   : > { %6673 = vst [vmem:[#allocation25_spill] sm:$0xff] %v4749_v59  ;;  %v784_v59 = vrot.slane %v6681_v63, 2  ;;  %v983_v63 = vld [vmem:[%s6438_s2 + $0x2f8] sm:$0xff] }
  0xfe   : > { %1417 = vmatpush.msrb.mxu1 %v983_v63  ;;  %v1013_v63 = vld [vmem:[%s6438_s2 + $0x3e8] sm:$0xff] }
  0xff   : > { %3104 = vmatmul.msk.f32.gmra.mxu0 %vm6676_vm4, %v6674_v41  ;;  %1573 = vmatpush.msra.mxu3 %v1013_v63  ;;  %v958_v63 = vld [vmem:[%s6438_s2 + $0x230] sm:$0xff] }
 0x100   : > { %3117 = vmatmul.msk.f32.gmra.mxu3 %vm3800_vm12, %v3831_v44  ;;  %1418 = vmatpush.msrb.mxu1 %v982_v51  ;;  %v787_v51 = vrot.slane %v6686_v60, 2  ;;  %v993_v60 = vld [vmem:[%s6438_s2 + $0x348] sm:$0xff] }
 0x104   : > { %v4765_v11 = vpop.f32.mrf.mxu0 }
 0x105   : > { %6678 = vst [vmem:[#allocation32_spill] sm:$0xff] %v4765_v11  ;;  %v960_v11 = vld [vmem:[%s6438_s2 + $0x240] sm:$0xff] }
 0x106   : > { %1347 = vmatpush.msra.mxu0 %v960_v11 }
 0x107   : > { %3105 = vmatmul.msk.f32.gmra.mxu0 %vm6680_vm15, %v6679_v36 }
 0x108   : > { %3118 = vmatmul.msk.f32.gmra.mxu3 %vm6661_vm1, %v3916_v17  ;;  %vm6684_vm1 = vcmask 1045504   ;;  %1348 = vmatpush.msra.mxu0 %v959_v1  ;;  %v1012_v1 = vld [vmem:[%s6438_s2 + $0x3e0] sm:$0xff] }
 0x109   : > { %v786_v11 = vsel %vm6684_vm1, %v784_v59, %v785_v40  ;;  %v981_v59 = vld [vmem:[%s6438_s2 + $0x2e8] sm:$0xff]  ;;  %1574 = vmatpush.msra.mxu3 %v1012_v1 }
 0x10a   : > { %1419 = vmatpush.msrb.mxu1 %v981_v59  ;;  %1349 = vmatpush.msra.mxu0 %v958_v63  ;;  %v1011_v59 = vld [vmem:[%s6438_s2 + $0x3d8] sm:$0xff]  ;;  %v957_v1 = vld [vmem:[%s6438_s2 + $0x228] sm:$0xff] }
 0x10b   : > { %1575 = vmatpush.msra.mxu3 %v1011_v59  ;;  %v1009_v59 = vld [vmem:[%s6438_s2 + $0x3c8] sm:$0xff] }
 0x10c   : > { %v4802_v12 = vpop.f32.mrf.mxu0  ;;  %1420 = vmatpush.msrb.mxu1 %v980_v8  ;;  %v788_v8 = vsel %vm6684_vm1, %v785_v40, %v787_v51  ;;  %1350 = vmatpush.msra.mxu0 %v957_v1  ;;  %v977_v40 = vld [vmem:[%s6438_s2 + $0x2c8] sm:$0xff]  ;;  %v991_v51 = vld [vmem:[%s6438_s2 + $0x338] sm:$0xff] }
 0x10d   : > { %6683 = vst [vmem:[#allocation33_spill] sm:$0xff] %v4802_v12  ;;  %v1010_v12 = vld [vmem:[%s6438_s2 + $0x3d0] sm:$0xff]  ;;  %v6690_v1 = vld [vmem:[#allocation23_spill] sm:$0xff] }
 0x10e   : > { %1421 = vmatpush.msrb.mxu1 %v979_v6  ;;  %1576 = vmatpush.msra.mxu3 %v1010_v12  ;;  %v4871_v6 = vpop.f32.mrf.mxu3  ;;  %v6689_v12 = vld [vmem:[#allocation21_spill] sm:$0xff] }
 0x10f   : > { %1202 = vmatmul.f32.vlgmr.msrb.gmra.mxu0 %v786_v11  ;;  %v994_v11 = vld [vmem:[%s6438_s2 + $0x350] sm:$0xff]  ;;  %6688 = vst [vmem:[#allocation18_spill] sm:$0xff] %v4871_v6  ;;  %v975_v6 = vld [vmem:[%s6438_s2 + $0x2b8] sm:$0xff] }
 0x110   : > { %3119 = vmatmul.msk.f32.gmra.mxu3 %vm6664_vm8, %v3922_v22  ;;  %1499 = vmatpush.msrb.mxu2 %v994_v11  ;;  %v978_v11 = vld [vmem:[%s6438_s2 + $0x2d0] sm:$0xff] }
 0x111   : > { %1422 = vmatpush.msrb.mxu1 %v978_v11  ;;  %v790_v11 = vrot.slane %v6690_v1, 2  ;;  %1577 = vmatpush.msra.mxu3 %v1009_v59  ;;  %v955_v1 = vld [vmem:[%s6438_s2 + $0x218] sm:$0xff] }
 0x112   : > { %1500 = vmatpush.msrb.mxu2 %v993_v60  ;;  %v789_v60 = vrot.slane %v6689_v12, 2  ;;  %v990_v12 = vld [vmem:[%s6438_s2 + $0x330] sm:$0xff] }
 0x113   : > { %1423 = vmatpush.msrb.mxu1 %v977_v40  ;;  %v1007_v40 = vld [vmem:[%s6438_s2 + $0x3b8] sm:$0xff] }
 0x114   : > { %v4853_v63 = vpop.f32.mrf.mxu0  ;;  %1501 = vmatpush.msrb.mxu2 %v992_v9  ;;  %v1008_v9 = vld [vmem:[%s6438_s2 + $0x3c0] sm:$0xff]  ;;  %v4905_v14 = vsel %vm6684_vm1, %v789_v60, %v790_v11  ;;  %v1005_v60 = vld [vmem:[%s6438_s2 + $0x3a8] sm:$0xff] }
 0x115   : > { %6687 = vst [vmem:[#allocation17_spill] sm:$0xff] %v4853_v63  ;;  %v956_v63 = vld [vmem:[%s6438_s2 + $0x220] sm:$0xff]  ;;  %1578 = vmatpush.msra.mxu3 %v1008_v9  ;;  %v974_v9 = vld [vmem:[%s6438_s2 + $0x2b0] sm:$0xff] }
 0x116   : > { %1351 = vmatpush.msra.mxu0 %v956_v63  ;;  %1502 = vmatpush.msrb.mxu2 %v991_v51  ;;  %v989_v63 = vld [vmem:[%s6438_s2 + $0x328] sm:$0xff]  ;;  %v1006_v51 = vld [vmem:[%s6438_s2 + $0x3b0] sm:$0xff] }
 0x117   : > { %1205 = vmatmul.f32.gmra.mxu0 %v788_v8  ;;  %v976_v8 = vld [vmem:[%s6438_s2 + $0x2c0] sm:$0xff]  ;;  %1579 = vmatpush.msra.mxu3 %v1007_v40  ;;  %v6692_v40 = vld [vmem:[#allocation26_spill] sm:$0xff] }
 0x118   : > { %3120 = vmatmul.msk.f32.gmra.mxu3 %vm6668_vm0, %v4115_v13  ;;  %1424 = vmatpush.msrb.mxu1 %v976_v8  ;;  %v988_v8 = vld [vmem:[%s6438_s2 + $0x320] sm:$0xff]  ;;  %vm6704_vm0 = vcmp.ge.s32.totalorder %v3718_v56, 0 }
 0x119   : > { %1352 = vmatpush.msra.mxu0 %v955_v1  ;;  %1503 = vmatpush.msrb.mxu2 %v990_v12  ;;  %v973_v12 = vld [vmem:[%s6438_s2 + $0x2a8] sm:$0xff]  ;;  %v987_v1 = vld [vmem:[%s6438_s2 + $0x318] sm:$0xff] }
 0x11a   : > { %1425 = vmatpush.msrb.mxu1 %v975_v6  ;;  %v954_v6 = vld [vmem:[%s6438_s2 + $0x210] sm:$0xff]  ;;  %1580 = vmatpush.msra.mxu3 %v1006_v51  ;;  %v953_v51 = vld [vmem:[%s6438_s2 + $0x208] sm:$0xff] }
 0x11b   : > { %1504 = vmatpush.msrb.mxu2 %v989_v63  ;;  %v792_v63 = vrot.slane %v6692_v40, 2  ;;  %1353 = vmatpush.msra.mxu0 %v954_v6  ;;  %v4945_v40 = vpop.f32.mrf.mxu3  ;;  %v985_v6 = vld [vmem:[%s6438_s2 + $0x308] sm:$0xff] }
 0x11c   : > { %v4902_v59 = vpop.f32.mrf.mxu0  ;;  %1426 = vmatpush.msrb.mxu1 %v974_v9  ;;  %v1004_v9 = vld [vmem:[%s6438_s2 + $0x3a0] sm:$0xff]  ;;  %1581 = vmatpush.msra.mxu3 %v1005_v60  ;;  %6693 = vst [vmem:[#allocation21_spill] sm:$0xff] %v4945_v40  ;;  %v971_v60 = vld [vmem:[%s6438_s2 + $0x298] sm:$0xff] }
 0x11d   : > { %6691 = vst [vmem:[#allocation19_spill] sm:$0xff] %v4902_v59  ;;  %1505 = vmatpush.msrb.mxu2 %v988_v8  ;;  %v972_v59 = vld [vmem:[%s6438_s2 + $0x2a0] sm:$0xff]  ;;  %v1003_v8 = vld [vmem:[%s6438_s2 + $0x398] sm:$0xff]  ;;  %1354 = vmatpush.msra.mxu0 %v953_v51  ;;  %v793_v40 = vsel %vm6684_vm1, %v790_v11, %v792_v63  ;;  %v970_v51 = vld [vmem:[%s6438_s2 + $0x290] sm:$0xff] }
 0x11e   : > { %1427 = vmatpush.msrb.mxu1 %v973_v12  ;;  %1582 = vmatpush.msra.mxu3 %v1004_v9  ;;  %v1002_v12 = vld [vmem:[%s6438_s2 + $0x390] sm:$0xff]  ;;  %v952_v9 = vld [vmem:[%s6438_s2 + $0x200] sm:$0xff]  ;;  %v1001_v11 = vld [vmem:[%s6438_s2 + $0x388] sm:$0xff] }
 0x11f   : > { %1208 = vmatmul.f32.gmra.mxu0 %v4905_v14  ;;  %1506 = vmatpush.msrb.mxu2 %v987_v1  ;;  %v324_v1 = vld [vmem:[#allocation2 + $0xf0] sm:$0xff] }
 0x120   : > { %3121 = vmatmul.msk.f32.gmra.mxu3 %vm6672_vm5, %v6670_v50  ;;  %1428 = vmatpush.msrb.mxu1 %v972_v59  ;;  %v6695_v59 = vld [vmem:[#allocation29_spill] sm:$0xff] }
 0x121   : > { %1507 = vmatpush.msrb.mxu2 %v986_v34  ;;  %1583 = vmatpush.msra.mxu3 %v1003_v8  ;;  %v984_v34 = vld [vmem:[%s6438_s2 + $0x300] sm:$0xff]  ;;  %v794_v63 = vrot.slane %v6695_v59, 2  ;;  %v795_v8 = vrot.slane %v4235_v57, 2 }
 0x122   : > { %1429 = vmatpush.msrb.mxu1 %v971_v60  ;;  %1355 = vmatpush.msra.mxu0 %v952_v9  ;;  %v969_v60 = vld [vmem:[%s6438_s2 + $0x288] sm:$0xff]  ;;  %v968_v57 = vld [vmem:[%s6438_s2 + $0x280] sm:$0xff]  ;;  %v6696_v9 = vld [vmem:[#allocation15_spill] sm:$0xff] }
 0x123   : > { %1508 = vmatpush.msrb.mxu2 %v985_v6  ;;  %1584 = vmatpush.msra.mxu3 %v1002_v12  ;;  %v1031_v6 = vld [vmem:[%s6438_s2 + $0x478] sm:$0xff]  ;;  %v361_v12 = vmul.f32 %v3716_v55, %v324_v1  ;;  %v523_v59 = vadd.s32 10, %v6696_v9  ;;  %v4996_v1 = vpop.f32.mrf.mxu3 }
 0x124   : > { %v4956_v47 = vpop.f32.mrf.mxu0  ;;  %1430 = vmatpush.msrb.mxu1 %v970_v51  ;;  %1648 = vmatpush.msrb.mxu0 %v1031_v6  ;;  %6697 = vst [vmem:[#allocation26_spill] sm:$0xff] %v4996_v1  ;;  %v6750_v1 = vld [vmem:[#allocation31_spill] sm:$0xff] }
 0x125   : > { %6694 = vst [vmem:[#allocation23_spill] sm:$0xff] %v4956_v47  ;;  %1509 = vmatpush.msrb.mxu2 %v984_v34  ;;  %v1000_v47 = vld [vmem:[%s6438_s2 + $0x380] sm:$0xff]  ;;  %1585 = vmatpush.msra.mxu3 %v1001_v11  ;;  %v5001_v34 = vsel %vm6684_vm1, %v794_v63, %v795_v8  ;;  %v398_v11 = vadd.f32 %v3736_v62, %v361_v12 }
 0x126   : > { %3126 = vmatmul.msk.f32.vlgmr.msrb.gmra.mxu2 %vm4184_vm13, %v4178_v29  ;;  %1431 = vmatpush.msrb.mxu1 %v969_v60  ;;  %v325_v29 = vld [vmem:[#allocation2 + $0xf8] sm:$0xff]  ;;  %vm542_vm13 = vcmp.ge.s32.totalorder %v523_v59, 0  ;;  %v797_v60 = vrot.slane %v6699_v46, 2 }
 0x127   : > { %1211 = vmatmul.f32.gmra.mxu0 %v793_v40  ;;  %1586 = vmatpush.msra.mxu3 %v1000_v47  ;;  %v1030_v47 = vld [vmem:[%s6438_s2 + $0x470] sm:$0xff]  ;;  %v470_v63 = vmul.f32 0.1, %v398_v11  ;;  %v362_v6 = vmul.f32 %v3716_v55, %v325_v29  ;;  %vm434_vm1 = vcmp.ge.f32.partialorder %v398_v11, 0.0 }
 0x128   : > { %3122 = vmatmul.msk.f32.gmra.mxu3 %vm6676_vm4, %v6674_v41  ;;  %1432 = vmatpush.msrb.mxu1 %v968_v57  ;;  %vm554_vm4 = vcmp.lt.s32.totalorder %v523_v59, 16 }
 0x129   : > { %1433 = vmatmul.f32.vlgmr.msrb.gmra.mxu1 %v4905_v14  ;;  %1649 = vmatpush.msrb.mxu0 %v1030_v47  ;;  %vm5014_vm5 = vmand %vm542_vm13, %vm554_vm4  ;;  %v5026_v59 = vsel %vm434_vm1, %v398_v11, %v470_v63  ;;  %v399_v46 = vadd.f32 %v3736_v62, %v362_v6  ;;  %vm6761_vm13 = vcmp.ge.s32.totalorder %v3718_v56, 0 }
 0x12a   : > { %vm5032_vm8 = vmand %vm5014_vm5, %vm6704_vm0 }
 0x12b   : > { %v5037_v47 = vpop.f32.mrf.mxu3 }
 0x12c   : > { %v4998_v51 = vpop.f32.mrf.mxu0  ;;  %6707 = vst [vmem:[#allocation36_spill] sm:$0xff] %v5037_v47 }
 0x12d   : > { %6698 = vst [vmem:[#allocation29_spill] sm:$0xff] %v4998_v51 }
 0x12e   : > { %3127 = vmatmul.msk.f32.gmra.mxu2 %vm4139_vm10, %v4189_v43  ;;  %v471_v43 = vmul.f32 0.1, %v399_v46  ;;  %vm435_vm10 = vcmp.ge.f32.partialorder %v399_v46, 0.0 }
 0x12f   : > { %1214 = vmatmul.f32.gmra.mxu0 %v5001_v34 }
 0x130   : > { %3123 = vmatmul.msk.f32.gmra.mxu3 %vm6680_vm15, %v6679_v36  ;;  %vm6703_vm15 = vcmask 1045504   ;;  %v5057_v6 = vsel %vm435_vm10, %v399_v46, %v471_v43  ;;  %v6714_v46 = vld [vmem:[#allocation27_spill] sm:$0xff] }
 0x131   : > { %v5024_v57 = vsel %vm6703_vm15, %v795_v8, %v797_v60  ;;  %1436 = vmatmul.f32.gmra.mxu1 %v793_v40  ;;  %v1029_v8 = vld [vmem:[%s6438_s2 + $0x468] sm:$0xff]  ;;  %v6709_v40 = vld [vmem:[#allocation38_spill] sm:$0xff]  ;;  %vm6711_vm0 = vmmov %vm6703_vm15 }
 0x132   : > { %v6710_v60 = vrot.slane %v6709_v40, 2  ;;  %1650 = vmatpush.msrb.mxu0 %v1029_v8  ;;  %v6718_v8 = vld [vmem:[#allocation40_spill] sm:$0xff]  ;;  %v1027_v40 = vld [vmem:[%s6438_s2 + $0x458] sm:$0xff] }
 0x133   : > { %v5061_v31 = vpop.f32.mrf.mxu3 }
 0x134   : > { %v5021_v12 = vpop.f32.mrf.mxu0  ;;  %v5055_v63 = vsel %vm6711_vm0, %v799_v33, %v6710_v60  ;;  %6712 = vst [vmem:[#allocation38_spill] sm:$0xff] %v5061_v31  ;;  %1651 = vmatpush.msrb.mxu0 %v1028_v45  ;;  %v6715_v33 = vld [vmem:[#allocation34_spill] sm:$0xff]  ;;  %v6721_v45 = vld [vmem:[#allocation43_spill] sm:$0xff] }
 0x135   : > { %6702 = vst [vmem:[#allocation15_spill] sm:$0xff] %v5021_v12 }
 0x136   : > { %3128 = vmatmul.msk.f32.gmra.mxu2 %vm4467_vm3, %v4461_v26  ;;  %1652 = vmatpush.msrb.mxu0 %v1027_v40  ;;  %vm6743_vm3 = vnez %v6675_v61 }
 0x137   : > { %1217 = vmatmul.f32.gmra.mxu0 %v5024_v57 }
 0x138   : > { %3124 = vmatmul.msk.f32.gmra.mxu3 %vm5032_vm8, %v5026_v59 }
 0x139   : > { %1439 = vmatmul.f32.gmra.mxu1 %v5001_v34 }
 0x13b   : > { %v5077_v43 = vpop.f32.mrf.mxu3 }
 0x13c   : > { %v5050_v11 = vpop.f32.mrf.mxu0 }
 0x13d   : > { %6708 = vst [vmem:[#allocation51_spill] sm:$0xff] %v5050_v11 }
 0x13e   : > { %3129 = vmatmul.msk.f32.gmra.mxu2 %vm4341_vm9, %v4355_v27  ;;  %v6717_v27 = vld [vmem:[#allocation30_spill] sm:$0xff]  ;;  %vm6728_vm9 = vnez %v6550_v10 }
 0x13f   : > { %1220 = vmatmul.f32.gmra.mxu0 %v5055_v63 }
 0x140   : > { %3125 = vmatmul.msk.f32.gmra.mxu3 %vm5014_vm5, %v5057_v6 }
 0x141   : > { %1442 = vmatmul.f32.gmra.mxu1 %v5024_v57 }
 0x143   : > { %v5093_v60 = vpop.f32.mrf.mxu3 }
 0x144   : > { %v5069_v26 = vpop.f32.mrf.mxu0 }
 0x145   : > { %6713 = vst [vmem:[#allocation52_spill] sm:$0xff] %v5069_v26  ;;  %v6755_v26 = vld [vmem:[#allocation49_spill] sm:$0xff] }
 0x146   : > { %3130 = vmatmul.msk.f32.gmra.mxu2 %vm4447_vm2, %v4422_v16  ;;  %vm6735_vm2 = vnez %v6569_v35 }
 0x147   : > { %1356 = vmatmul.f32.vlgmr.msra.gmra.mxu0 %v6714_v46  ;;  %v1026_v46 = vld [vmem:[%s6438_s2 + $0x450] sm:$0xff] }
 0x148   : > { %1587 = vmatmul.f32.vlgmr.msra.gmra.mxu3 %v6715_v33  ;;  %1653 = vmatpush.msrb.mxu0 %v1026_v46  ;;  %v1022_v46 = vld [vmem:[%s6438_s2 + $0x430] sm:$0xff] }
 0x149   : > { %1445 = vmatmul.f32.gmra.mxu1 %v5055_v63 }
 0x14b   : > { %v5108_v23 = vpop.f32.mrf.mxu3 }
 0x14c   : > { %v5082_v52 = vpop.f32.mrf.mxu0 }
 0x14d   : > { %6716 = vst [vmem:[#allocation27_spill] sm:$0xff] %v5082_v52  ;;  %v6754_v52 = vld [vmem:[#allocation35_spill] sm:$0xff] }
 0x14e   : > { %3131 = vmatmul.msk.f32.gmra.mxu2 %vm4432_vm7, %v4418_v3  ;;  %vm6739_vm7 = vnez %v6671_v30 }
 0x14f   : > { %1359 = vmatmul.f32.gmra.mxu0 %v6717_v27  ;;  %v6723_v27 = vld [vmem:[#allocation42_spill] sm:$0xff] }
 0x150   : > { %1590 = vmatmul.f32.gmra.mxu3 %v6718_v8 }
 0x151   : > { %1448 = vmatmul.f32.gmra.mxu1 %v6720_v0 }
 0x153   : > { %v5123_v15 = vpop.f32.mrf.mxu3 }
 0x154   : > { %v5095_v16 = vpop.f32.mrf.mxu0 }
 0x155   : > { %6719 = vst [vmem:[#allocation34_spill] sm:$0xff] %v5095_v16 }
 0x156   : > { %3132 = vmatmul.msk.f32.gmra.mxu2 %vm4541_vm14, %v4533_v48  ;;  %v1025_v48 = vld [vmem:[%s6438_s2 + $0x448] sm:$0xff] }
 0x157   : > { %1362 = vmatmul.f32.gmra.mxu0 %v6715_v33 }
 0x158   : > { %1593 = vmatmul.f32.gmra.mxu3 %v6721_v45  ;;  %1654 = vmatpush.msrb.mxu0 %v1025_v48 }
 0x159   : > { %1451 = vmatmul.f32.gmra.mxu1 %v6723_v27 }
 0x15a   : > { %1655 = vmatpush.msrb.mxu0 %v1024_v24 }
 0x15b   : > { %v5139_v40 = vpop.f32.mrf.mxu3 }
 0x15c   : > { %v5106_v3 = vpop.f32.mrf.mxu0 }
 0x15d   : > { %6722 = vst [vmem:[#allocation30_spill] sm:$0xff] %v5106_v3  ;;  %v6753_v3 = vld [vmem:[#allocation47_spill] sm:$0xff] }
 0x15e   : > { %3133 = vmatmul.msk.f32.gmra.mxu2 %vm4526_vm6, %v4535_v25  ;;  %vm6746_vm6 = vnez %v6588_v2 }
 0x15f   : > { %1365 = vmatmul.f32.gmra.mxu0 %v6718_v8  ;;  %v5137_v8 = vpop.f32.mrf.mxu2 }
 0x160   : > { %1596 = vmatmul.f32.gmra.mxu3 %v4575_v19  ;;  %6726 = vst [vmem:[#allocation43_spill] sm:$0xff] %v5137_v8  ;;  %v2185_v8 = vld [vmem:[#allocation4 + $0x78] sm:$0xff] }
 0x161   : > { %1454 = vmatmul.f32.gmra.mxu1 %v4553_v39 }
 0x162   : > { %2314 = vmatpush.msra.mxu1 %v2185_v8 }
 0x164   : > { %v5116_v33 = vpop.f32.mrf.mxu0 }
 0x165   : > { %6724 = vst [vmem:[#allocation40_spill] sm:$0xff] %v5116_v33 }
 0x166   : > { %3134 = vmatmul.msk.f32.gmra.mxu2 %vm4596_vm11, %v4590_v28 }
 0x167   : > { %1368 = vmatmul.f32.gmra.mxu0 %v6721_v45  ;;  %v5157_v32 = vpop.f32.mrf.mxu2 }
 0x168   : > { %1599 = vmatmul.f32.gmra.mxu3 %v4601_v4  ;;  %6729 = vst [vmem:[#allocation53_spill] sm:$0xff] %v5157_v32 }
 0x169   : > { %1457 = vmatmul.f32.gmra.mxu1 %v4578_v38 }
 0x16c   : > { %v5129_v25 = vpop.f32.mrf.mxu0 }
 0x16d   : > { %6725 = vst [vmem:[#allocation39_spill] sm:$0xff] %v5129_v25 }
 0x16e   : > { %3135 = vmatmul.msk.f32.gmra.mxu2 %vm3800_vm12, %v3831_v44  ;;  %v5159_v44 = vpop.f32.mrf.mxu3  ;;  %vm6731_vm12 = vnez %v6545_v54 }
 0x16f   : > { %1371 = vmatmul.f32.gmra.mxu0 %v4575_v19  ;;  %v1023_v19 = vld [vmem:[%s6438_s2 + $0x438] sm:$0xff] }
 0x170   : > { %1602 = vmatmul.f32.gmra.mxu3 %v4620_v53  ;;  %1656 = vmatpush.msrb.mxu0 %v1023_v19  ;;  %v6738_v19 = vld [vmem:[#allocation20_spill] sm:$0xff] }
 0x171   : > { %1460 = vmatmul.f32.gmra.mxu1 %v4604_v5 }
 0x172   : > { %1657 = vmatpush.msrb.mxu0 %v1022_v46  ;;  %v1020_v46 = vld [vmem:[%s6438_s2 + $0x420] sm:$0xff] }
 0x174   : > { %v5144_v28 = vpop.f32.mrf.mxu0 }
 0x175   : > { %6727 = vst [vmem:[#allocation42_spill] sm:$0xff] %v5144_v28  ;;  %v327_v28 = vld [vmem:[#allocation2 + $0x108] sm:$0xff] }
 0x176   : > { %3136 = vmatmul.msk.f32.gmra.mxu2 %vm6728_vm9, %v3916_v17  ;;  %v5176_v17 = vpop.f32.mrf.mxu2  ;;  %v5178_v48 = vpop.f32.mrf.mxu3  ;;  %v364_v25 = vmul.f32 %v3716_v55, %v327_v28  ;;  %v328_v28 = vld [vmem:[#allocation2 + $0x110] sm:$0xff]  ;;  %vm6766_vm9 = vcmask 1045504  }
 0x177   : > { %1374 = vmatmul.f32.gmra.mxu0 %v4601_v4  ;;  %v5165_v4 = vpop.f32.mrf.mxu1  ;;  %6733 = vst [vmem:[#allocation56_spill] sm:$0xff] %v5176_v17  ;;  %v6764_v17 = vld [vmem:[#allocation16_spill] sm:$0xff] }
 0x178   : > { %1605 = vmatmul.f32.gmra.mxu3 %v4635_v21  ;;  %6734 = vst [vmem:[#allocation57_spill] sm:$0xff] %v5178_v48  ;;  %vm6765_vm10 = vcmp.lt.s32.totalorder %v6764_v17, 16 }
 0x179   : > { %1463 = vmatmul.f32.gmra.mxu1 %v4623_v37  ;;  %vm642_vm0 = vmand %vm5014_vm5, %vm6765_vm10 }
 0x17c   : > { %v5161_v45 = vpop.f32.mrf.mxu0 }
 0x17d   : > { %6730 = vst [vmem:[#allocation54_spill] sm:$0xff] %v5161_v45  ;;  %v6749_v45 = vld [vmem:[#allocation46_spill] sm:$0xff] }
 0x17e   : > { %3137 = vmatmul.msk.f32.gmra.mxu2 %vm6731_vm12, %v3922_v22  ;;  %v1021_v22 = vld [vmem:[%s6438_s2 + $0x428] sm:$0xff]  ;;  %v5194_v24 = vpop.f32.mrf.mxu2 }
 0x17f   : > { %1377 = vmatmul.f32.gmra.mxu0 %v4620_v53  ;;  %v5183_v53 = vpop.f32.mrf.mxu1  ;;  %6736 = vst [vmem:[#allocation58_spill] sm:$0xff] %v5194_v24 }
 0x180   : > { %1608 = vmatmul.f32.gmra.mxu3 %v4651_v49  ;;  %1658 = vmatpush.msrb.mxu0 %v1021_v22 }
 0x181   : > { %1466 = vmatmul.f32.gmra.mxu1 %v4638_v58 }
 0x182   : > { %1659 = vmatpush.msrb.mxu0 %v1020_v46  ;;  %v6745_v46 = vld [vmem:[#allocation28_spill] sm:$0xff] }
 0x184   : > { %v5174_v10 = vpop.f32.mrf.mxu0 }
 0x185   : > { %6732 = vst [vmem:[#allocation55_spill] sm:$0xff] %v5174_v10  ;;  %v6744_v10 = vld [vmem:[#allocation45_spill] sm:$0xff] }
 0x186   : > { %3138 = vmatmul.msk.f32.gmra.mxu2 %vm6735_vm2, %v4115_v13  ;;  %v5213_v22 = vpop.f32.mrf.mxu2  ;;  %vm6771_vm2 = vcmask 1046528  }
 0x187   : > { %1380 = vmatmul.f32.gmra.mxu0 %v4635_v21  ;;  %v5197_v21 = vpop.f32.mrf.mxu3  ;;  %v5203_v13 = vpop.f32.mrf.mxu1  ;;  %6741 = vst [vmem:[#allocation20_spill] sm:$0xff] %v5213_v22 }
 0x188   : > { %1611 = vmatmul.f32.gmra.mxu3 %v4668_v20  ;;  %6737 = vst [vmem:[#allocation59_spill] sm:$0xff] %v5197_v21 }
 0x189   : > { %1469 = vmatmul.f32.gmra.mxu1 %v4654_v7 }
 0x18c   : > { %v5188_v54 = vpop.f32.mrf.mxu0 }
 0x18e   : > { %3139 = vmatmul.msk.f32.gmra.mxu2 %vm6739_vm7, %v6670_v50  ;;  %vm6773_vm7 = vmmov %vm6771_vm2 }
 0x18f   : > { %1383 = vmatmul.f32.gmra.mxu0 %v4651_v49  ;;  %v6740_v49 = vld [vmem:[#allocation22_spill] sm:$0xff]  ;;  %v5215_v31 = vpop.f32.mrf.mxu3  ;;  %v5222_v30 = vpop.f32.mrf.mxu1 }
 0x190   : > { %1614 = vmatmul.f32.gmra.mxu3 %v6738_v19  ;;  %6742 = vst [vmem:[#allocation22_spill] sm:$0xff] %v5215_v31 }
 0x191   : > { %1472 = vmatmul.f32.gmra.mxu1 %v4671_v42 }
 0x194   : > { %v5205_v35 = vpop.f32.mrf.mxu0 }
 0x196   : > { %3140 = vmatmul.msk.f32.gmra.mxu2 %vm6743_vm3, %v6674_v41  ;;  %v5233_v41 = vpop.f32.mrf.mxu2 }
 0x197   : > { %1386 = vmatmul.f32.gmra.mxu0 %v4668_v20  ;;  %v1019_v20 = vld [vmem:[%s6438_s2 + $0x418] sm:$0xff]  ;;  %6747 = vst [vmem:[#allocation45_spill] sm:$0xff] %v5233_v41  ;;  %v5235_v61 = vpop.f32.mrf.mxu3  ;;  %v524_v41 = vadd.s32 11, %v6696_v9  ;;  %v1017_v9 = vld [vmem:[%s6438_s2 + $0x408] sm:$0xff] }
 0x198   : > { %1617 = vmatmul.f32.gmra.mxu3 %v6740_v49  ;;  %1660 = vmatpush.msrb.mxu0 %v1019_v20  ;;  %6748 = vst [vmem:[#allocation28_spill] sm:$0xff] %v5235_v61  ;;  %v1018_v20 = vld [vmem:[%s6438_s2 + $0x410] sm:$0xff] }
 0x199   : > { %1475 = vmatmul.f32.gmra.mxu1 %v6744_v10  ;;  %vm543_vm14 = vcmp.ge.s32.totalorder %v524_v41, 0  ;;  %vm555_vm11 = vcmp.lt.s32.totalorder %v524_v41, 16 }
 0x19a   : > { %1661 = vmatpush.msrb.mxu0 %v1018_v20  ;;  %v401_v20 = vadd.f32 %v3736_v62, %v364_v25  ;;  %v365_v25 = vmul.f32 %v3716_v55, %v328_v28  ;;  %vm5282_vm15 = vmand %vm543_vm14, %vm555_vm11 }
 0x19b   : > { %vm5296_vm1 = vmand %vm5282_vm15, %vm6761_vm13 }
 0x19c   : > { %v5220_v50 = vpop.f32.mrf.mxu0  ;;  %1662 = vmatpush.msrb.mxu0 %v1017_v9  ;;  %vm437_vm4 = vcmp.ge.f32.partialorder %v401_v20, 0.0  ;;  %vm6775_vm11 = vmmov %vm6771_vm2 }
 0x19e   : > { %3141 = vmatmul.msk.f32.gmra.mxu2 %vm6746_vm6, %v6679_v36  ;;  %v326_v36 = vld [vmem:[#allocation2 + $0x100] sm:$0x3]  ;;  %vm6774_vm6 = vmmov %vm6765_vm10  ;;  %vm1929_vm10 = vcmask 1040384  }
 0x19f   : > { %1389 = vmatmul.f32.gmra.mxu0 %v6738_v19  ;;  %v5241_v19 = vpop.f32.mrf.mxu1  ;;  %v5255_v33 = vpop.f32.mrf.mxu3  ;;  %v363_v16 = vmul.f32 %v3716_v55, %v326_v36  ;;  %v473_v36 = vmul.f32 0.1, %v401_v20  ;;  %vm645_vm14 = vmand %vm5282_vm15, %vm6774_vm6 }
 0x1a0   : > { %1620 = vmatmul.f32.gmra.mxu3 %v6745_v46  ;;  %6752 = vst [vmem:[#allocation31_spill] sm:$0xff] %v5255_v33  ;;  %v676_v33 = vsel %vm5032_vm8, %v5026_v59, 0.0 }
 0x1a1   : > { %1478 = vmatmul.f32.gmra.mxu1 %v6749_v45  ;;  %v864_v24 = vrot.slane %v676_v33, 2 }
 0x1a4   : > { %v5237_v47 = vpop.f32.mrf.mxu0 }
 0x1a6   : > { %3142 = vmatmul.msk.f32.gmra.mxu2 %vm5032_vm8, %v5026_v59  ;;  %v6760_v59 = vld [vmem:[#allocation41_spill] sm:$0xff] }
 0x1a7   : > { %1392 = vmatmul.f32.gmra.mxu0 %v6740_v49  ;;  %v5253_v49 = vpop.f32.mrf.mxu2  ;;  %v5263_v22 = vpop.f32.mrf.mxu1 }
 0x1a8   : > { %1623 = vmatmul.f32.gmra.mxu3 %v6750_v1  ;;  %6751 = vst [vmem:[#allocation46_spill] sm:$0xff] %v5253_v49  ;;  %v400_v49 = vadd.f32 %v3736_v62, %v363_v16  ;;  %v677_v16 = vsel %vm5014_vm5, %v5057_v6, 0.0  ;;  %v5289_v29 = vpop.f32.mrf.mxu3 }
 0x1a9   : > { %1481 = vmatmul.f32.gmra.mxu1 %v6753_v3  ;;  %v865_v28 = vrot.slane %v677_v16, 2  ;;  %6759 = vst [vmem:[#allocation35_spill] sm:$0xff] %v5289_v29  ;;  %v858_v12 = vrot.slane %v677_v16, 1 }
 0x1aa   : > { %v472_v9 = vmul.f32 0.1, %v400_v49  ;;  %vm436_vm8 = vcmp.ge.f32.partialorder %v400_v49, 0.0 }
 0x1ac   : > { %v5250_v2 = vpop.f32.mrf.mxu0 }
 0x1ae   : > { %3143 = vmatmul.msk.f32.gmra.mxu2 %vm5014_vm5, %v5057_v6  ;;  %v509_v6 = vsel %vm437_vm4, %v401_v20, %v473_v36  ;;  %v5308_v20 = vsel %vm6766_vm9, %v864_v24, %v865_v28  ;;  %v2201_v24 = vld [vmem:[#allocation4 + $0xf8] sm:$0xff]  ;;  %vm6770_vm5 = vmmov %vm6766_vm9 }
 0x1af   : > { %1395 = vmatmul.f32.gmra.mxu0 %v6745_v46  ;;  %v5287_v11 = vpop.f32.mrf.mxu2  ;;  %v5310_v56 = vpop.f32.mrf.mxu1  ;;  %2379 = vmatpush.msra.mxu2 %v2201_v24  ;;  %vm6777_vm4 = vmmov %vm6771_vm2 }
 0x1b0   : > { %1626 = vmatmul.f32.gmra.mxu3 %v6754_v52  ;;  %6758 = vst [vmem:[#allocation47_spill] sm:$0xff] %v5287_v11  ;;  %v508_v11 = vsel %vm436_vm8, %v400_v49, %v472_v9  ;;  %v6767_v49 = vld [vmem:[#allocation44_spill] sm:$0xff]  ;;  %v857_v9 = vrot.slane %v676_v33, 1  ;;  %v5322_v21 = vpop.f32.mrf.mxu3  ;;  %vm6812_vm9 = vmmov %vm6770_vm5 }
 0x1b1   : > { %1484 = vmatmul.f32.gmra.mxu1 %v6755_v26  ;;  %v678_v31 = vsel %vm642_vm0, %v508_v11, 0.0  ;;  %6769 = vst [vmem:[#allocation41_spill] sm:$0xff] %v5322_v21  ;;  %v6796_v21 = vld [vmem:[#allocation48_spill] sm:$0xff]  ;;  %vm5541_vm0 = vmneg %vm1929_vm10 }
 0x1b2   : > { %v867_v14 = vrot.slane %v678_v31, 2  ;;  %v859_v48 = vsel %vm6771_vm2, %v857_v9, %v858_v12  ;;  %v2184_v9 = vld [vmem:[#allocation4 + $0x70] sm:$0xff] }
 0x1b3   : > { %2315 = vmatpush.msra.mxu1 %v2184_v9  ;;  %v2182_v9 = vld [vmem:[#allocation4 + $0x60] sm:$0xff] }
 0x1b4   : > { %v5269_v46 = vpop.f32.mrf.mxu0  ;;  %v5327_v11 = vsel %vm6770_vm5, %v865_v28, %v867_v14 }
 0x1b6   : > { %3144 = vmatmul.msk.f32.gmra.mxu2 %vm5296_vm1, %v509_v6 }
 0x1b7   : > { %1398 = vmatmul.f32.gmra.mxu0 %v6750_v1  ;;  %v402_v1 = vadd.f32 %v3736_v62, %v365_v25  ;;  %v1016_v25 = vld [vmem:[%s6438_s2 + $0x400] sm:$0xff]  ;;  %v5320_v51 = vpop.f32.mrf.mxu2  ;;  %v5332_v33 = vpop.f32.mrf.mxu1 }
 0x1b8   : > { %1629 = vmatmul.f32.gmra.mxu3 %v6760_v59  ;;  %1663 = vmatpush.msrb.mxu0 %v1016_v25  ;;  %6768 = vst [vmem:[#allocation49_spill] sm:$0xff] %v5320_v51  ;;  %v5338_v14 = vpop.f32.mrf.mxu3  ;;  %v5345_v51 = vsel %vm5296_vm1, %v509_v6, 0.0 }
 0x1b9   : > { %v474_v29 = vmul.f32 0.1, %v402_v1  ;;  %vm438_vm12 = vcmp.ge.f32.partialorder %v402_v1, 0.0  ;;  %1487 = vmatmul.f32.gmra.mxu1 %v5308_v20  ;;  %6772 = vst [vmem:[#allocation16_spill] sm:$0xff] %v5338_v14  ;;  %v2212_v14 = vld [vmem:[#allocation4 + $0x150] sm:$0xff] }
 0x1bb   : > { %v510_v32 = vsel %vm438_vm12, %v402_v1, %v474_v29  ;;  %v860_v29 = vrot.slane %v678_v31, 1  ;;  %v2200_v1 = vld [vmem:[#allocation4 + $0xf0] sm:$0xff] }
 0x1bc   : > { %v5312_v36 = vpop.f32.mrf.mxu0  ;;  %2380 = vmatpush.msra.mxu2 %v2200_v1  ;;  %v2198_v1 = vld [vmem:[#allocation4 + $0xe0] sm:$0xff] }
 0x1bd   : > { %v861_v8 = vsel %vm6773_vm7, %v858_v12, %v860_v29  ;;  %vm6813_vm7 = vmmov %vm6812_vm9 }
 0x1be   : > { %3145 = vmatmul.msk.f32.gmra.mxu2 %vm5282_vm15, %v510_v32 }
 0x1bf   : > { %1401 = vmatmul.f32.gmra.mxu0 %v6754_v52  ;;  %v329_v52 = vld [vmem:[#allocation2 + $0x118] sm:$0x3] }
 0x1c0   : > { %1632 = vmatmul.f32.gmra.mxu3 %v6767_v49  ;;  %v366_v16 = vmul.f32 %v3716_v55, %v329_v52  ;;  %v5349_v55 = vsel %vm5282_vm15, %v510_v32, 0.0  ;;  %v2199_v32 = vld [vmem:[#allocation4 + $0xe8] sm:$0xff] }
 0x1c1   : > { %1490 = vmatmul.f32.gmra.mxu1 %v5327_v11  ;;  %2381 = vmatpush.msra.mxu2 %v2199_v32  ;;  %v2180_v32 = vld [vmem:[#allocation4 + $0x50] sm:$0xff] }
 0x1c2   : > { %v403_v28 = vadd.f32 %v3736_v62, %v366_v16  ;;  %v874_v62 = vrot.slane %v5345_v51, 1  ;;  %v2183_v16 = vld [vmem:[#allocation4 + $0x68] sm:$0xff] }
 0x1c3   : > { %2316 = vmatpush.msra.mxu1 %v2183_v16  ;;  %2382 = vmatpush.msra.mxu2 %v2198_v1  ;;  %v2195_v16 = vld [vmem:[#allocation4 + $0xc8] sm:$0xff]  ;;  %v2178_v1 = vld [vmem:[#allocation4 + $0x40] sm:$0xff] }
 0x1c4   : > { %v5329_v25 = vpop.f32.mrf.mxu0  ;;  %v475_v31 = vmul.f32 0.1, %v403_v28  ;;  %vm439_vm3 = vcmp.ge.f32.partialorder %v403_v28, 0.0 }
 0x1c5   : > { %2317 = vmatpush.msra.mxu1 %v2182_v9 }
 0x1c6   : > { %v511_v12 = vsel %vm439_vm3, %v403_v28, %v475_v31 }
 0x1c7   : > { %1404 = vmatmul.f32.gmra.mxu0 %v6760_v59  ;;  %v875_v59 = vrot.slane %v5349_v55, 1  ;;  %v5363_v52 = vsel %vm645_vm14, %v511_v12, 0.0  ;;  %v2181_v12 = vld [vmem:[#allocation4 + $0x58] sm:$0xff]  ;;  %vm6817_vm14 = vmmov %vm6777_vm4 }
 0x1c8   : > { %1635 = vmatmul.f32.gmra.mxu3 %v859_v48  ;;  %v877_v29 = vrot.slane %v5363_v52, 1  ;;  %2318 = vmatpush.msra.mxu1 %v2181_v12 }
 0x1c9   : > { %v876_v6 = vsel %vm6775_vm11, %v874_v62, %v875_v59  ;;  %vm6818_vm11 = vmmov %vm6813_vm7 }
 0x1ca   : > { %v878_v41 = vsel %vm6777_vm4, %v875_v59, %v877_v29  ;;  %v2196_v59 = vld [vmem:[#allocation4 + $0xd0] sm:$0xff]  ;;  %2319 = vmatpush.msra.mxu1 %v2180_v32  ;;  %v5383_v29 = vpop.f32.mrf.mxu1 }
 0x1cc   : > { %v5340_v24 = vpop.f32.mrf.mxu0 }
 0x1cf   : > { %1407 = vmatmul.f32.gmra.mxu0 %v6767_v49  ;;  %v5361_v49 = vpop.f32.mrf.mxu3 }
 0x1d0   : > { %1638 = vmatmul.f32.gmra.mxu3 %v861_v8  ;;  %6776 = vst [vmem:[#allocation44_spill] sm:$0xff] %v5361_v49  ;;  %v2189_v49 = vld [vmem:[#allocation4 + $0x98] sm:$0xff] }
 0x1d4   : > { %v5358_v61 = vpop.f32.mrf.mxu0 }
 0x1d7   : > { %1410 = vmatmul.f32.gmra.mxu0 %v859_v48  ;;  %v5369_v28 = vpop.f32.mrf.mxu3  ;;  %v2197_v48 = vld [vmem:[#allocation4 + $0xd8] sm:$0xff] }
 0x1d8   : > { %1641 = vmatmul.f32.gmra.mxu3 %v876_v6  ;;  %6778 = vst [vmem:[#allocation60_spill] sm:$0xff] %v5369_v28  ;;  %2383 = vmatpush.msra.mxu2 %v2197_v48  ;;  %v2193_v48 = vld [vmem:[#allocation4 + $0xb8] sm:$0xff] }
 0x1da   : > { %2384 = vmatpush.msra.mxu2 %v2196_v59  ;;  %v2177_v59 = vld [vmem:[#allocation4 + $0x38] sm:$0xff] }
 0x1dc   : > { %v5366_v17 = vpop.f32.mrf.mxu0  ;;  %2385 = vmatpush.msra.mxu2 %v2195_v16  ;;  %v2192_v16 = vld [vmem:[#allocation4 + $0xb0] sm:$0xff] }
 0x1df   : > { %1413 = vmatmul.f32.gmra.mxu0 %v861_v8  ;;  %v5397_v32 = vpop.f32.mrf.mxu3 }
 0x1e0   : > { %1644 = vmatmul.f32.gmra.mxu3 %v878_v41  ;;  %6781 = vst [vmem:[#allocation63_spill] sm:$0xff] %v5397_v32 }
 0x1e4   : > { %v5371_v31 = vpop.f32.mrf.mxu0 }
 0x1e7   : > { %1664 = vmatmul.f32.vlgmr.msrb.gmra.mxu0 %v5001_v34  ;;  %v2179_v34 = vld [vmem:[#allocation4 + $0x48] sm:$0xff] }
 0x1e8   : > { %2320 = vmatpush.msra.mxu1 %v2179_v34 }
 0x1ea   : > { %2321 = vmatpush.msra.mxu1 %v2178_v1  ;;  %v5406_v1 = vpop.f32.mrf.mxu3 }
 0x1eb   : > { %6784 = vst [vmem:[#allocation66_spill] sm:$0xff] %v5406_v1  ;;  %v2217_v1 = vld [vmem:[#allocation4 + $0x178] sm:$0xff] }
 0x1ec   : > { %v5374_v62 = vpop.f32.mrf.mxu0  ;;  %2322 = vmatpush.msra.mxu1 %v2177_v59  ;;  %v2191_v59 = vld [vmem:[#allocation4 + $0xa8] sm:$0xff]  ;;  %2444 = vmatpush.msrb.mxu3 %v2217_v1 }
 0x1ef   : > { %1667 = vmatmul.f32.gmra.mxu0 %v5024_v57  ;;  %v2194_v57 = vld [vmem:[#allocation4 + $0xc0] sm:$0xff] }
 0x1f0   : > { %2386 = vmatpush.msra.mxu2 %v2194_v57 }
 0x1f2   : > { %2387 = vmatpush.msra.mxu2 %v2193_v48 }
 0x1f4   : > { %v5377_v8 = vpop.f32.mrf.mxu0  ;;  %2388 = vmatpush.msra.mxu2 %v2192_v16  ;;  %v2175_v16 = vld [vmem:[#allocation4 + $0x28] sm:$0xff] }
 0x1f6   : > { %2389 = vmatpush.msra.mxu2 %v2191_v59  ;;  %v2174_v59 = vld [vmem:[#allocation4 + $0x20] sm:$0xff] }
 0x1f7   : > { %1670 = vmatmul.f32.gmra.mxu0 %v5055_v63  ;;  %v5390_v63 = vpop.f32.mrf.mxu1 }
 0x1fc   : > { %v5380_v6 = vpop.f32.mrf.mxu0 }
 0x1ff   : > { %1673 = vmatmul.f32.gmra.mxu0 %v6720_v0  ;;  %v5393_v0 = vpop.f32.mrf.mxu2 }
 0x200   : > { %6779 = vst [vmem:[#allocation61_spill] sm:$0xff] %v5393_v0  ;;  %v5416_v0 = vpop.f32.mrf.mxu3 }
 0x201   : > { %6788 = vst [vmem:[#allocation70_spill] sm:$0xff] %v5416_v0  ;;  %v2216_v0 = vld [vmem:[#allocation4 + $0x170] sm:$0xff] }
 0x202   : > { %2445 = vmatpush.msrb.mxu3 %v2216_v0 }
 0x204   : > { %v5385_v41 = vpop.f32.mrf.mxu0 }
 0x207   : > { %1676 = vmatmul.f32.gmra.mxu0 %v6723_v27  ;;  %v5400_v27 = vpop.f32.mrf.mxu1  ;;  %v5404_v57 = vpop.f32.mrf.mxu2 }
 0x208   : > { %6783 = vst [vmem:[#allocation65_spill] sm:$0xff] %v5404_v57 }
 0x20c   : > { %v5388_v9 = vpop.f32.mrf.mxu0 }
 0x20f   : > { %1679 = vmatmul.f32.gmra.mxu0 %v4553_v39  ;;  %v2176_v39 = vld [vmem:[#allocation4 + $0x30] sm:$0xff]  ;;  %v5409_v48 = vpop.f32.mrf.mxu1 }
 0x210   : > { %2323 = vmatpush.msra.mxu1 %v2176_v39  ;;  %6785 = vst [vmem:[#allocation67_spill] sm:$0xff] %v5409_v48 }
 0x212   : > { %2324 = vmatpush.msra.mxu1 %v2175_v16 }
 0x214   : > { %v5395_v12 = vpop.f32.mrf.mxu0  ;;  %2325 = vmatpush.msra.mxu1 %v2174_v59 }
 0x215   : > { %6780 = vst [vmem:[#allocation62_spill] sm:$0xff] %v5395_v12  ;;  %v2208_v12 = vld [vmem:[#allocation4 + $0x130] sm:$0xff] }
 0x217   : > { %1682 = vmatmul.f32.gmra.mxu0 %v4578_v38  ;;  %v5413_v38 = vpop.f32.mrf.mxu2  ;;  %v5418_v57 = vpop.f32.mrf.mxu1 }
 0x218   : > { %6787 = vst [vmem:[#allocation69_spill] sm:$0xff] %v5413_v38  ;;  %v5425_v38 = vpop.f32.mrf.mxu3 }
 0x219   : > { %6791 = vst [vmem:[#allocation73_spill] sm:$0xff] %v5425_v38  ;;  %v2215_v38 = vld [vmem:[#allocation4 + $0x168] sm:$0xff] }
 0x21a   : > { %2446 = vmatpush.msrb.mxu3 %v2215_v38  ;;  %v2211_v38 = vld [vmem:[#allocation4 + $0x148] sm:$0xff] }
 0x21c   : > { %v5402_v34 = vpop.f32.mrf.mxu0 }
 0x21d   : > { %6782 = vst [vmem:[#allocation64_spill] sm:$0xff] %v5402_v34  ;;  %v1127_v34 = vadd.f32 %v5146_v18, %v6796_v21  ;;  %v2281_v21 = vld [vmem:[#allocation4 + $0x378] sm:$0xff] }
 0x21e   : > { %2704 = vmatpush.msra.mxu0 %v2281_v21 }
 0x21f   : > { %1685 = vmatmul.f32.gmra.mxu0 %v4604_v5  ;;  %v2190_v5 = vld [vmem:[#allocation4 + $0xa0] sm:$0xff]  ;;  %v5423_v28 = vpop.f32.mrf.mxu2 }
 0x220   : > { %2390 = vmatpush.msra.mxu2 %v2190_v5  ;;  %6790 = vst [vmem:[#allocation72_spill] sm:$0xff] %v5423_v28  ;;  %v5436_v28 = vpop.f32.mrf.mxu3 }
 0x222   : > { %2391 = vmatpush.msra.mxu2 %v2189_v49  ;;  %v2214_v49 = vld [vmem:[#allocation4 + $0x160] sm:$0xff] }
 0x223   : > { %2447 = vmatpush.msrb.mxu3 %v2214_v49  ;;  %v2209_v49 = vld [vmem:[#allocation4 + $0x138] sm:$0xff] }
 0x224   : > { %v5411_v32 = vpop.f32.mrf.mxu0 }
 0x225   : > { %6786 = vst [vmem:[#allocation68_spill] sm:$0xff] %v5411_v32  ;;  %v2172_v32 = vld [vmem:[#allocation4 + $0x10] sm:$0xff] }
 0x227   : > { %1688 = vmatmul.f32.gmra.mxu0 %v4623_v37  ;;  %v5427_v37 = vpop.f32.mrf.mxu1  ;;  %v5432_v1 = vpop.f32.mrf.mxu2 }
 0x22c   : > { %v5420_v39 = vpop.f32.mrf.mxu0 }
 0x22d   : > { %6789 = vst [vmem:[#allocation71_spill] sm:$0xff] %v5420_v39  ;;  %v5445_v39 = vpop.f32.mrf.mxu3 }
 0x22f   : > { %1691 = vmatmul.f32.gmra.mxu0 %v4638_v58  ;;  %v2173_v58 = vld [vmem:[#allocation4 + $0x18] sm:$0xff]  ;;  %v5438_v59 = vpop.f32.mrf.mxu1  ;;  %v5441_v0 = vpop.f32.mrf.mxu2 }
 0x230   : > { %2326 = vmatpush.msra.mxu1 %v2173_v58  ;;  %v2213_v58 = vld [vmem:[#allocation4 + $0x158] sm:$0xff] }
 0x231   : > { %2448 = vmatpush.msrb.mxu3 %v2213_v58  ;;  %v1204_v58 = vadd.f32 %v5188_v54, %v1127_v34  ;;  %v6798_v54 = vld [vmem:[#allocation50_spill] sm:$0xff] }
 0x232   : > { %2327 = vmatpush.msra.mxu1 %v2172_v32  ;;  %v1130_v34 = vadd.f32 %v5165_v4, %v6798_v54  ;;  %v2277_v54 = vld [vmem:[#allocation4 + $0x358] sm:$0xff] }
 0x233   : > { %2449 = vmatpush.msrb.mxu3 %v2212_v14  ;;  %v1281_v32 = vadd.f32 %v5077_v43, %v1204_v58  ;;  %v2204_v43 = vld [vmem:[#allocation4 + $0x110] sm:$0xff]  ;;  %v2278_v58 = vld [vmem:[#allocation4 + $0x360] sm:$0xff] }
 0x234   : > { %v5429_v16 = vpop.f32.mrf.mxu0 }
 0x235   : > { %6792 = vst [vmem:[#allocation74_spill] sm:$0xff] %v5429_v16  ;;  %v2188_v16 = vld [vmem:[#allocation4 + $0x90] sm:$0xff]  ;;  %2450 = vmatpush.msrb.mxu3 %v2211_v38  ;;  %v5458_v14 = vpop.f32.mrf.mxu3  ;;  %v2170_v38 = vld [vmem:[#allocation4] sm:$0xff] }
 0x236   : > { %2392 = vmatpush.msra.mxu2 %v2188_v16 }
 0x237   : > { %1694 = vmatmul.f32.gmra.mxu0 %v4654_v7  ;;  %v5452_v16 = vpop.f32.mrf.mxu2 }
 0x23c   : > { %v5434_v5 = vpop.f32.mrf.mxu0 }
 0x23d   : > { %6793 = vst [vmem:[#allocation75_spill] sm:$0xff] %v5434_v5  ;;  %v5448_v5 = vpop.f32.mrf.mxu1 }
 0x23f   : > { %1697 = vmatmul.f32.gmra.mxu0 %v4671_v42 }
 0x244   : > { %v5443_v7 = vpop.f32.mrf.mxu0 }
 0x245   : > { %6794 = vst [vmem:[#allocation76_spill] sm:$0xff] %v5443_v7  ;;  %v2210_v7 = vld [vmem:[#allocation4 + $0x140] sm:$0xff]  ;;  %v5460_v48 = vpop.f32.mrf.mxu1 }
 0x246   : > { %2451 = vmatpush.msrb.mxu3 %v2210_v7  ;;  %v2206_v7 = vld [vmem:[#allocation4 + $0x120] sm:$0xff] }
 0x247   : > { %1700 = vmatmul.f32.gmra.mxu0 %v6744_v10  ;;  %v2171_v10 = vld [vmem:[#allocation4 + $0x8] sm:$0xff] }
 0x248   : > { %2328 = vmatpush.msra.mxu1 %v2171_v10  ;;  %2452 = vmatpush.msrb.mxu3 %v2209_v49  ;;  %v2280_v10 = vld [vmem:[#allocation4 + $0x370] sm:$0xff]  ;;  %v5468_v49 = vpop.f32.mrf.mxu2 }
 0x249   : > { %2705 = vmatpush.msra.mxu0 %v2280_v10  ;;  %v2276_v10 = vld [vmem:[#allocation4 + $0x350] sm:$0xff] }
 0x24a   : > { %2329 = vmatpush.msra.mxu1 %v2170_v38  ;;  %2453 = vmatpush.msrb.mxu3 %v2208_v12  ;;  %v1207_v38 = vadd.f32 %v5205_v35, %v1130_v34  ;;  %v2205_v12 = vld [vmem:[#allocation4 + $0x118] sm:$0xff]  ;;  %v2186_v35 = vld [vmem:[#allocation4 + $0x80] sm:$0xff] }
 0x24c   : > { %v5450_v42 = vpop.f32.mrf.mxu0 }
 0x24d   : > { %6795 = vst [vmem:[#allocation77_spill] sm:$0xff] %v5450_v42  ;;  %v2187_v42 = vld [vmem:[#allocation4 + $0x88] sm:$0xff]  ;;  %v5476_v21 = vpop.f32.mrf.mxu1 }
 0x24e   : > { %2393 = vmatpush.msra.mxu2 %v2187_v42  ;;  %v1358_v42 = vadd.f32 %v5329_v25, %v1281_v32  ;;  %v1284_v25 = vadd.f32 %v5093_v60, %v1207_v38 }
 0x24f   : > { %1703 = vmatmul.f32.gmra.mxu0 %v6749_v45  ;;  %v2207_v45 = vld [vmem:[#allocation4 + $0x128] sm:$0xff] }
 0x250   : > { %2454 = vmatpush.msrb.mxu3 %v2207_v45  ;;  %v1435_v4 = vadd.f32 %v5418_v57, %v1358_v42  ;;  %v5473_v45 = vpop.f32.mrf.mxu3  ;;  %v1361_v34 = vadd.f32 %v5340_v24, %v1284_v25  ;;  %2394 = vmatpush.msra.mxu2 %v2186_v35  ;;  %v5486_v38 = vpop.f32.mrf.mxu2 }
 0x252   : > { %2455 = vmatpush.msrb.mxu3 %v2206_v7  ;;  %v6800_v7 = vld [vmem:[#allocation25_spill] sm:$0xff]  ;;  %v1512_v60 = vadd.f32 %v5432_v1, %v1435_v4  ;;  %v1438_v24 = vadd.f32 %v5427_v37, %v1361_v34  ;;  %v2233_v37 = vld [vmem:[#allocation4 + $0x1f8] sm:$0xff] }
 0x253   : > { %v1133_v57 = vadd.f32 %v5183_v53, %v6800_v7  ;;  %v2274_v53 = vld [vmem:[#allocation4 + $0x340] sm:$0xff]  ;;  %v2273_v34 = vld [vmem:[#allocation4 + $0x338] sm:$0xff]  ;;  %2509 = vmatpush.msrb.mxu1 %v2233_v37  ;;  %v6808_v37 = vld [vmem:[#allocation33_spill] sm:$0xff] }
 0x254   : > { %v5462_v18 = vpop.f32.mrf.mxu0  ;;  %2456 = vmatpush.msrb.mxu3 %v2205_v12  ;;  %v2275_v12 = vld [vmem:[#allocation4 + $0x348] sm:$0xff]  ;;  %v1515_v7 = vadd.f32 %v5441_v0, %v1438_v24 }
 0x255   : > { %6797 = vst [vmem:[#allocation48_spill] sm:$0xff] %v5462_v18  ;;  %v2279_v18 = vld [vmem:[#allocation4 + $0x368] sm:$0xff]  ;;  %v1210_v42 = vadd.f32 %v5220_v50, %v1133_v57  ;;  %v5503_v57 = vpop.f32.mrf.mxu1 }
 0x256   : > { %2706 = vmatpush.msra.mxu0 %v2279_v18  ;;  %2457 = vmatpush.msrb.mxu3 %v2204_v43  ;;  %v2202_v18 = vld [vmem:[#allocation4 + $0x100] sm:$0xff]  ;;  %v1589_v43 = vadd.f32 %v5436_v28, %v1512_v60  ;;  %v2271_v24 = vld [vmem:[#allocation4 + $0x328] sm:$0xff] }
 0x257   : > { %1706 = vmatmul.f32.gmra.mxu0 %v6753_v3  ;;  %v2203_v3 = vld [vmem:[#allocation4 + $0x108] sm:$0xff] }
 0x258   : > { %2707 = vmatpush.msra.mxu0 %v2278_v58  ;;  %2458 = vmatpush.msrb.mxu3 %v2203_v3  ;;  %v6801_v58 = vld [vmem:[#allocation12_spill] sm:$0xff]  ;;  %v5495_v4 = vpop.f32.mrf.mxu3  ;;  %v6802_v3 = vld [vmem:[#allocation13_spill] sm:$0xff] }
 0x259   : > { %v5491_v25 = vperm.slane %v6801_v58, 0  ;;  %v5498_v35 = vperm.slane %v6802_v3, 0 }
 0x25a   : > { %2708 = vmatpush.msra.mxu0 %v2277_v54  ;;  %2459 = vmatpush.msrb.mxu3 %v2202_v18  ;;  %v2249_v54 = vld [vmem:[#allocation4 + $0x278] sm:$0xff]  ;;  %v6803_v18 = vld [vmem:[#allocation32_spill] sm:$0xff] }
 0x25b   : > { %v1136_v28 = vadd.f32 %v5203_v13, %v6803_v18  ;;  %2574 = vmatpush.msrb.mxu2 %v2249_v54 }
 0x25c   : > { %v5478_v32 = vpop.f32.mrf.mxu0  ;;  %2709 = vmatpush.msra.mxu0 %v2276_v10  ;;  %v6804_v10 = vld [vmem:[#allocation14_spill] sm:$0xff] }
 0x25d   : > { %6799 = vst [vmem:[#allocation50_spill] sm:$0xff] %v5478_v32  ;;  %v1213_v13 = vadd.f32 %v5237_v47, %v1136_v28 }
 0x25e   : > { %2710 = vmatpush.msra.mxu0 %v2275_v12  ;;  %v5510_v12 = vstv %s3146_s14 }
 0x25f   : > { %1709 = vmatmul.f32.gmra.mxu0 %v6755_v26  ;;  %v1287_v26 = vadd.f32 %v5108_v23, %v1210_v42  ;;  %v5508_v42 = vperm.slane %v6804_v10, 0  ;;  %6805 = vst [vmem:[#allocation25_spill] sm:$0xff] %v5510_v12  ;;  %vm1859_vm15 = vcmp.ge.s32.totalorder %v5510_v12, 0  ;;  %vm1869_vm8 = vcmp.lt.s32.totalorder %v5510_v12, 16 }
 0x260   : > { %2711 = vmatpush.msra.mxu0 %v2274_v53  ;;  %v5519_v53 = vpop.f32.mrf.mxu2  ;;  %v1290_v47 = vadd.f32 %v5123_v15, %v1213_v13  ;;  %vm5523_vm1 = vmand %vm1859_vm15, %vm1869_vm8  ;;  %v5531_v15 = vpop.f32.mrf.mxu3 }
 0x261   : > { %v1364_v23 = vadd.f32 %v5358_v61, %v1287_v26  ;;  %v1592_v61 = vadd.f32 %v5445_v39, %v1515_v7  ;;  %v2269_v39 = vld [vmem:[#allocation4 + $0x318] sm:$0xff]  ;;  %vm6821_vm15 = vmmov %vm6817_vm14 }
 0x262   : > { %2712 = vmatpush.msra.mxu0 %v2273_v34  ;;  %v1139_v34 = vadd.f32 %v5222_v30, %v6808_v37  ;;  %v882_v30 = vrot.slane %v5349_v55, 2  ;;  %v6811_v55 = vld [vmem:[#allocation17_spill] sm:$0xff]  ;;  %vm6822_vm8 = vmmov %vm6813_vm7 }
 0x263   : > { %v1441_v58 = vadd.f32 %v5438_v59, %v1364_v23  ;;  %v1367_v59 = vadd.f32 %v5366_v17, %v1290_v47  ;;  %v881_v23 = vrot.slane %v5345_v51, 2  ;;  %v2248_v51 = vld [vmem:[#allocation4 + $0x270] sm:$0xff] }
 0x264   : > { %v1665_v1 = vpop.f32.mrf.mxu0  ;;  %2575 = vmatpush.msrb.mxu2 %v2248_v51 }
 0x265   : > { %v1666_v50 = vadd.f32 %v1665_v1, %v1589_v43  ;;  %v2272_v43 = vld [vmem:[#allocation4 + $0x330] sm:$0xff]  ;;  %v2270_v1 = vld [vmem:[#allocation4 + $0x320] sm:$0xff]  ;;  %v1518_v18 = vadd.f32 %v5452_v16, %v1441_v58  ;;  %v883_v47 = vsel %vm6812_vm9, %v881_v23, %v882_v30 }
 0x266   : > { %2713 = vmatpush.msra.mxu0 %v2272_v43  ;;  %v2268_v16 = vld [vmem:[#allocation4 + $0x310] sm:$0xff]  ;;  %v1216_v43 = vadd.f32 %v5250_v2, %v1139_v34  ;;  %v1142_v2 = vadd.f32 %v5241_v19, %v6811_v55  ;;  %v1850_v19 = vadd.s32 1, %v5510_v12 }
 0x267   : > { %v1726_v60 = vadd.f32 %v5491_v25, %v1666_v50  ;;  %1712 = vmatmul.f32.gmra.mxu0 %v5308_v20  ;;  %v1595_v58 = vadd.f32 %v5458_v14, %v1518_v18  ;;  %v2247_v14 = vld [vmem:[#allocation4 + $0x268] sm:$0xff] }
 0x268   : > { %2714 = vmatpush.msra.mxu0 %v2271_v24  ;;  %v1444_v24 = vadd.f32 %v5448_v5, %v1367_v59  ;;  %v5557_v5 = vpop.f32.mrf.mxu2  ;;  %v2231_v59 = vld [vmem:[#allocation4 + $0x1e8] sm:$0xff]  ;;  %v1219_v37 = vadd.f32 %v5269_v46, %v1142_v2  ;;  %2576 = vmatpush.msrb.mxu2 %v2247_v14  ;;  %vm1860_vm5 = vcmp.ge.s32.totalorder %v1850_v19, 0  ;;  %vm1870_vm2 = vcmp.lt.s32.totalorder %v1850_v19, 16 }
 0x269   : > { %v1747_v0 = vmul.f32 %v5498_v35, %v1726_v60  ;;  %v5536_v60 = vpop.f32.mrf.mxu1  ;;  %vm5580_vm6 = vmand %vm1860_vm5, %vm1870_vm2 }
 0x26a   : > { %2715 = vmatpush.msra.mxu0 %v2270_v1  ;;  %v1521_v34 = vadd.f32 %v5468_v49, %v1444_v24  ;;  %vm6828_vm5 = vmmov %vm6817_vm14 }
 0x26b   : > { %v1768_v20 = vadd.f32 %v5508_v42, %v1747_v0  ;;  %v2232_v0 = vld [vmem:[#allocation4 + $0x1f0] sm:$0xff]  ;;  %vm6829_vm2 = vmmov %vm6813_vm7 }
 0x26c   : > { %v1668_v26 = vpop.f32.mrf.mxu0  ;;  %2716 = vmatpush.msra.mxu0 %v2269_v39  ;;  %2510 = vmatpush.msrb.mxu1 %v2232_v0  ;;  %v2266_v39 = vld [vmem:[#allocation4 + $0x300] sm:$0xff] }
 0x26d   : > { %vm1788_vm13 = vcmp.ge.f32.partialorder %v1768_v20, 0.0  ;;  %v1808_v50 = vmul.f32 0.1, %v1768_v20  ;;  %v1669_v54 = vadd.f32 %v1668_v26, %v1592_v61  ;;  %v2267_v61 = vld [vmem:[#allocation4 + $0x308] sm:$0xff]  ;;  %v1293_v26 = vadd.f32 %v5139_v40, %v1216_v43 }
 0x26e   : > { %2717 = vmatpush.msra.mxu0 %v2268_v16  ;;  %2511 = vmatpush.msrb.mxu1 %v2231_v59  ;;  %v1598_v43 = vadd.f32 %v5473_v45, %v1521_v34  ;;  %v2246_v59 = vld [vmem:[#allocation4 + $0x260] sm:$0xff] }
 0x26f   : > { %v1828_v28 = vsel %vm1788_vm13, %v1768_v20, %v1808_v50  ;;  %v1727_v7 = vadd.f32 %v5491_v25, %v1669_v54  ;;  %1715 = vmatmul.f32.gmra.mxu0 %v5327_v11  ;;  %v1370_v18 = vadd.f32 %v5371_v31, %v1293_v26  ;;  %v1296_v31 = vadd.f32 %v5159_v44, %v1219_v37  ;;  %v2230_v37 = vld [vmem:[#allocation4 + $0x1e0] sm:$0xff] }
 0x270   : > { %v1889_v17 = vsel %vm5523_vm1, %v1828_v28, 0.0  ;;  %2718 = vmatpush.msra.mxu0 %v2267_v61  ;;  %2577 = vmatpush.msrb.mxu2 %v2246_v59 }
 0x271   : > { %v1930_v13 = vrot.slane %v1889_v17, 7  ;;  %v1748_v11 = vmul.f32 %v5498_v35, %v1727_v7  ;;  %v884_v7 = vrot.slane %v5363_v52, 2  ;;  %v5567_v17 = vpop.f32.mrf.mxu3  ;;  %v1447_v52 = vadd.f32 %v5460_v48, %v1370_v18  ;;  %v6816_v48 = vld [vmem:[#allocation19_spill] sm:$0xff]  ;;  %2512 = vmatpush.msrb.mxu1 %v2230_v37 }
 0x272   : > { %2719 = vmatpush.msra.mxu0 %v2266_v39 }
 0x273   : > { %v1769_v20 = vadd.f32 %v5508_v42, %v1748_v11  ;;  %3148 = vmatmul.msk.f32.vlgmr.msra.gmra.mxu1 %vm5541_vm0, %v1930_v13  ;;  %v1990_v16 = vsel %vm1929_vm10, 0.0, %v1930_v13  ;;  %v5573_v11 = vpop.f32.mrf.mxu1  ;;  %v885_v0 = vsel %vm6813_vm7, %v882_v30, %v884_v7  ;;  %v1524_v26 = vadd.f32 %v5486_v38, %v1447_v52 }
 0x274   : > { %v1671_v1 = vpop.f32.mrf.mxu0  ;;  %v2082_v45 = vrot.slane %v1990_v16, 2 }
 0x275   : > { %v1672_v50 = vadd.f32 %v1671_v1, %v1595_v58  ;;  %vm1789_vm12 = vcmp.ge.f32.partialorder %v1769_v20, 0.0  ;;  %v1809_v54 = vmul.f32 0.1, %v1769_v20  ;;  %v1145_v1 = vadd.f32 %v5263_v22, %v6816_v48 }
 0x277   : > { %v1728_v40 = vadd.f32 %v5491_v25, %v1672_v50  ;;  %1718 = vmatmul.f32.gmra.mxu0 %v883_v47  ;;  %v1829_v28 = vsel %vm1789_vm12, %v1769_v20, %v1809_v54  ;;  %v2026_v20 = vrot.slane %v1990_v16, 1  ;;  %v5590_v50 = vpop.f32.mrf.mxu2 }
 0x278   : > { %v1890_v23 = vsel %vm5523_vm1, %v1829_v28, 0.0 }
 0x279   : > { %v1749_v46 = vmul.f32 %v5498_v35, %v1728_v40  ;;  %v1931_v49 = vrot.slane %v1890_v23, 7  ;;  %v1601_v40 = vadd.f32 %v5495_v4, %v1524_v26  ;;  %v5602_v28 = vpop.f32.mrf.mxu3  ;;  %v2245_v4 = vld [vmem:[#allocation4 + $0x258] sm:$0xff] }
 0x27a   : > { %2578 = vmatpush.msrb.mxu2 %v2245_v4 }
 0x27b   : > { %v1770_v3 = vadd.f32 %v5508_v42, %v1749_v46  ;;  %v1932_v51 = vsel %vm1929_vm10, %v1930_v13, %v1931_v49  ;;  %v1373_v13 = vadd.f32 %v5374_v62, %v1296_v31  ;;  %v2000_v39 = vsel %vm1929_vm10, %v1931_v49, 0.0  ;;  %v6819_v46 = vld [vmem:[#allocation23_spill] sm:$0xff]  ;;  %v5607_v16 = vpop.f32.mrf.mxu1 }
 0x27c   : > { %v1674_v24 = vpop.f32.mrf.mxu0  ;;  %v2027_v61 = vrot.slane %v1932_v51, 1  ;;  %v2083_v58 = vrot.slane %v1932_v51, 2  ;;  %2333 = vmatmul.f32.gmra.mxu1 %v1932_v51  ;;  %v1222_v62 = vadd.f32 %v5312_v36, %v1145_v1  ;;  %v2029_v18 = vrot.slane %v2000_v39, 1 }
 0x27d   : > { %v1810_v55 = vmul.f32 0.1, %v1770_v3  ;;  %v1675_v44 = vadd.f32 %v1674_v24, %v1598_v43  ;;  %vm1790_vm3 = vcmp.ge.f32.partialorder %v1770_v3, 0.0  ;;  %v1450_v19 = vadd.f32 %v5476_v21, %v1373_v13  ;;  %v6820_v43 = vld [vmem:[#allocation57_spill] sm:$0xff] }
 0x27e   : > { %v2028_v30 = vsel %vm6817_vm14, %v2026_v20, %v2027_v61  ;;  %v2084_v47 = vsel %vm6818_vm11, %v2082_v45, %v2083_v58  ;;  %v2085_v23 = vrot.slane %v2000_v39, 2  ;;  %v1148_v49 = vadd.f32 %v5310_v56, %v6819_v46 }
 0x27f   : > { %v1729_v54 = vadd.f32 %v5491_v25, %v1675_v44  ;;  %1721 = vmatmul.f32.gmra.mxu0 %v885_v0  ;;  %2395 = vmatmul.f32.vlgmr.msra.gmra.mxu2 %v2028_v30  ;;  %v1830_v14 = vsel %vm1790_vm3, %v1770_v3, %v1810_v55  ;;  %v1299_v21 = vadd.f32 %v6820_v43, %v1222_v62  ;;  %v2229_v3 = vld [vmem:[#allocation4 + $0x1d8] sm:$0xff]  ;;  %v1851_v0 = vadd.s32 2, %v5510_v12  ;;  %v5622_v1 = vpop.f32.mrf.mxu2  ;;  %vm6833_vm3 = vmmov %vm6828_vm5 }
 0x280   : > { %2460 = vmatmul.f32.vlgmr.msrb.gmra.mxu3 %v2084_v47  ;;  %v1891_v22 = vsel %vm5580_vm6, %v1830_v14, 0.0  ;;  %v1527_v51 = vadd.f32 %v5519_v53, %v1450_v19  ;;  %v2030_v56 = vsel %vm6821_vm15, %v2027_v61, %v2029_v18  ;;  %2513 = vmatpush.msrb.mxu1 %v2229_v3  ;;  %v2086_v45 = vsel %vm6822_vm8, %v2083_v58, %v2085_v23  ;;  %v6823_v44 = vld [vmem:[#allocation43_spill] sm:$0xff]  ;;  %v6827_v19 = vld [vmem:[#allocation29_spill] sm:$0xff]  ;;  %vm6840_vm8 = vmmov %vm6833_vm3 }
 0x281   : > { %v1750_v38 = vmul.f32 %v5498_v35, %v1729_v54  ;;  %v5598_v34 = vrot.slane %v1891_v22, 7  ;;  %v1376_v24 = vadd.f32 %v5377_v8, %v1299_v21  ;;  %v1225_v48 = vadd.f32 %v6823_v44, %v1148_v49  ;;  %v6824_v30 = vld [vmem:[#allocation59_spill] sm:$0xff]  ;;  %v5638_v62 = vpop.f32.mrf.mxu3 }
 0x282   : > { %vm1861_vm13 = vcmp.ge.s32.totalorder %v1851_v0, 0  ;;  %vm1871_vm1 = vcmp.lt.s32.totalorder %v1851_v0, 16  ;;  %v1604_v58 = vadd.f32 %v5531_v15, %v1527_v51  ;;  %v1151_v18 = vadd.f32 %v5332_v33, %v6827_v19  ;;  %v2244_v33 = vld [vmem:[#allocation4 + $0x250] sm:$0xff]  ;;  %v6830_v51 = vld [vmem:[#allocation53_spill] sm:$0xff] }
 0x283   : > { %v1771_v7 = vadd.f32 %v5508_v42, %v1750_v38  ;;  %v1991_v8 = vsel %vm1929_vm10, 0.0, %v5598_v34  ;;  %v1302_v47 = vadd.f32 %v6824_v30, %v1225_v48  ;;  %v1453_v26 = vadd.f32 %v5503_v57, %v1376_v24  ;;  %vm5641_vm12 = vmand %vm1861_vm13, %vm1871_vm1  ;;  %2579 = vmatpush.msrb.mxu2 %v2244_v33 }
 0x284   : > { %v1677_v36 = vpop.f32.mrf.mxu0  ;;  %3150 = vmatmul.msk.f32.gmra.mxu1 %vm5541_vm0, %v5598_v34  ;;  %v2031_v39 = vrot.slane %v1991_v8, 1  ;;  %v2087_v37 = vrot.slane %v1991_v8, 2  ;;  %v1228_v0 = vadd.f32 %v6830_v51, %v1151_v18  ;;  %v2227_v8 = vld [vmem:[#allocation4 + $0x1c8] sm:$0xff]  ;;  %v6836_v18 = vld [vmem:[#allocation28_spill] sm:$0xff]  ;;  %vm6841_vm13 = vmmov %vm6829_vm2 }
 0x285   : > { %v1811_v31 = vmul.f32 0.1, %v1771_v7  ;;  %v1678_v52 = vadd.f32 %v1677_v36, %v1601_v40  ;;  %vm1791_vm4 = vcmp.ge.f32.partialorder %v1771_v7, 0.0  ;;  %v1379_v40 = vadd.f32 %v5380_v6, %v1302_v47 }
 0x286   : > { %v1530_v49 = vadd.f32 %v5557_v5, %v1453_v26 }
 0x287   : > { %v1730_v20 = vadd.f32 %v5491_v25, %v1678_v52  ;;  %2398 = vmatmul.f32.gmra.mxu2 %v2030_v56  ;;  %v1831_v55 = vsel %vm1791_vm4, %v1771_v7, %v1811_v31  ;;  %v5648_v7 = vpop.f32.mrf.mxu1  ;;  %v2228_v31 = vld [vmem:[#allocation4 + $0x1d0] sm:$0xff]  ;;  %v1456_v5 = vadd.f32 %v5536_v60, %v1379_v40  ;;  %v5669_v24 = vpop.f32.mrf.mxu2 }
 0x288   : > { %2463 = vmatmul.f32.gmra.mxu3 %v2086_v45  ;;  %v1892_v53 = vsel %vm5580_vm6, %v1831_v55, 0.0  ;;  %2514 = vmatpush.msrb.mxu1 %v2228_v31  ;;  %v1607_v56 = vadd.f32 %v5567_v17, %v1530_v49  ;;  %v6831_v55 = vld [vmem:[#allocation15_spill] sm:$0xff]  ;;  %v6832_v60 = vld [vmem:[#allocation22_spill] sm:$0xff]  ;;  %vm6834_vm6 = vmmov %vm6829_vm2 }
 0x289   : > { %v1751_v61 = vmul.f32 %v5498_v35, %v1730_v20  ;;  %v1934_v13 = vrot.slane %v1892_v53, 7  ;;  %v1154_v44 = vadd.f32 %v5383_v29, %v6831_v55  ;;  %v1305_v53 = vadd.f32 %v6832_v60, %v1228_v0  ;;  %v5687_v26 = vpop.f32.mrf.mxu3  ;;  %v2226_v60 = vld [vmem:[#allocation4 + $0x1c0] sm:$0xff] }
 0x28a   : > { %v1533_v30 = vadd.f32 %v5590_v50, %v1456_v5  ;;  %2515 = vmatpush.msrb.mxu1 %v2227_v8  ;;  %v6835_v50 = vld [vmem:[#allocation56_spill] sm:$0xff] }
 0x28b   : > { %v1772_v54 = vadd.f32 %v5508_v42, %v1751_v61  ;;  %v5633_v2 = vsel %vm1929_vm10, %v5598_v34, %v1934_v13  ;;  %v2001_v21 = vsel %vm1929_vm10, %v1934_v13, 0.0  ;;  %v2243_v13 = vld [vmem:[#allocation4 + $0x248] sm:$0xff]  ;;  %v1382_v29 = vadd.f32 %v5385_v41, %v1305_v53 }
 0x28c   : > { %v1680_v14 = vpop.f32.mrf.mxu0  ;;  %2339 = vmatmul.f32.gmra.mxu1 %v5633_v2  ;;  %v2032_v59 = vrot.slane %v5633_v2, 1  ;;  %v2088_v22 = vrot.slane %v5633_v2, 2  ;;  %v2034_v3 = vrot.slane %v2001_v21, 1  ;;  %v2090_v45 = vrot.slane %v2001_v21, 2  ;;  %2580 = vmatpush.msrb.mxu2 %v2243_v13 }
 0x28d   : > { %vm1792_vm9 = vcmp.ge.f32.partialorder %v1772_v54, 0.0  ;;  %v1812_v15 = vmul.f32 0.1, %v1772_v54  ;;  %v1681_v38 = vadd.f32 %v1680_v14, %v1604_v58  ;;  %v1852_v58 = vadd.s32 3, %v5510_v12  ;;  %2516 = vmatpush.msrb.mxu1 %v2226_v60 }
 0x28e   : > { %v5651_v23 = vsel %vm6828_vm5, %v2031_v39, %v2032_v59  ;;  %v5654_v46 = vsel %vm6829_vm2, %v2087_v37, %v2088_v22  ;;  %v5683_v47 = vsel %vm6833_vm3, %v2032_v59, %v2034_v3  ;;  %v5692_v14 = vsel %vm6834_vm6, %v2088_v22, %v2090_v45  ;;  %v6839_v3 = vld [vmem:[#allocation51_spill] sm:$0xff]  ;;  %vm6855_vm6 = vmmov %vm6840_vm8 }
 0x28f   : > { %v1832_v36 = vsel %vm1792_vm9, %v1772_v54, %v1812_v15  ;;  %v1731_v43 = vadd.f32 %v5491_v25, %v1681_v38  ;;  %2401 = vmatmul.f32.gmra.mxu2 %v5651_v23  ;;  %v1231_v37 = vadd.f32 %v6835_v50, %v1154_v44  ;;  %v5695_v59 = vpop.f32.mrf.mxu1  ;;  %vm1862_vm14 = vcmp.ge.s32.totalorder %v1852_v58, 0  ;;  %v6843_v50 = vld [vmem:[#allocation52_spill] sm:$0xff]  ;;  %vm6845_vm9 = vmmov %vm6833_vm3 }
 0x290   : > { %v1893_v6 = vsel %vm5641_vm12, %v1832_v36, 0.0  ;;  %2466 = vmatmul.f32.gmra.mxu3 %v5654_v46  ;;  %vm1872_vm11 = vcmp.lt.s32.totalorder %v1852_v58, 16  ;;  %v1610_v22 = vadd.f32 %v5602_v28, %v1533_v30  ;;  %v1459_v49 = vadd.f32 %v5573_v11, %v1382_v29  ;;  %v5715_v28 = vpop.f32.mrf.mxu2  ;;  %v6842_v30 = vld [vmem:[#allocation58_spill] sm:$0xff] }
 0x291   : > { %v5663_v52 = vrot.slane %v1893_v6, 7  ;;  %v1752_v4 = vmul.f32 %v5498_v35, %v1731_v43  ;;  %v1308_v40 = vadd.f32 %v6836_v18, %v1231_v37  ;;  %vm5719_vm15 = vmand %vm1862_vm14, %vm1872_vm11  ;;  %v1157_v51 = vadd.f32 %v5390_v63, %v6839_v3  ;;  %v2242_v63 = vld [vmem:[#allocation4 + $0x240] sm:$0xff]  ;;  %v5739_v53 = vpop.f32.mrf.mxu3 }
 0x292   : > { %v1536_v45 = vadd.f32 %v5622_v1, %v1459_v49  ;;  %2581 = vmatpush.msrb.mxu2 %v2242_v63  ;;  %v1160_v37 = vadd.f32 %v5400_v27, %v6843_v50  ;;  %v1853_v27 = vadd.s32 4, %v5510_v12  ;;  %v6854_v50 = vld [vmem:[#allocation64_spill] sm:$0xff] }
 0x293   : > { %v1773_v20 = vadd.f32 %v5508_v42, %v1752_v4  ;;  %3180 = vmatmul.msk.f32.vlgmr.msra.gmra.mxu0 %vm5541_vm0, %v5663_v52  ;;  %v1992_v19 = vsel %vm1929_vm10, 0.0, %v5663_v52  ;;  %v1385_v0 = vadd.f32 %v5388_v9, %v1308_v40  ;;  %v1234_v58 = vadd.f32 %v6842_v30, %v1157_v51  ;;  %v6846_v40 = vld [vmem:[#allocation62_spill] sm:$0xff] }
 0x294   : > { %v1683_v48 = vpop.f32.mrf.mxu0  ;;  %3152 = vmatmul.msk.f32.gmra.mxu1 %vm5541_vm0, %v5663_v52  ;;  %v2036_v21 = vrot.slane %v1992_v19, 1  ;;  %v2092_v31 = vrot.slane %v1992_v19, 2  ;;  %v1613_v29 = vadd.f32 %v5638_v62, %v1536_v45  ;;  %vm1863_vm5 = vcmp.ge.s32.totalorder %v1853_v27, 0 }
 0x295   : > { %vm1793_vm7 = vcmp.ge.f32.partialorder %v1773_v20, 0.0  ;;  %v1813_v17 = vmul.f32 0.1, %v1773_v20  ;;  %v1684_v61 = vadd.f32 %v1683_v48, %v1607_v56  ;;  %v1462_v1 = vadd.f32 %v5607_v16, %v1385_v0  ;;  %v6844_v16 = vld [vmem:[#allocation31_spill] sm:$0xff] }
 0x297   : > { %v1732_v54 = vadd.f32 %v5491_v25, %v1684_v61  ;;  %2404 = vmatmul.f32.gmra.mxu2 %v5683_v47  ;;  %v1833_v39 = vsel %vm1793_vm7, %v1773_v20, %v1813_v17  ;;  %v5745_v13 = vpop.f32.mrf.mxu1  ;;  %v1539_v19 = vadd.f32 %v5669_v24, %v1462_v1  ;;  %v6848_v24 = vld [vmem:[#allocation20_spill] sm:$0xff] }
 0x298   : > { %2469 = vmatmul.f32.gmra.mxu3 %v5692_v14  ;;  %v1894_v15 = vsel %vm5641_vm12, %v1833_v39, 0.0  ;;  %v5765_v49 = vpop.f32.mrf.mxu2  ;;  %vm6847_vm12 = vmmov %vm6829_vm2  ;;  %vm1873_vm2 = vcmp.lt.s32.totalorder %v1853_v27, 16 }
 0x299   : > { %v1753_v41 = vmul.f32 %v5498_v35, %v1732_v54  ;;  %v1937_v38 = vrot.slane %v1894_v15, 7  ;;  %vm5797_vm3 = vmand %vm1863_vm5, %vm1873_vm2 }
 0x29a   : > { %vm6856_vm14 = vmmov %vm6847_vm12 }
 0x29b   : > { %v1774_v36 = vadd.f32 %v5508_v42, %v1753_v41  ;;  %v5709_v57 = vsel %vm1929_vm10, %v5663_v52, %v1937_v38  ;;  %v2002_v48 = vsel %vm1929_vm10, %v1937_v38, 0.0  ;;  %v1311_v41 = vadd.f32 %v6844_v16, %v1234_v58  ;;  %vm6872_vm5 = vmmov %vm6856_vm14 }
 0x29c   : > { %v1686_v43 = vpop.f32.mrf.mxu0  ;;  %2345 = vmatmul.f32.gmra.mxu1 %v5709_v57  ;;  %2723 = vmatmul.f32.gmra.mxu0 %v5709_v57  ;;  %v2037_v33 = vrot.slane %v5709_v57, 1  ;;  %v2093_v6 = vrot.slane %v5709_v57, 2  ;;  %v2039_v8 = vrot.slane %v2002_v48, 1  ;;  %v2095_v39 = vrot.slane %v2002_v48, 2  ;;  %v5782_v48 = vpop.f32.mrf.mxu3 }
 0x29d   : > { %vm1794_vm4 = vcmp.ge.f32.partialorder %v1774_v36, 0.0  ;;  %v1814_v11 = vmul.f32 0.1, %v1774_v36  ;;  %v1687_v4 = vadd.f32 %v1686_v43, %v1610_v22  ;;  %v1388_v22 = vadd.f32 %v6846_v40, %v1311_v41  ;;  %v2240_v40 = vld [vmem:[#allocation4 + $0x230] sm:$0xff] }
 0x29e   : > { %v5727_v56 = vsel %vm6840_vm8, %v2036_v21, %v2037_v33  ;;  %v5730_v20 = vsel %vm6841_vm13, %v2092_v31, %v2093_v6  ;;  %v5761_v18 = vsel %vm6845_vm9, %v2037_v33, %v2039_v8  ;;  %v5770_v43 = vsel %vm6847_vm12, %v2093_v6, %v2095_v39  ;;  %v2241_v31 = vld [vmem:[#allocation4 + $0x238] sm:$0xff] }
 0x29f   : > { %v1834_v55 = vsel %vm1794_vm4, %v1774_v36, %v1814_v11  ;;  %v1733_v44 = vadd.f32 %v5491_v25, %v1687_v4  ;;  %2407 = vmatmul.f32.gmra.mxu2 %v5727_v56  ;;  %v2225_v11 = vld [vmem:[#allocation4 + $0x1b8] sm:$0xff]  ;;  %v1237_v4 = vadd.f32 %v6848_v24, %v1160_v37  ;;  %v5789_v63 = vpop.f32.mrf.mxu1  ;;  %v6857_v24 = vld [vmem:[#allocation45_spill] sm:$0xff]  ;;  %vm6861_vm4 = vmmov %vm6855_vm6 }
 0x2a0   : > { %2472 = vmatmul.f32.gmra.mxu3 %v5730_v20  ;;  %v1895_v9 = vsel %vm5719_vm15, %v1834_v55, 0.0  ;;  %2582 = vmatpush.msrb.mxu2 %v2241_v31  ;;  %v6849_v6 = vld [vmem:[#allocation35_spill] sm:$0xff]  ;;  %v1616_v55 = vadd.f32 %v5687_v26, %v1539_v19 }
 0x2a1   : > { %v1754_v17 = vmul.f32 %v5498_v35, %v1733_v44  ;;  %v5742_v61 = vrot.slane %v1895_v9, 7  ;;  %2517 = vmatpush.msrb.mxu1 %v2225_v11  ;;  %v1314_v45 = vadd.f32 %v6849_v6, %v1237_v4  ;;  %v1465_v44 = vadd.f32 %v5648_v7, %v1388_v22  ;;  %v2224_v22 = vld [vmem:[#allocation4 + $0x1b0] sm:$0xff]  ;;  %v6859_v6 = vld [vmem:[#allocation24_spill] sm:$0xff] }
 0x2a2   : > { %2583 = vmatpush.msrb.mxu2 %v2240_v40 }
 0x2a3   : > { %v1775_v54 = vadd.f32 %v5508_v42, %v1754_v17  ;;  %v1993_v0 = vsel %vm1929_vm10, 0.0, %v5742_v61  ;;  %v1391_v37 = vadd.f32 %v6854_v50, %v1314_v45  ;;  %v1542_v41 = vadd.f32 %v5715_v28, %v1465_v44  ;;  %2518 = vmatpush.msrb.mxu1 %v2224_v22 }
 0x2a4   : > { %v1689_v15 = vpop.f32.mrf.mxu0  ;;  %3154 = vmatmul.msk.f32.gmra.mxu1 %vm5541_vm0, %v5742_v61  ;;  %3182 = vmatmul.msk.f32.gmra.mxu0 %vm5541_vm0, %v5742_v61  ;;  %v2041_v17 = vrot.slane %v1993_v0, 1  ;;  %v2097_v1 = vrot.slane %v1993_v0, 2  ;;  %v6858_v0 = vld [vmem:[#allocation34_spill] sm:$0xff] }
 0x2a5   : > { %vm1795_vm1 = vcmp.ge.f32.partialorder %v1775_v54, 0.0  ;;  %v1815_v38 = vmul.f32 0.1, %v1775_v54  ;;  %v1690_v62 = vadd.f32 %v1689_v15, %v1613_v29  ;;  %v6852_v29 = vld [vmem:[#allocation27_spill] sm:$0xff]  ;;  %v1468_v28 = vadd.f32 %v5695_v59, %v1391_v37  ;;  %v6860_v59 = vld [vmem:[#allocation41_spill] sm:$0xff] }
 0x2a6   : > { %v1166_v45 = vadd.f32 %v6859_v6, %v6858_v0 }
 0x2a7   : > { %v1734_v36 = vadd.f32 %v5491_v25, %v1690_v62  ;;  %2410 = vmatmul.f32.gmra.mxu2 %v5761_v18  ;;  %v1835_v21 = vsel %vm1795_vm1, %v1775_v54, %v1815_v38  ;;  %v6853_v54 = vld [vmem:[#allocation67_spill] sm:$0xff] }
 0x2a8   : > { %2475 = vmatmul.f32.gmra.mxu3 %v5770_v43  ;;  %v1896_v33 = vsel %vm5719_vm15, %v1835_v21, 0.0  ;;  %v1163_v39 = vadd.f32 %v6853_v54, %v6852_v29  ;;  %v6862_v29 = vld [vmem:[#allocation68_spill] sm:$0xff]  ;;  %vm6863_vm15 = vmmov %vm6847_vm12 }
 0x2a9   : > { %v1755_v3 = vmul.f32 %v5498_v35, %v1734_v36  ;;  %v1940_v51 = vrot.slane %v1896_v33, 7  ;;  %v5817_v36 = vpop.f32.mrf.mxu2  ;;  %v1619_v33 = vadd.f32 %v5739_v53, %v1542_v41  ;;  %v2239_v41 = vld [vmem:[#allocation4 + $0x228] sm:$0xff]  ;;  %vm6871_vm12 = vmmov %vm6861_vm4 }
 0x2aa   : > { %v1240_v4 = vadd.f32 %v6857_v24, %v1163_v39  ;;  %2584 = vmatpush.msrb.mxu2 %v2239_v41 }
 0x2ab   : > { %v1776_v5 = vadd.f32 %v5508_v42, %v1755_v3  ;;  %v5787_v9 = vsel %vm1929_vm10, %v5742_v61, %v1940_v51  ;;  %v2003_v19 = vsel %vm1929_vm10, %v1940_v51, 0.0 }
 0x2ac   : > { %v1692_v60 = vpop.f32.mrf.mxu0  ;;  %2351 = vmatmul.f32.gmra.mxu1 %v5787_v9  ;;  %2729 = vmatmul.f32.gmra.mxu0 %v5787_v9  ;;  %v2042_v26 = vrot.slane %v5787_v9, 1  ;;  %v2098_v7 = vrot.slane %v5787_v9, 2  ;;  %v2044_v11 = vrot.slane %v2003_v19, 1  ;;  %v2100_v51 = vrot.slane %v2003_v19, 2 }
 0x2ad   : > { %vm1796_vm7 = vcmp.ge.f32.partialorder %v1776_v5, 0.0  ;;  %v1816_v8 = vmul.f32 0.1, %v1776_v5  ;;  %v1693_v30 = vadd.f32 %v1692_v60, %v1616_v55  ;;  %v1317_v44 = vadd.f32 %v6860_v59, %v1240_v4 }
 0x2ae   : > { %v5805_v15 = vsel %vm6855_vm6, %v2041_v17, %v2042_v26  ;;  %v5808_v16 = vsel %vm6856_vm14, %v2097_v1, %v2098_v7  ;;  %v1545_v17 = vadd.f32 %v5765_v49, %v1468_v28  ;;  %v5838_v1 = vpop.f32.mrf.mxu1  ;;  %v5848_v50 = vsel %vm6863_vm15, %v2098_v7, %v2100_v51  ;;  %v6864_v49 = vld [vmem:[#allocation46_spill] sm:$0xff]  ;;  %v6865_v7 = vld [vmem:[#allocation16_spill] sm:$0xff] }
 0x2af   : > { %v1836_v38 = vsel %vm1796_vm7, %v1776_v5, %v1816_v8  ;;  %v1735_v62 = vadd.f32 %v5491_v25, %v1693_v30  ;;  %2413 = vmatmul.f32.gmra.mxu2 %v5805_v15  ;;  %v5835_v5 = vpop.f32.mrf.mxu3  ;;  %v1854_v8 = vadd.s32 5, %v5510_v12  ;;  %v5842_v30 = vsel %vm6861_vm4, %v2042_v26, %v2044_v11  ;;  %vm6878_vm7 = vmmov %vm6861_vm4 }
 0x2b0   : > { %2478 = vmatmul.f32.gmra.mxu3 %v5808_v16  ;;  %v1897_v27 = vsel %vm5797_vm3, %v1836_v38, 0.0  ;;  %v1394_v54 = vadd.f32 %v6862_v29, %v1317_v44  ;;  %v2223_v38 = vld [vmem:[#allocation4 + $0x1a8] sm:$0xff]  ;;  %v6870_v44 = vld [vmem:[#allocation71_spill] sm:$0xff]  ;;  %vm6887_vm15 = vmmov %vm6878_vm7 }
 0x2b1   : > { %v1756_v21 = vmul.f32 %v5498_v35, %v1735_v62  ;;  %v5820_v31 = vrot.slane %v1897_v27, 7  ;;  %v1243_v62 = vadd.f32 %v6864_v49, %v1166_v45  ;;  %2519 = vmatpush.msrb.mxu1 %v2223_v38  ;;  %vm1864_vm8 = vcmp.ge.s32.totalorder %v1854_v8, 0  ;;  %v1550_v11 = vpop.f32.mrf.mxu2  ;;  %v6868_v45 = vld [vmem:[#allocation30_spill] sm:$0xff]  ;;  %v2238_v49 = vld [vmem:[#allocation4 + $0x220] sm:$0xff] }
 0x2b2   : > { %vm1874_vm13 = vcmp.lt.s32.totalorder %v1854_v8, 16  ;;  %v1471_v28 = vadd.f32 %v5745_v13, %v1394_v54  ;;  %2585 = vmatpush.msrb.mxu2 %v2238_v49 }
 0x2b3   : > { %v1777_v3 = vadd.f32 %v5508_v42, %v1756_v21  ;;  %v1994_v40 = vsel %vm1929_vm10, 0.0, %v5820_v31  ;;  %v1320_v22 = vadd.f32 %v6865_v7, %v1243_v62  ;;  %v1622_v21 = vadd.f32 %v5782_v48, %v1545_v17  ;;  %vm5871_vm9 = vmand %vm1864_vm8, %vm1874_vm13  ;;  %v2222_v62 = vld [vmem:[#allocation4 + $0x1a0] sm:$0xff] }
 0x2b4   : > { %v1695_v55 = vpop.f32.mrf.mxu0  ;;  %3156 = vmatmul.msk.f32.gmra.mxu1 %vm5541_vm0, %v5820_v31  ;;  %3184 = vmatmul.msk.f32.gmra.mxu0 %vm5541_vm0, %v5820_v31  ;;  %v2102_v51 = vrot.slane %v1994_v40, 2  ;;  %v1548_v29 = vadd.f32 %v5817_v36, %v1471_v28 }
 0x2b5   : > { %vm1797_vm11 = vcmp.ge.f32.partialorder %v1777_v3, 0.0  ;;  %v1817_v53 = vmul.f32 0.1, %v1777_v3  ;;  %v1696_v60 = vadd.f32 %v1695_v55, %v1619_v33  ;;  %v2046_v33 = vrot.slane %v1994_v40, 1  ;;  %v6869_v55 = vld [vmem:[#allocation37_spill] sm:$0xff]  ;;  %2520 = vmatpush.msrb.mxu1 %v2222_v62  ;;  %v6873_v40 = vld [vmem:[#allocation47_spill] sm:$0xff] }
 0x2b6   : > { %v1169_v59 = vadd.f32 %v6869_v55, %v6868_v45  ;;  %v5888_v41 = vpop.f32.mrf.mxu1  ;;  %v1625_v28 = vadd.f32 %v5835_v5, %v1548_v29  ;;  %v6877_v29 = vld [vmem:[#allocation74_spill] sm:$0xff] }
 0x2b7   : > { %v1736_v39 = vadd.f32 %v5491_v25, %v1696_v60  ;;  %2416 = vmatmul.f32.gmra.mxu2 %v5842_v30  ;;  %v1837_v37 = vsel %vm1797_vm11, %v1777_v3, %v1817_v53  ;;  %v1397_v53 = vadd.f32 %v6870_v44, %v1320_v22  ;;  %v1627_v54 = vpop.f32.mrf.mxu3 }
 0x2b8   : > { %2481 = vmatmul.f32.gmra.mxu3 %v5848_v50  ;;  %v1898_v26 = vsel %vm5797_vm3, %v1837_v37, 0.0  ;;  %v1246_v7 = vadd.f32 %v6873_v40, %v1169_v59  ;;  %vm6879_vm3 = vmmov %vm6872_vm5  ;;  %v2221_v40 = vld [vmem:[#allocation4 + $0x198] sm:$0xff] }
 0x2b9   : > { %v1757_v19 = vmul.f32 %v5498_v35, %v1736_v39  ;;  %v1943_v27 = vrot.slane %v1898_v26, 7  ;;  %v1553_v59 = vpop.f32.mrf.mxu2  ;;  %2521 = vmatpush.msrb.mxu1 %v2221_v40  ;;  %v6886_v40 = vld [vmem:[#allocation75_spill] sm:$0xff]  ;;  %vm6888_vm8 = vmmov %vm6879_vm3 }
 0x2bb   : > { %v1778_v58 = vadd.f32 %v5508_v42, %v1757_v19  ;;  %v5863_v24 = vsel %vm1929_vm10, %v5820_v31, %v1943_v27  ;;  %v2004_v37 = vsel %vm1929_vm10, %v1943_v27, 0.0  ;;  %v2265_v19 = vld [vmem:[#allocation4 + $0x2f8] sm:$0xff]  ;;  %v1474_v27 = vadd.f32 %v5789_v63, %v1397_v53  ;;  %v2263_v63 = vld [vmem:[#allocation4 + $0x2e8] sm:$0xff] }
 0x2bc   : > { %v1698_v4 = vpop.f32.mrf.mxu0  ;;  %2357 = vmatmul.f32.gmra.mxu1 %v5863_v24  ;;  %2735 = vmatmul.f32.gmra.mxu0 %v5863_v24  ;;  %v2047_v3 = vrot.slane %v5863_v24, 1  ;;  %v2103_v48 = vrot.slane %v5863_v24, 2  ;;  %v2049_v22 = vrot.slane %v2004_v37, 1 }
 0x2bd   : > { %vm1798_vm1 = vcmp.ge.f32.partialorder %v1778_v58, 0.0  ;;  %v1818_v13 = vmul.f32 0.1, %v1778_v58  ;;  %v1699_v6 = vadd.f32 %v1698_v4, %v1622_v21  ;;  %2639 = vmatpush.msra.mxu3 %v2265_v19  ;;  %v2264_v21 = vld [vmem:[#allocation4 + $0x2f0] sm:$0xff]  ;;  %v2105_v4 = vrot.slane %v2004_v37, 2  ;;  %v2237_v19 = vld [vmem:[#allocation4 + $0x218] sm:$0xff] }
 0x2be   : > { %v5879_v60 = vsel %vm6871_vm12, %v2046_v33, %v2047_v3  ;;  %v5882_v17 = vsel %vm6872_vm5, %v2102_v51, %v2103_v48  ;;  %v6874_v33 = vld [vmem:[#allocation40_spill] sm:$0xff]  ;;  %v6875_v51 = vld [vmem:[#allocation18_spill] sm:$0xff]  ;;  %v1551_v53 = vadd.f32 %v1550_v11, %v1474_v27  ;;  %v5912_v37 = vsel %vm6878_vm7, %v2047_v3, %v2049_v22  ;;  %v6880_v11 = vld [vmem:[#allocation49_spill] sm:$0xff]  ;;  %2586 = vmatpush.msrb.mxu2 %v2237_v19 }
 0x2bf   : > { %v1838_v8 = vsel %vm1798_vm1, %v1778_v58, %v1818_v13  ;;  %v1737_v39 = vadd.f32 %v5491_v25, %v1699_v6  ;;  %2419 = vmatmul.f32.gmra.mxu2 %v5879_v60  ;;  %v1172_v13 = vadd.f32 %v6875_v51, %v6874_v33  ;;  %v6876_v6 = vld [vmem:[#allocation44_spill] sm:$0xff]  ;;  %2640 = vmatpush.msra.mxu3 %v2264_v21  ;;  %v2261_v27 = vld [vmem:[#allocation4 + $0x2d8] sm:$0xff]  ;;  %v1630_v22 = vpop.f32.mrf.mxu3  ;;  %v5927_v33 = vpop.f32.mrf.mxu1  ;;  %v2260_v51 = vld [vmem:[#allocation4 + $0x2d0] sm:$0xff] }
 0x2c0   : > { %v1899_v38 = vsel %vm5871_vm9, %v1838_v8, 0.0  ;;  %2484 = vmatmul.f32.gmra.mxu3 %v5882_v17  ;;  %v1323_v45 = vadd.f32 %v6876_v6, %v1246_v7  ;;  %v1628_v0 = vadd.f32 %v1627_v54, %v1551_v53  ;;  %vm6894_vm1 = vmmov %vm6878_vm7 }
 0x2c1   : > { %v1758_v26 = vmul.f32 %v5498_v35, %v1737_v39  ;;  %v5894_v36 = vrot.slane %v1899_v38, 7  ;;  %v1855_v39 = vadd.s32 6, %v5510_v12  ;;  %v2262_v38 = vld [vmem:[#allocation4 + $0x2e0] sm:$0xff]  ;;  %2641 = vmatpush.msra.mxu3 %v2263_v63  ;;  %v1249_v7 = vadd.f32 %v6880_v11, %v1172_v13 }
 0x2c2   : > { %v1400_v8 = vadd.f32 %v6877_v29, %v1323_v45 }
 0x2c3   : > { %v1779_v58 = vadd.f32 %v5508_v42, %v1758_v26  ;;  %v5917_v26 = vsel %vm6879_vm3, %v2103_v48, %v2105_v4  ;;  %v1995_v48 = vsel %vm1929_vm10, 0.0, %v5894_v36  ;;  %2642 = vmatpush.msra.mxu3 %v2262_v38  ;;  %vm1865_vm6 = vcmp.ge.s32.totalorder %v1855_v39, 0  ;;  %v2220_v38 = vld [vmem:[#allocation4 + $0x190] sm:$0xff] }
 0x2c4   : > { %v1701_v55 = vpop.f32.mrf.mxu0  ;;  %3158 = vmatmul.msk.f32.gmra.mxu1 %vm5541_vm0, %v5894_v36  ;;  %3186 = vmatmul.msk.f32.gmra.mxu0 %vm5541_vm0, %v5894_v36  ;;  %vm1875_vm14 = vcmp.lt.s32.totalorder %v1855_v39, 16  ;;  %v1477_v13 = vadd.f32 %v5838_v1, %v1400_v8  ;;  %v2051_v63 = vrot.slane %v1995_v48, 1  ;;  %v2236_v8 = vld [vmem:[#allocation4 + $0x210] sm:$0xff]  ;;  %v2259_v39 = vld [vmem:[#allocation4 + $0x2c8] sm:$0xff] }
 0x2c5   : > { %vm1799_vm2 = vcmp.ge.f32.partialorder %v1779_v58, 0.0  ;;  %v1819_v5 = vmul.f32 0.1, %v1779_v58  ;;  %v1702_v44 = vadd.f32 %v1701_v55, %v1625_v28  ;;  %2643 = vmatpush.msra.mxu3 %v2261_v27  ;;  %vm5941_vm4 = vmand %vm1865_vm6, %vm1875_vm14  ;;  %2587 = vmatpush.msrb.mxu2 %v2236_v8 }
 0x2c6   : > { %v1554_v27 = vadd.f32 %v1553_v59, %v1477_v13  ;;  %2522 = vmatpush.msrb.mxu1 %v2220_v38  ;;  %v2219_v59 = vld [vmem:[#allocation4 + $0x188] sm:$0xff]  ;;  %vm6904_vm6 = vmmov %vm6888_vm8 }
 0x2c7   : > { %v1839_v49 = vsel %vm1799_vm2, %v1779_v58, %v1819_v5  ;;  %v1738_v62 = vadd.f32 %v5491_v25, %v1702_v44  ;;  %2422 = vmatmul.f32.gmra.mxu2 %v5912_v37  ;;  %v6881_v58 = vld [vmem:[#allocation60_spill] sm:$0xff]  ;;  %v2107_v44 = vrot.slane %v1995_v48, 2  ;;  %2644 = vmatpush.msra.mxu3 %v2260_v51  ;;  %v6889_v13 = vld [vmem:[#allocation61_spill] sm:$0xff]  ;;  %v1633_v8 = vpop.f32.mrf.mxu3  ;;  %v5969_v32 = vpop.f32.mrf.mxu1 }
 0x2c8   : > { %2487 = vmatmul.f32.gmra.mxu3 %v5917_v26  ;;  %v1900_v3 = vsel %vm5871_vm9, %v1839_v49, 0.0  ;;  %v1326_v4 = vadd.f32 %v6881_v58, %v1249_v7  ;;  %v6884_v49 = vld [vmem:[#allocation39_spill] sm:$0xff]  ;;  %2523 = vmatpush.msrb.mxu1 %v2219_v59  ;;  %v1856_v59 = vadd.s32 7, %v5510_v12  ;;  %vm6895_vm9 = vmmov %vm6879_vm3 }
 0x2c9   : > { %v1759_v21 = vmul.f32 %v5498_v35, %v1738_v62  ;;  %v1946_v28 = vrot.slane %v1900_v3, 7  ;;  %v6885_v62 = vld [vmem:[#allocation21_spill] sm:$0xff]  ;;  %2645 = vmatpush.msra.mxu3 %v2259_v39  ;;  %vm6903_vm3 = vmmov %vm6894_vm1 }
 0x2ca   : > { %v1175_v19 = vadd.f32 %v6885_v62, %v6884_v49  ;;  %v1403_v11 = vadd.f32 %v6886_v40, %v1326_v4  ;;  %v2218_v62 = vld [vmem:[#allocation4 + $0x180] sm:$0xff]  ;;  %v6890_v40 = vld [vmem:[#allocation42_spill] sm:$0xff]  ;;  %vm1866_vm12 = vcmp.ge.s32.totalorder %v1856_v59, 0  ;;  %vm1876_vm5 = vcmp.lt.s32.totalorder %v1856_v59, 16 }
 0x2cb   : > { %v1780_v6 = vadd.f32 %v5508_v42, %v1759_v21  ;;  %v5933_v45 = vsel %vm1929_vm10, %v5894_v36, %v1946_v28  ;;  %v1556_v21 = vpop.f32.mrf.mxu2  ;;  %v2005_v51 = vsel %vm1929_vm10, %v1946_v28, 0.0  ;;  %v1631_v28 = vadd.f32 %v1630_v22, %v1554_v27  ;;  %v2235_v27 = vld [vmem:[#allocation4 + $0x208] sm:$0xff]  ;;  %2524 = vmatpush.msrb.mxu1 %v2218_v62  ;;  %vm6007_vm7 = vmand %vm1866_vm12, %vm1876_vm5 }
 0x2cc   : > { %v1704_v55 = vpop.f32.mrf.mxu0  ;;  %2363 = vmatmul.f32.gmra.mxu1 %v5933_v45  ;;  %2741 = vmatmul.f32.gmra.mxu0 %v5933_v45  ;;  %v2052_v5 = vrot.slane %v5933_v45, 1  ;;  %v2108_v54 = vrot.slane %v5933_v45, 2  ;;  %v2110_v49 = vrot.slane %v2005_v51, 2 }
 0x2cd   : > { %vm1800_vm11 = vcmp.ge.f32.partialorder %v1780_v6, 0.0  ;;  %v1820_v1 = vmul.f32 0.1, %v1780_v6  ;;  %v1705_v29 = vadd.f32 %v1704_v55, %v1628_v0  ;;  %v2258_v0 = vld [vmem:[#allocation4 + $0x2c0] sm:$0xff]  ;;  %2588 = vmatpush.msrb.mxu2 %v2235_v27 }
 0x2ce   : > { %v5949_v7 = vsel %vm6887_vm15, %v2051_v63, %v2052_v5  ;;  %v5952_v3 = vsel %vm6888_vm8, %v2107_v44, %v2108_v54  ;;  %v1480_v44 = vadd.f32 %v5888_v41, %v1403_v11  ;;  %2646 = vmatpush.msra.mxu3 %v2258_v0  ;;  %v2256_v41 = vld [vmem:[#allocation4 + $0x2b0] sm:$0xff]  ;;  %v6893_v0 = vld [vmem:[#allocation76_spill] sm:$0xff] }
 0x2cf   : > { %v1840_v48 = vsel %vm1800_vm11, %v1780_v6, %v1820_v1  ;;  %v1739_v58 = vadd.f32 %v5491_v25, %v1705_v29  ;;  %2425 = vmatmul.f32.gmra.mxu2 %v5949_v7  ;;  %v1252_v6 = vadd.f32 %v6889_v13, %v1175_v19  ;;  %v2054_v1 = vrot.slane %v2005_v51, 1  ;;  %v2257_v29 = vld [vmem:[#allocation4 + $0x2b8] sm:$0xff]  ;;  %vm6906_vm11 = vmmov %vm6894_vm1 }
 0x2d0   : > { %v1901_v4 = vsel %vm5941_vm4, %v1840_v48, 0.0  ;;  %2490 = vmatmul.f32.gmra.mxu3 %v5952_v3  ;;  %v6891_v48 = vld [vmem:[#allocation26_spill] sm:$0xff]  ;;  %v1557_v51 = vadd.f32 %v1556_v21, %v1480_v44 }
 0x2d1   : > { %v1760_v55 = vmul.f32 %v5498_v35, %v1739_v58  ;;  %v5961_v63 = vrot.slane %v1901_v4, 7  ;;  %v1178_v58 = vadd.f32 %v6891_v48, %v6890_v40  ;;  %v6892_v4 = vld [vmem:[#allocation63_spill] sm:$0xff]  ;;  %2647 = vmatpush.msra.mxu3 %v2257_v29  ;;  %v5980_v13 = vsel %vm6894_vm1, %v2052_v5, %v2054_v1  ;;  %v6897_v29 = vld [vmem:[#allocation65_spill] sm:$0xff]  ;;  %v2254_v5 = vld [vmem:[#allocation4 + $0x2a0] sm:$0xff] }
 0x2d2   : > { %v1329_v39 = vadd.f32 %v6892_v4, %v1252_v6  ;;  %v2255_v6 = vld [vmem:[#allocation4 + $0x2a8] sm:$0xff] }
 0x2d3   : > { %v1781_v38 = vadd.f32 %v5508_v42, %v1760_v55  ;;  %2648 = vmatpush.msra.mxu3 %v2256_v41  ;;  %v1255_v21 = vadd.f32 %v6897_v29, %v1178_v58  ;;  %v1559_v1 = vpop.f32.mrf.mxu2  ;;  %v1996_v4 = vsel %vm1929_vm10, 0.0, %v5961_v63  ;;  %v1634_v58 = vadd.f32 %v1633_v8, %v1557_v51  ;;  %v2252_v51 = vld [vmem:[#allocation4 + $0x290] sm:$0xff] }
 0x2d4   : > { %v1707_v19 = vpop.f32.mrf.mxu0  ;;  %3160 = vmatmul.msk.f32.gmra.mxu1 %vm5541_vm0, %v5961_v63  ;;  %3188 = vmatmul.msk.f32.gmra.mxu0 %vm5541_vm0, %v5961_v63  ;;  %v1406_v55 = vadd.f32 %v6893_v0, %v1329_v39  ;;  %v6898_v39 = vld [vmem:[#allocation66_spill] sm:$0xff]  ;;  %v2112_v0 = vrot.slane %v1996_v4, 2 }
 0x2d5   : > { %vm1801_vm13 = vcmp.ge.f32.partialorder %v1781_v38, 0.0  ;;  %v1821_v22 = vmul.f32 0.1, %v1781_v38  ;;  %v1708_v11 = vadd.f32 %v1707_v19, %v1631_v28  ;;  %v5985_v28 = vsel %vm6895_vm9, %v2108_v54, %v2110_v49  ;;  %2649 = vmatpush.msra.mxu3 %v2255_v6  ;;  %v2253_v49 = vld [vmem:[#allocation4 + $0x298] sm:$0xff]  ;;  %v3341_v6 = vld [vmem:[#allocation4 + $0x360] sm:$0xff]  ;;  %vm6910_vm9 = vmmov %vm6903_vm3 }
 0x2d6   : > { %6896 = vst [vmem:[#allocation12_spill] sm:$0xff] %v5985_v28  ;;  %v1332_v54 = vadd.f32 %v6898_v39, %v1255_v21  ;;  %v1483_v19 = vadd.f32 %v5927_v33, %v1406_v55  ;;  %v1636_v33 = vpop.f32.mrf.mxu3  ;;  %v6012_v21 = vpop.f32.mrf.mxu1 }
 0x2d7   : > { %v1841_v40 = vsel %vm1801_vm13, %v1781_v38, %v1821_v22  ;;  %v1740_v48 = vadd.f32 %v5491_v25, %v1708_v11  ;;  %2428 = vmatmul.f32.gmra.mxu2 %v5980_v13  ;;  %2650 = vmatpush.msra.mxu3 %v2254_v5  ;;  %v2056_v11 = vrot.slane %v1996_v4, 1  ;;  %v2251_v4 = vld [vmem:[#allocation4 + $0x288] sm:$0xff] }
 0x2d8   : > { %2493 = vmatmul.f32.gmra.mxu3 %v5985_v28  ;;  %v1902_v44 = vsel %vm5941_vm4, %v1841_v40, 0.0  ;;  %v1560_v39 = vadd.f32 %v1559_v1, %v1483_v19  ;;  %vm6907_vm4 = vmmov %vm6904_vm6 }
 0x2d9   : > { %v1761_v62 = vmul.f32 %v5498_v35, %v1740_v48  ;;  %v1949_v38 = vrot.slane %v1902_v44, 7  ;;  %2651 = vmatpush.msra.mxu3 %v2253_v49  ;;  %v6902_v48 = vld [vmem:[#allocation77_spill] sm:$0xff]  ;;  %vm6911_vm12 = vmmov %vm6907_vm4 }
 0x2da   : > { %v1409_v29 = vadd.f32 %v6902_v48, %v1332_v54  ;;  %v2297_v48 = vld [vmem:[#allocation4 + $0x3f8] sm:$0xff] }
 0x2db   : > { %v1782_v53 = vadd.f32 %v5508_v42, %v1761_v62  ;;  %v5999_v41 = vsel %vm1929_vm10, %v5961_v63, %v1949_v38  ;;  %v2234_v62 = vld [vmem:[#allocation4 + $0x200] sm:$0xff]  ;;  %v2006_v49 = vsel %vm1929_vm10, %v1949_v38, 0.0  ;;  %2652 = vmatpush.msra.mxu3 %v2252_v51  ;;  %2769 = vmatpush.msra.mxu1 %v2297_v48 }
 0x2dc   : > { %6899 = vst [vmem:[#allocation13_spill] sm:$0xff] %v5999_v41  ;;  %v1710_v22 = vpop.f32.mrf.mxu0  ;;  %2369 = vmatmul.f32.gmra.mxu1 %v5999_v41  ;;  %2747 = vmatmul.f32.gmra.mxu0 %v5999_v41  ;;  %v2057_v27 = vrot.slane %v5999_v41, 1  ;;  %v2113_v8 = vrot.slane %v5999_v41, 2  ;;  %v1486_v1 = vadd.f32 %v5969_v32, %v1409_v29  ;;  %v2059_v19 = vrot.slane %v2006_v49, 1  ;;  %v2313_v32 = vld [vmem:[#allocation4 + $0x478] sm:$0xff] }
 0x2dd   : > { %vm1802_vm2 = vcmp.ge.f32.partialorder %v1782_v53, 0.0  ;;  %v1822_v55 = vmul.f32 0.1, %v1782_v53  ;;  %v1711_v40 = vadd.f32 %v1710_v22, %v1634_v58  ;;  %2589 = vmatpush.msrb.mxu2 %v2234_v62  ;;  %v2250_v58 = vld [vmem:[#allocation4 + $0x280] sm:$0xff]  ;;  %2653 = vmatpush.msra.mxu3 %v2251_v4  ;;  %v2115_v51 = vrot.slane %v2006_v49, 2 }
 0x2de   : > { %v6015_v44 = vsel %vm6903_vm3, %v2056_v11, %v2057_v27  ;;  %v6018_v5 = vsel %vm6904_vm6, %v2112_v0, %v2113_v8  ;;  %v1562_v0 = vpop.f32.mrf.mxu2  ;;  %v6038_v62 = vsel %vm6906_vm11, %v2057_v27, %v2059_v19  ;;  %v1857_v4 = vadd.s32 8, %v5510_v12  ;;  %vm6928_vm6 = vmmov %vm6907_vm4 }
 0x2df   : > { %6905 = vst [vmem:[#allocation32_spill] sm:$0xff] %v6018_v5  ;;  %v1842_v59 = vsel %vm1802_vm2, %v1782_v53, %v1822_v55  ;;  %v1741_v41 = vadd.f32 %v5491_v25, %v1711_v40  ;;  %2431 = vmatmul.f32.gmra.mxu2 %v6015_v44  ;;  %v1637_v53 = vadd.f32 %v1636_v33, %v1560_v39  ;;  %v3338_v33 = vld [vmem:[#allocation4 + $0x378] sm:$0xff]  ;;  %v1639_v39 = vpop.f32.mrf.mxu3  ;;  %vm6912_vm2 = vmmov %vm6903_vm3 }
 0x2e0   : > { %v1903_v54 = vsel %vm6007_vm7, %v1842_v59, 0.0  ;;  %2496 = vmatmul.f32.gmra.mxu3 %v6018_v5  ;;  %v1563_v29 = vadd.f32 %v1562_v0, %v1486_v1  ;;  %2834 = vmatpush.msra.mxu2 %v2313_v32  ;;  %v2312_v1 = vld [vmem:[#allocation4 + $0x470] sm:$0xff]  ;;  %vm1867_vm15 = vcmp.ge.s32.totalorder %v1857_v4, 0  ;;  %vm1877_vm8 = vcmp.lt.s32.totalorder %v1857_v4, 16  ;;  %vm6927_vm3 = vmmov %vm6912_vm2 }
 0x2e1   : > { %v1762_v22 = vmul.f32 %v5498_v35, %v1741_v41  ;;  %v6027_v11 = vrot.slane %v1903_v54, 7  ;;  %2654 = vmatpush.msra.mxu3 %v2250_v58  ;;  %v6044_v54 = vsel %vm6907_vm4, %v2113_v8, %v2115_v51  ;;  %v3339_v58 = vld [vmem:[#allocation4 + $0x370] sm:$0xff]  ;;  %vm6065_vm1 = vmand %vm1867_vm15, %vm1877_vm8 }
 0x2e2   : > { %2835 = vmatpush.msra.mxu2 %v2312_v1  ;;  %v1640_v8 = vadd.f32 %v1639_v39, %v1563_v29  ;;  %vm6930_vm15 = vmmov %vm6912_vm2 }
 0x2e3   : > { %v1783_v38 = vadd.f32 %v5508_v42, %v1762_v22  ;;  %3236 = vmatpush.msrb.mxu3 %v3338_v33  ;;  %v6046_v22 = vpop.f32.mrf.mxu1  ;;  %v1997_v0 = vsel %vm1929_vm10, 0.0, %v6027_v11  ;;  %vm6931_vm8 = vmmov %vm6928_vm6 }
 0x2e4   : > { %v1713_v55 = vpop.f32.mrf.mxu0  ;;  %3162 = vmatmul.msk.f32.gmra.mxu1 %vm5541_vm0, %v6027_v11  ;;  %3190 = vmatmul.msk.f32.gmra.mxu0 %vm5541_vm0, %v6027_v11  ;;  %v2117_v48 = vrot.slane %v1997_v0, 2 }
 0x2e5   : > { %vm1803_vm14 = vcmp.ge.f32.partialorder %v1783_v38, 0.0  ;;  %v1823_v41 = vmul.f32 0.1, %v1783_v38  ;;  %v1714_v40 = vadd.f32 %v1713_v55, %v1637_v53  ;;  %3237 = vmatpush.msrb.mxu3 %v3339_v58  ;;  %v3342_v58 = vld [vmem:[#allocation4 + $0x358] sm:$0xff] }
 0x2e7   : > { %v1843_v59 = vsel %vm1803_vm14, %v1783_v38, %v1823_v41  ;;  %v1742_v49 = vadd.f32 %v5491_v25, %v1714_v40  ;;  %2434 = vmatmul.f32.gmra.mxu2 %v6038_v62  ;;  %v3340_v38 = vld [vmem:[#allocation4 + $0x368] sm:$0xff]  ;;  %v2061_v40 = vrot.slane %v1997_v0, 1 }
 0x2e8   : > { %2499 = vmatmul.f32.gmra.mxu3 %v6044_v54  ;;  %v1904_v27 = vsel %vm6007_vm7, %v1843_v59, 0.0  ;;  %vm6913_vm7 = vmmov %vm6907_vm4  ;;  %v2294_v59 = vld [vmem:[#allocation4 + $0x3e0] sm:$0xff] }
 0x2e9   : > { %v1763_v19 = vmul.f32 %v5498_v35, %v1742_v49  ;;  %v1952_v53 = vrot.slane %v1904_v27, 7  ;;  %3238 = vmatpush.msrb.mxu3 %v3340_v38  ;;  %v2296_v49 = vld [vmem:[#allocation4 + $0x3f0] sm:$0xff] }
 0x2ea   : > { %2770 = vmatpush.msra.mxu1 %v2296_v49  ;;  %v3343_v38 = vld [vmem:[#allocation4 + $0x350] sm:$0xff] }
 0x2eb   : > { %v1784_v51 = vadd.f32 %v5508_v42, %v1763_v19  ;;  %v6057_v55 = vsel %vm1929_vm10, %v6027_v11, %v1952_v53  ;;  %3239 = vmatpush.msrb.mxu3 %v3341_v6  ;;  %v2007_v4 = vsel %vm1929_vm10, %v1952_v53, 0.0 }
 0x2ec   : > { %v1716_v41 = vpop.f32.mrf.mxu0  ;;  %2375 = vmatmul.f32.gmra.mxu1 %v6057_v55  ;;  %2753 = vmatmul.f32.gmra.mxu0 %v6057_v55  ;;  %v2062_v32 = vrot.slane %v6057_v55, 1  ;;  %v2118_v33 = vrot.slane %v6057_v55, 2  ;;  %v2064_v53 = vrot.slane %v2007_v4, 1 }
 0x2ed   : > { %v1824_v29 = vmul.f32 0.1, %v1784_v51  ;;  %v1717_v39 = vadd.f32 %v1716_v41, %v1640_v8  ;;  %vm1804_vm13 = vcmp.ge.f32.partialorder %v1784_v51, 0.0  ;;  %3240 = vmatpush.msrb.mxu3 %v3342_v58  ;;  %v6078_v8 = vpop.f32.mrf.mxu2  ;;  %v2120_v58 = vrot.slane %v2007_v4, 2 }
 0x2ee   : > { %v6070_v27 = vsel %vm6910_vm9, %v2061_v40, %v2062_v32  ;;  %v6073_v1 = vsel %vm6911_vm12, %v2117_v48, %v2118_v33  ;;  %v2311_v40 = vld [vmem:[#allocation4 + $0x468] sm:$0xff]  ;;  %v6083_v48 = vpop.f32.mrf.mxu3  ;;  %vm6940_vm12 = vmmov %vm6928_vm6 }
 0x2ef   : > { %v1743_v19 = vadd.f32 %v5491_v25, %v1717_v39  ;;  %2437 = vmatmul.f32.gmra.mxu2 %v6070_v27  ;;  %v1844_v0 = vsel %vm1804_vm13, %v1784_v51, %v1824_v29  ;;  %3241 = vmatpush.msrb.mxu3 %v3343_v38  ;;  %v3344_v51 = vld [vmem:[#allocation4 + $0x348] sm:$0xff]  ;;  %v3345_v38 = vld [vmem:[#allocation4 + $0x340] sm:$0xff]  ;;  %v6100_v4 = vsel %vm6913_vm7, %v2118_v33, %v2120_v58  ;;  %v3350_v58 = vld [vmem:[#allocation4 + $0x318] sm:$0xff] }
 0x2f0   : > { %2502 = vmatmul.f32.gmra.mxu3 %v6073_v1  ;;  %v2331_v6 = vpop.f32.mrf.mxu1  ;;  %v1905_v41 = vsel %vm6065_vm1, %v1844_v0, 0.0  ;;  %2836 = vmatpush.msra.mxu2 %v2311_v40  ;;  %v2295_v0 = vld [vmem:[#allocation4 + $0x3e8] sm:$0xff]  ;;  %v6096_v40 = vsel %vm6912_vm2, %v2062_v32, %v2064_v53 }
 0x2f1   : > { %v1764_v39 = vmul.f32 %v5498_v35, %v1743_v19  ;;  %v6086_v49 = vrot.slane %v1905_v41, 7  ;;  %3242 = vmatpush.msrb.mxu3 %v3344_v51  ;;  %v3346_v41 = vld [vmem:[#allocation4 + $0x338] sm:$0xff]  ;;  %2771 = vmatpush.msra.mxu1 %v2295_v0  ;;  %v3348_v32 = vld [vmem:[#allocation4 + $0x328] sm:$0xff] }
 0x2f3   : > { %v1785_v29 = vadd.f32 %v5508_v42, %v1764_v39  ;;  %3243 = vmatpush.msrb.mxu3 %v3345_v38  ;;  %v2310_v38 = vld [vmem:[#allocation4 + $0x460] sm:$0xff]  ;;  %2772 = vmatpush.msra.mxu1 %v2294_v59 }
 0x2f4   : > { %3164 = vmatmul.msk.f32.vlgmr.msrb.gmra.mxu1 %vm5541_vm0, %v5598_v34  ;;  %3192 = vmatmul.msk.f32.gmra.mxu0 %vm5541_vm0, %v6086_v49  ;;  %v3347_v34 = vld [vmem:[#allocation4 + $0x330] sm:$0xff] }
 0x2f5   : > { %vm1805_vm5 = vcmp.ge.f32.partialorder %v1785_v29, 0.0  ;;  %v1825_v19 = vmul.f32 0.1, %v1785_v29  ;;  %3244 = vmatpush.msrb.mxu3 %v3346_v41  ;;  %2837 = vmatpush.msra.mxu2 %v2310_v38  ;;  %v6107_v53 = vpop.f32.mrf.mxu2 }
 0x2f6   : > { %v6109_v0 = vpop.f32.mrf.mxu3 }
 0x2f7   : > { %2440 = vmatmul.f32.gmra.mxu2 %v6096_v40  ;;  %v1845_v39 = vsel %vm1805_vm5, %v1785_v29, %v1825_v19  ;;  %3245 = vmatpush.msrb.mxu3 %v3347_v34  ;;  %v3349_v29 = vld [vmem:[#allocation4 + $0x320] sm:$0xff]  ;;  %v3351_v19 = vld [vmem:[#allocation4 + $0x310] sm:$0xff] }
 0x2f8   : > { %2505 = vmatmul.f32.gmra.mxu3 %v6100_v4  ;;  %v1906_v51 = vsel %vm6065_vm1, %v1845_v39, 0.0  ;;  %v2309_v39 = vld [vmem:[#allocation4 + $0x458] sm:$0xff] }
 0x2f9   : > { %v2334_v12 = vpop.f32.mrf.mxu1  ;;  %v6105_v41 = vrot.slane %v1906_v51, 7  ;;  %3246 = vmatpush.msrb.mxu3 %v3348_v32  ;;  %2838 = vmatpush.msra.mxu2 %v2309_v39  ;;  %v3352_v51 = vld [vmem:[#allocation4 + $0x308] sm:$0xff] }
 0x2fb   : > { %v6114_v33 = vsel %vm1929_vm10, %v6086_v49, %v6105_v41  ;;  %3247 = vmatpush.msrb.mxu3 %v3349_v29  ;;  %v3353_v29 = vld [vmem:[#allocation4 + $0x300] sm:$0xff] }
 0x2fc   : > { %2528 = vmatmul.f32.gmra.mxu1 %v5633_v2  ;;  %2759 = vmatmul.f32.gmra.mxu0 %v6114_v33 }
 0x2fd   : > { %3248 = vmatpush.msrb.mxu3 %v3350_v58 }
 0x2ff   : > { %2590 = vmatmul.f32.vlgmr.msrb.gmra.mxu2 %v5651_v23  ;;  %3249 = vmatpush.msrb.mxu3 %v3351_v19  ;;  %v2293_v23 = vld [vmem:[#allocation4 + $0x3d8] sm:$0xff] }
 0x300   : > { %2655 = vmatmul.f32.vlgmr.msra.gmra.mxu3 %v5654_v46  ;;  %2773 = vmatpush.msra.mxu1 %v2293_v23  ;;  %v2308_v46 = vld [vmem:[#allocation4 + $0x450] sm:$0xff] }
 0x301   : > { %v2337_v34 = vpop.f32.mrf.mxu1  ;;  %3250 = vmatpush.msrb.mxu3 %v3352_v51  ;;  %2839 = vmatpush.msra.mxu2 %v2308_v46 }
 0x302   : > { %v2396_v38 = vpop.f32.mrf.mxu2 }
 0x303   : > { %v2397_v32 = vadd.f32 %v2396_v38, %v2331_v6  ;;  %v2461_v2 = vpop.f32.mrf.mxu3  ;;  %3251 = vmatpush.msrb.mxu3 %v3353_v29  ;;  %v2292_v38 = vld [vmem:[#allocation4 + $0x3d0] sm:$0xff]  ;;  %v2306_v29 = vld [vmem:[#allocation4 + $0x440] sm:$0xff] }
 0x304   : > { %3166 = vmatmul.msk.f32.gmra.mxu1 %vm5541_vm0, %v5663_v52  ;;  %v2307_v52 = vld [vmem:[#allocation4 + $0x448] sm:$0xff] }
 0x305   : > { %v6123_v59 = vadd.f32 %v2461_v2, %v2397_v32  ;;  %2774 = vmatpush.msra.mxu1 %v2292_v38  ;;  %2840 = vmatpush.msra.mxu2 %v2307_v52 }
 0x307   : > { %2593 = vmatmul.f32.gmra.mxu2 %v5683_v47 }
 0x308   : > { %2658 = vmatmul.f32.gmra.mxu3 %v5692_v14  ;;  %2841 = vmatpush.msra.mxu2 %v2306_v29 }
 0x309   : > { %v2340_v58 = vpop.f32.mrf.mxu1 }
 0x30a   : > { %v2399_v19 = vpop.f32.mrf.mxu2 }
 0x30b   : > { %v2400_v6 = vadd.f32 %v2399_v19, %v2334_v12  ;;  %v2464_v39 = vpop.f32.mrf.mxu3 }
 0x30c   : > { %2534 = vmatmul.f32.gmra.mxu1 %v5709_v57  ;;  %v2291_v57 = vld [vmem:[#allocation4 + $0x3c8] sm:$0xff] }
 0x30d   : > { %v6128_v51 = vadd.f32 %v2464_v39, %v2400_v6  ;;  %2775 = vmatpush.msra.mxu1 %v2291_v57  ;;  %v2290_v39 = vld [vmem:[#allocation4 + $0x3c0] sm:$0xff] }
 0x30f   : > { %2596 = vmatmul.f32.gmra.mxu2 %v5727_v56  ;;  %2776 = vmatpush.msra.mxu1 %v2290_v39 }
 0x310   : > { %2661 = vmatmul.f32.gmra.mxu3 %v5730_v20 }
 0x311   : > { %v2343_v47 = vpop.f32.mrf.mxu1 }
 0x312   : > { %v2402_v14 = vpop.f32.mrf.mxu2 }
 0x313   : > { %v2403_v32 = vadd.f32 %v2402_v14, %v2337_v34  ;;  %v2467_v2 = vpop.f32.mrf.mxu3 }
 0x314   : > { %3168 = vmatmul.msk.f32.gmra.mxu1 %vm5541_vm0, %v5742_v61  ;;  %v2305_v61 = vld [vmem:[#allocation4 + $0x438] sm:$0xff] }
 0x315   : > { %v6135_v12 = vadd.f32 %v2467_v2, %v2403_v32  ;;  %2842 = vmatpush.msra.mxu2 %v2305_v61  ;;  %v2304_v2 = vld [vmem:[#allocation4 + $0x430] sm:$0xff] }
 0x317   : > { %2599 = vmatmul.f32.gmra.mxu2 %v5761_v18 }
 0x318   : > { %2664 = vmatmul.f32.gmra.mxu3 %v5770_v43  ;;  %2843 = vmatpush.msra.mxu2 %v2304_v2 }
 0x319   : > { %v2346_v23 = vpop.f32.mrf.mxu1 }
 0x31a   : > { %v2405_v46 = vpop.f32.mrf.mxu2 }
 0x31b   : > { %v2406_v19 = vadd.f32 %v2405_v46, %v2340_v58  ;;  %v2470_v6 = vpop.f32.mrf.mxu3 }
 0x31c   : > { %2540 = vmatmul.f32.gmra.mxu1 %v5787_v9  ;;  %v2289_v9 = vld [vmem:[#allocation4 + $0x3b8] sm:$0xff] }
 0x31d   : > { %v6140_v34 = vadd.f32 %v2470_v6, %v2406_v19  ;;  %2777 = vmatpush.msra.mxu1 %v2289_v9  ;;  %v2288_v6 = vld [vmem:[#allocation4 + $0x3b0] sm:$0xff] }
 0x31f   : > { %2602 = vmatmul.f32.gmra.mxu2 %v5805_v15  ;;  %2778 = vmatpush.msra.mxu1 %v2288_v6 }
 0x320   : > { %2667 = vmatmul.f32.gmra.mxu3 %v5808_v16 }
 0x321   : > { %v2349_v38 = vpop.f32.mrf.mxu1 }
 0x322   : > { %v2408_v52 = vpop.f32.mrf.mxu2 }
 0x323   : > { %v2409_v14 = vadd.f32 %v2408_v52, %v2343_v47  ;;  %v2473_v32 = vpop.f32.mrf.mxu3 }
 0x324   : > { %3170 = vmatmul.msk.f32.gmra.mxu1 %vm5541_vm0, %v5820_v31  ;;  %v2303_v31 = vld [vmem:[#allocation4 + $0x428] sm:$0xff] }
 0x325   : > { %v6147_v58 = vadd.f32 %v2473_v32, %v2409_v14  ;;  %2844 = vmatpush.msra.mxu2 %v2303_v31  ;;  %v2302_v32 = vld [vmem:[#allocation4 + $0x420] sm:$0xff] }
 0x327   : > { %2605 = vmatmul.f32.gmra.mxu2 %v5842_v30 }
 0x328   : > { %2670 = vmatmul.f32.gmra.mxu3 %v5848_v50  ;;  %2845 = vmatpush.msra.mxu2 %v2302_v32 }
 0x329   : > { %v2352_v57 = vpop.f32.mrf.mxu1 }
 0x32a   : > { %v2411_v29 = vpop.f32.mrf.mxu2 }
 0x32b   : > { %v2412_v46 = vadd.f32 %v2411_v29, %v2346_v23  ;;  %v2476_v19 = vpop.f32.mrf.mxu3 }
 0x32c   : > { %2546 = vmatmul.f32.gmra.mxu1 %v5863_v24  ;;  %v2287_v24 = vld [vmem:[#allocation4 + $0x3a8] sm:$0xff] }
 0x32d   : > { %v6152_v47 = vadd.f32 %v2476_v19, %v2412_v46  ;;  %2779 = vmatpush.msra.mxu1 %v2287_v24  ;;  %v2286_v19 = vld [vmem:[#allocation4 + $0x3a0] sm:$0xff] }
 0x32f   : > { %2608 = vmatmul.f32.gmra.mxu2 %v5879_v60  ;;  %2780 = vmatpush.msra.mxu1 %v2286_v19  ;;  %v2284_v19 = vld [vmem:[#allocation4 + $0x390] sm:$0xff] }
 0x330   : > { %2673 = vmatmul.f32.gmra.mxu3 %v5882_v17 }
 0x331   : > { %v2355_v39 = vpop.f32.mrf.mxu1 }
 0x332   : > { %v2414_v61 = vpop.f32.mrf.mxu2 }
 0x333   : > { %v2415_v52 = vadd.f32 %v2414_v61, %v2349_v38  ;;  %v2479_v14 = vpop.f32.mrf.mxu3 }
 0x334   : > { %3172 = vmatmul.msk.f32.gmra.mxu1 %vm5541_vm0, %v5894_v36  ;;  %v2301_v36 = vld [vmem:[#allocation4 + $0x418] sm:$0xff] }
 0x335   : > { %v6159_v23 = vadd.f32 %v2479_v14, %v2415_v52  ;;  %2846 = vmatpush.msra.mxu2 %v2301_v36  ;;  %v2300_v14 = vld [vmem:[#allocation4 + $0x410] sm:$0xff]  ;;  %v6918_v36 = vld [vmem:[#allocation36_spill] sm:$0xff] }
 0x337   : > { %2611 = vmatmul.f32.gmra.mxu2 %v5912_v37 }
 0x338   : > { %2676 = vmatmul.f32.gmra.mxu3 %v5917_v26  ;;  %2847 = vmatpush.msra.mxu2 %v2300_v14  ;;  %v6919_v14 = vld [vmem:[#allocation69_spill] sm:$0xff] }
 0x339   : > { %v2358_v9 = vpop.f32.mrf.mxu1 }
 0x33a   : > { %v2417_v2 = vpop.f32.mrf.mxu2 }
 0x33b   : > { %v2418_v29 = vadd.f32 %v2417_v2, %v2352_v57  ;;  %v2482_v46 = vpop.f32.mrf.mxu3 }
 0x33c   : > { %2552 = vmatmul.f32.gmra.mxu1 %v5933_v45  ;;  %v2285_v45 = vld [vmem:[#allocation4 + $0x398] sm:$0xff] }
 0x33d   : > { %v6164_v38 = vadd.f32 %v2482_v46, %v2418_v29  ;;  %2781 = vmatpush.msra.mxu1 %v2285_v45  ;;  %v2283_v45 = vld [vmem:[#allocation4 + $0x388] sm:$0xff] }
 0x33f   : > { %6914 = vst [vmem:[#allocation14_spill] sm:$0xff] %v6164_v38  ;;  %2614 = vmatmul.f32.gmra.mxu2 %v5949_v7  ;;  %2782 = vmatpush.msra.mxu1 %v2284_v19 }
 0x340   : > { %2679 = vmatmul.f32.gmra.mxu3 %v5952_v3 }
 0x341   : > { %v2361_v6 = vpop.f32.mrf.mxu1  ;;  %2783 = vmatpush.msra.mxu1 %v2283_v45  ;;  %v6925_v45 = vld [vmem:[#allocation73_spill] sm:$0xff] }
 0x342   : > { %v2420_v31 = vpop.f32.mrf.mxu2 }
 0x343   : > { %v2421_v61 = vadd.f32 %v2420_v31, %v2355_v39  ;;  %v2485_v52 = vpop.f32.mrf.mxu3  ;;  %v6915_v39 = vld [vmem:[#allocation13_spill] sm:$0xff] }
 0x344   : > { %3174 = vmatmul.msk.f32.gmra.mxu1 %vm5541_vm0, %v5961_v63  ;;  %v6917_v63 = vld [vmem:[#allocation54_spill] sm:$0xff] }
 0x345   : > { %v6171_v57 = vadd.f32 %v2485_v52, %v2421_v61  ;;  %v1181_v31 = vadd.f32 %v6918_v36, %v6917_v63  ;;  %v2299_v61 = vld [vmem:[#allocation4 + $0x408] sm:$0xff]  ;;  %v6922_v63 = vld [vmem:[#allocation70_spill] sm:$0xff] }
 0x346   : > { %2848 = vmatpush.msra.mxu2 %v2299_v61  ;;  %v6923_v61 = vld [vmem:[#allocation48_spill] sm:$0xff] }
 0x347   : > { %2617 = vmatmul.f32.gmra.mxu2 %v5980_v13 }
 0x348   : > { %2682 = vmatmul.f32.gmra.mxu3 %v5985_v28  ;;  %v2282_v28 = vld [vmem:[#allocation4 + $0x380] sm:$0xff] }
 0x349   : > { %v2364_v24 = vpop.f32.mrf.mxu1  ;;  %2784 = vmatpush.msra.mxu1 %v2282_v28 }
 0x34a   : > { %v2423_v32 = vpop.f32.mrf.mxu2 }
 0x34b   : > { %v2424_v2 = vadd.f32 %v2423_v32, %v2358_v9  ;;  %v2488_v29 = vpop.f32.mrf.mxu3  ;;  %v1258_v9 = vadd.f32 %v6919_v14, %v1181_v31  ;;  %v6924_v31 = vld [vmem:[#allocation72_spill] sm:$0xff] }
 0x34c   : > { %2558 = vmatmul.f32.gmra.mxu1 %v6915_v39  ;;  %v6920_v39 = vld [vmem:[#allocation55_spill] sm:$0xff] }
 0x34d   : > { %v6176_v46 = vadd.f32 %v2488_v29, %v2424_v2  ;;  %v6921_v2 = vld [vmem:[#allocation38_spill] sm:$0xff]  ;;  %v1335_v19 = vadd.f32 %v6922_v63, %v1258_v9  ;;  %v1719_v63 = vpop.f32.mrf.mxu0 }
 0x34e   : > { %v1184_v29 = vadd.f32 %v6921_v2, %v6920_v39 }
 0x34f   : > { %6916 = vst [vmem:[#allocation33_spill] sm:$0xff] %v6176_v46  ;;  %2620 = vmatmul.f32.gmra.mxu2 %v6015_v44 }
 0x350   : > { %2685 = vmatmul.f32.gmra.mxu3 %v6018_v5  ;;  %v1412_v5 = vadd.f32 %v6923_v61, %v1335_v19  ;;  %v1261_v14 = vadd.f32 %v6924_v31, %v1184_v29 }
 0x351   : > { %v2367_v52 = vpop.f32.mrf.mxu1 }
 0x352   : > { %v2426_v32 = vpop.f32.mrf.mxu2  ;;  %v1489_v9 = vadd.f32 %v6012_v21, %v1412_v5 }
 0x353   : > { %v2427_v46 = vadd.f32 %v2426_v32, %v2361_v6  ;;  %v2491_v38 = vpop.f32.mrf.mxu3  ;;  %v2298_v6 = vld [vmem:[#allocation4 + $0x400] sm:$0xff]  ;;  %v1338_v32 = vadd.f32 %v6925_v45, %v1261_v14 }
 0x354   : > { %3176 = vmatmul.msk.f32.gmra.mxu1 %vm5541_vm0, %v6027_v11  ;;  %2849 = vmatpush.msra.mxu2 %v2298_v6  ;;  %v6926_v11 = vld [vmem:[#allocation50_spill] sm:$0xff]  ;;  %v1566_v19 = vadd.f32 %v6078_v8, %v1489_v9 }
 0x355   : > { %v6189_v36 = vadd.f32 %v2491_v38, %v2427_v46  ;;  %v1415_v38 = vadd.f32 %v6926_v11, %v1338_v32 }
 0x356   : > { %v1643_v21 = vadd.f32 %v6083_v48, %v1566_v19 }
 0x357   : > { %2623 = vmatmul.f32.gmra.mxu2 %v6038_v62  ;;  %v1492_v61 = vadd.f32 %v6046_v22, %v1415_v38  ;;  %v1722_v22 = vpop.f32.mrf.mxu0 }
 0x358   : > { %2688 = vmatmul.f32.gmra.mxu3 %v6044_v54  ;;  %v1720_v45 = vadd.f32 %v1719_v63, %v1643_v21 }
 0x359   : > { %v2370_v39 = vpop.f32.mrf.mxu1 }
 0x35a   : > { %v2429_v2 = vpop.f32.mrf.mxu2  ;;  %v1744_v32 = vadd.f32 %v5491_v25, %v1720_v45 }
 0x35b   : > { %v2430_v46 = vadd.f32 %v2429_v2, %v2364_v24  ;;  %v2494_v28 = vpop.f32.mrf.mxu3  ;;  %v1569_v24 = vadd.f32 %v6107_v53, %v1492_v61  ;;  %v2141_v2 = vrot.slane %v6114_v33, 1 }
 0x35c   : > { %2564 = vmatmul.f32.gmra.mxu1 %v6057_v55 }
 0x35d   : > { %v6199_v29 = vadd.f32 %v2494_v28, %v2430_v46  ;;  %v1646_v8 = vadd.f32 %v6109_v0, %v1569_v24  ;;  %v2148_v46 = vrot.slane %v6114_v33, 2  ;;  %v1765_v0 = vmul.f32 %v5498_v35, %v1744_v32 }
 0x35f   : > { %2626 = vmatmul.f32.gmra.mxu2 %v6070_v27  ;;  %v1723_v48 = vadd.f32 %v1722_v22, %v1646_v8 }
 0x360   : > { %2691 = vmatmul.f32.gmra.mxu3 %v6073_v1 }
 0x361   : > { %v2373_v31 = vpop.f32.mrf.mxu1  ;;  %v1745_v63 = vadd.f32 %v5491_v25, %v1723_v48 }
 0x362   : > { %v2432_v5 = vpop.f32.mrf.mxu2 }
 0x363   : > { %v2433_v14 = vadd.f32 %v2432_v5, %v2367_v52  ;;  %v2497_v6 = vpop.f32.mrf.mxu3  ;;  %v1998_v52 = vsel %vm1929_vm10, 0.0, %v6086_v49  ;;  %v1786_v5 = vadd.f32 %v5508_v42, %v1765_v0  ;;  %v1766_v25 = vmul.f32 %v5498_v35, %v1745_v63 }
 0x364   : > { %3178 = vmatmul.msk.f32.gmra.mxu1 %vm5541_vm0, %v6086_v49  ;;  %v2140_v28 = vrot.slane %v1998_v52, 1  ;;  %v2147_v61 = vrot.slane %v1998_v52, 2 }
 0x365   : > { %v6210_v55 = vadd.f32 %v2497_v6, %v2433_v14  ;;  %v1826_v48 = vmul.f32 0.1, %v1786_v5  ;;  %vm1806_vm11 = vcmp.ge.f32.partialorder %v1786_v5, 0.0 }
 0x366   : > { %v6226_v21 = vsel %vm6927_vm3, %v2140_v28, %v2141_v2  ;;  %v6230_v49 = vsel %vm6928_vm6, %v2147_v61, %v2148_v46 }
 0x367   : > { %2629 = vmatmul.f32.gmra.mxu2 %v6096_v40 }
 0x368   : > { %2694 = vmatmul.f32.gmra.mxu3 %v6100_v4 }
 0x369   : > { %v2376_v53 = vpop.f32.mrf.mxu1 }
 0x36a   : > { %v2435_v9 = vpop.f32.mrf.mxu2 }
 0x36b   : > { %v2436_v11 = vadd.f32 %v2435_v9, %v2370_v39  ;;  %v2500_v38 = vpop.f32.mrf.mxu3  ;;  %v2008_v39 = vsel %vm1929_vm10, %v6105_v41, 0.0  ;;  %v1787_v41 = vadd.f32 %v5508_v42, %v1766_v25 }
 0x36c   : > { %2570 = vmatmul.f32.gmra.mxu1 %v6114_v33  ;;  %v6929_v33 = vld [vmem:[#allocation25_spill] sm:$0xff]  ;;  %v2143_v45 = vrot.slane %v2008_v39, 1  ;;  %v2150_v32 = vrot.slane %v2008_v39, 2 }
 0x36d   : > { %v6223_v19 = vadd.f32 %v2500_v38, %v2436_v11  ;;  %v1858_v24 = vadd.s32 9, %v6929_v33  ;;  %vm1807_vm1 = vcmp.ge.f32.partialorder %v1787_v41, 0.0 }
 0x36e   : > { %v6243_v9 = vsel %vm6930_vm15, %v2141_v2, %v2143_v45  ;;  %v6247_v35 = vsel %vm6931_vm8, %v2148_v46, %v2150_v32 }
 0x36f   : > { %2632 = vmatmul.f32.gmra.mxu2 %v6226_v21  ;;  %vm1868_vm14 = vcmp.ge.s32.totalorder %v1858_v24, 0  ;;  %vm1878_vm4 = vcmp.lt.s32.totalorder %v1858_v24, 16 }
 0x370   : > { %2697 = vmatmul.f32.gmra.mxu3 %v6230_v49  ;;  %vm6249_vm13 = vmand %vm1868_vm14, %vm1878_vm4 }
 0x371   : > { %v2526_v14 = vpop.f32.mrf.mxu1 }
 0x372   : > { %v2438_v6 = vpop.f32.mrf.mxu2 }
 0x373   : > { %v2439_v22 = vadd.f32 %v2438_v6, %v2373_v31  ;;  %v2503_v8 = vpop.f32.mrf.mxu3  ;;  %v1846_v31 = vsel %vm1806_vm11, %v1786_v5, %v1826_v48  ;;  %v2527_v5 = vadd.f32 %v2526_v14, %v6123_v59 }
 0x374   : > { %2785 = vmatmul.f32.vlgmr.msra.gmra.mxu1 %v5727_v56  ;;  %v1827_v56 = vmul.f32 0.1, %v1787_v41  ;;  %v1907_v2 = vsel %vm6249_vm13, %v1846_v31, 0.0 }
 0x375   : > { %v6240_v52 = vadd.f32 %v2503_v8, %v2439_v22  ;;  %v6259_v61 = vrot.slane %v1907_v2, 7 }
 0x376   : > { %v1847_v63 = vsel %vm1807_vm1, %v1787_v41, %v1827_v56 }
 0x377   : > { %2635 = vmatmul.f32.gmra.mxu2 %v6243_v9  ;;  %v1908_v39 = vsel %vm6249_vm13, %v1847_v63, 0.0 }
 0x378   : > { %2700 = vmatmul.f32.gmra.mxu3 %v6247_v35 }
 0x379   : > { %v2529_v38 = vpop.f32.mrf.mxu1 }
 0x37a   : > { %v2441_v42 = vpop.f32.mrf.mxu2  ;;  %v2530_v10 = vadd.f32 %v2529_v38, %v6128_v51  ;;  %v6936_v38 = vld [vmem:[#allocation33_spill] sm:$0xff] }
 0x37b   : > { %v2442_v0 = vadd.f32 %v2441_v42, %v2376_v53  ;;  %v2506_v28 = vpop.f32.mrf.mxu3 }
 0x37c   : > { %2788 = vmatmul.f32.gmra.mxu1 %v5761_v18  ;;  %v6270_v18 = vrot.slane %v1908_v39, 7 }
 0x37d   : > { %v6257_v46 = vadd.f32 %v2506_v28, %v2442_v0 }
 0x37f   : > { %2850 = vmatmul.f32.vlgmr.msra.gmra.mxu2 %v5730_v20  ;;  %v6276_v20 = vsel %vm1929_vm10, %v6259_v61, %v6270_v18 }
 0x380   : > { %3194 = vmatmul.msk.f32.vlgmr.msrb.gmra.mxu3 %vm5541_vm0, %v6259_v61  ;;  %vm6938_vm0 = vmmov %vm6912_vm2 }
 0x381   : > { %v2532_v53 = vpop.f32.mrf.mxu1  ;;  %vm6939_vm9 = vmmov %vm6938_vm0 }
 0x382   : > { %v2591_v33 = vpop.f32.mrf.mxu2 }
 0x383   : > { %v6268_v24 = vadd.f32 %v2591_v33, %v2527_v5  ;;  %v2656_v63 = vpop.f32.mrf.mxu3 }
 0x384   : > { %2791 = vmatmul.f32.gmra.mxu1 %v5805_v15  ;;  %v2533_v15 = vadd.f32 %v2532_v53, %v6135_v12 }
 0x387   : > { %2853 = vmatmul.f32.gmra.mxu2 %v5770_v43 }
 0x388   : > { %2765 = vmatmul.f32.gmra.mxu3 %v6276_v20 }
 0x389   : > { %v2535_v59 = vpop.f32.mrf.mxu1 }
 0x38a   : > { %v2594_v25 = vpop.f32.mrf.mxu2  ;;  %v2536_v43 = vadd.f32 %v2535_v59, %v6140_v34 }
 0x38b   : > { %v6281_v14 = vadd.f32 %v2594_v25, %v2530_v10 }
 0x38c   : > { %2794 = vmatmul.f32.gmra.mxu1 %v5842_v30 }
 0x38f   : > { %2856 = vmatmul.f32.gmra.mxu2 %v5808_v16 }
 0x391   : > { %v2538_v6 = vpop.f32.mrf.mxu1 }
 0x392   : > { %v2597_v45 = vpop.f32.mrf.mxu2  ;;  %v2539_v16 = vadd.f32 %v2538_v6, %v6147_v58 }
 0x393   : > { %v6286_v22 = vadd.f32 %v2597_v45, %v2533_v15 }
 0x394   : > { %2797 = vmatmul.f32.gmra.mxu1 %v5879_v60 }
 0x397   : > { %2859 = vmatmul.f32.gmra.mxu2 %v5848_v50 }
 0x399   : > { %v2541_v51 = vpop.f32.mrf.mxu1 }
 0x39a   : > { %v2600_v8 = vpop.f32.mrf.mxu2  ;;  %v2542_v50 = vadd.f32 %v2541_v51, %v6152_v47 }
 0x39b   : > { %v6291_v32 = vadd.f32 %v2600_v8, %v2536_v43  ;;  %v2721_v43 = vpop.f32.mrf.mxu0 }
 0x39c   : > { %2800 = vmatmul.f32.gmra.mxu1 %v5912_v37 }
 0x39f   : > { %2862 = vmatmul.f32.gmra.mxu2 %v5882_v17 }
 0x3a1   : > { %v2544_v30 = vpop.f32.mrf.mxu1 }
 0x3a2   : > { %v2603_v12 = vpop.f32.mrf.mxu2  ;;  %v2545_v17 = vadd.f32 %v2544_v30, %v6159_v23 }
 0x3a3   : > { %v6296_v48 = vadd.f32 %v2603_v12, %v2539_v16 }
 0x3a4   : > { %2803 = vmatmul.f32.gmra.mxu1 %v5949_v7  ;;  %v6935_v7 = vld [vmem:[#allocation14_spill] sm:$0xff] }
 0x3a7   : > { %2865 = vmatmul.f32.gmra.mxu2 %v5917_v26  ;;  %v6934_v26 = vld [vmem:[#allocation12_spill] sm:$0xff] }
 0x3a9   : > { %v2547_v60 = vpop.f32.mrf.mxu1 }
 0x3aa   : > { %v2606_v34 = vpop.f32.mrf.mxu2  ;;  %v2548_v47 = vadd.f32 %v2547_v60, %v6935_v7  ;;  %v2724_v60 = vpop.f32.mrf.mxu0  ;;  %v2657_v7 = vadd.f32 %v2656_v63, %v6268_v24  ;;  %v2901_v63 = vld [vmem:[#allocation2 + $0x39] sm:$0xff] }
 0x3ab   : > { %v6301_v41 = vadd.f32 %v2606_v34, %v2542_v50 }
 0x3ac   : > { %2806 = vmatmul.f32.gmra.mxu1 %v5980_v13 }
 0x3af   : > { %2868 = vmatmul.f32.gmra.mxu2 %v5952_v3  ;;  %v6937_v3 = vld [vmem:[#allocation32_spill] sm:$0xff] }
 0x3b1   : > { %v2550_v37 = vpop.f32.mrf.mxu1 }
 0x3b2   : > { %v2551_v58 = vadd.f32 %v2550_v37, %v6171_v57  ;;  %v2609_v31 = vpop.f32.mrf.mxu2 }
 0x3b3   : > { %v6307_v11 = vadd.f32 %v2609_v31, %v2545_v17 }
 0x3b4   : > { %2809 = vmatmul.f32.gmra.mxu1 %v6015_v44 }
 0x3b7   : > { %2871 = vmatmul.f32.gmra.mxu2 %v6934_v26 }
 0x3b9   : > { %v2553_v56 = vpop.f32.mrf.mxu1 }
 0x3ba   : > { %v2554_v42 = vadd.f32 %v2553_v56, %v6936_v38  ;;  %v2612_v13 = vpop.f32.mrf.mxu2  ;;  %v2722_v38 = vadd.f32 %v2721_v43, %v2657_v7 }
 0x3bb   : > { %v6313_v2 = vadd.f32 %v2612_v13, %v2548_v47 }
 0x3bc   : > { %2812 = vmatmul.f32.gmra.mxu1 %v6038_v62 }
 0x3bf   : > { %2874 = vmatmul.f32.gmra.mxu2 %v6937_v3 }
 0x3c1   : > { %v2556_v23 = vpop.f32.mrf.mxu1 }
 0x3c2   : > { %v2557_v57 = vadd.f32 %v2556_v23, %v6189_v36  ;;  %v2615_v0 = vpop.f32.mrf.mxu2 }
 0x3c3   : > { %v6318_v28 = vadd.f32 %v2615_v0, %v2551_v58 }
 0x3c4   : > { %2815 = vmatmul.f32.gmra.mxu1 %v6070_v27  ;;  %v2659_v27 = vpop.f32.mrf.mxu3 }
 0x3c5   : > { %v2660_v0 = vadd.f32 %v2659_v27, %v6281_v14 }
 0x3c7   : > { %2877 = vmatmul.f32.gmra.mxu2 %v6044_v54 }
 0x3c9   : > { %v2559_v44 = vpop.f32.mrf.mxu1 }
 0x3ca   : > { %v2560_v39 = vadd.f32 %v2559_v44, %v6199_v29  ;;  %v2618_v5 = vpop.f32.mrf.mxu2 }
 0x3cb   : > { %v6323_v53 = vadd.f32 %v2618_v5, %v2554_v42 }
 0x3cc   : > { %2818 = vmatmul.f32.gmra.mxu1 %v6096_v40  ;;  %v1999_v40 = vsel %vm1929_vm10, 0.0, %v6259_v61 }
 0x3cd   : > { %v2163_v50 = vrot.slane %v1999_v40, 2 }
 0x3cf   : > { %2880 = vmatmul.f32.gmra.mxu2 %v6073_v1  ;;  %v2662_v1 = vpop.f32.mrf.mxu3 }
 0x3d1   : > { %v2562_v62 = vpop.f32.mrf.mxu1 }
 0x3d2   : > { %v2563_v36 = vadd.f32 %v2562_v62, %v6210_v55  ;;  %v2621_v33 = vpop.f32.mrf.mxu2  ;;  %v2157_v55 = vrot.slane %v6276_v20, 1  ;;  %v2725_v62 = vadd.f32 %v2724_v60, %v2660_v0 }
 0x3d3   : > { %v6328_v10 = vadd.f32 %v2621_v33, %v2557_v57  ;;  %v2900_v57 = vld [vmem:[#allocation2 + $0x31] sm:$0xff] }
 0x3d4   : > { %2821 = vmatmul.f32.gmra.mxu1 %v6226_v21  ;;  %v2156_v21 = vrot.slane %v1999_v40, 1 }
 0x3d7   : > { %2883 = vmatmul.f32.gmra.mxu2 %v6100_v4  ;;  %v2665_v51 = vpop.f32.mrf.mxu3 }
 0x3d9   : > { %v2565_v54 = vpop.f32.mrf.mxu1 }
 0x3da   : > { %v2566_v29 = vadd.f32 %v2565_v54, %v6223_v19  ;;  %v2624_v59 = vpop.f32.mrf.mxu2  ;;  %v2158_v19 = vsel %vm6938_vm0, %v2156_v21, %v2157_v55  ;;  %v2663_v54 = vadd.f32 %v2662_v1, %v6286_v22 }
 0x3db   : > { %v6333_v25 = vadd.f32 %v2624_v59, %v2560_v39 }
 0x3dc   : > { %2824 = vmatmul.f32.gmra.mxu1 %v6243_v9  ;;  %v2009_v9 = vsel %vm1929_vm10, %v6270_v18, 0.0  ;;  %vm6941_vm10 = vmmov %vm6928_vm6 }
 0x3dd   : > { %v2159_v61 = vrot.slane %v2009_v9, 1  ;;  %v2166_v37 = vrot.slane %v2009_v9, 2 }
 0x3df   : > { %2886 = vmatmul.f32.gmra.mxu2 %v6230_v49  ;;  %v2164_v49 = vrot.slane %v6276_v20, 2  ;;  %v2160_v12 = vsel %vm6939_vm9, %v2157_v55, %v2159_v61 }
 0x3e1   : > { %v2568_v15 = vpop.f32.mrf.mxu1  ;;  %v2165_v34 = vsel %vm6940_vm12, %v2163_v50, %v2164_v49  ;;  %v2167_v20 = vsel %vm6941_vm10, %v2164_v49, %v2166_v37 }
 0x3e2   : > { %v2569_v4 = vadd.f32 %v2568_v15, %v6240_v52  ;;  %v2627_v6 = vpop.f32.mrf.mxu2 }
 0x3e3   : > { %v6341_v45 = vadd.f32 %v2627_v6, %v2563_v36  ;;  %v2666_v6 = vadd.f32 %v2665_v51, %v6291_v32 }
 0x3e4   : > { %2827 = vmatmul.f32.gmra.mxu1 %v2158_v19 }
 0x3e7   : > { %2889 = vmatmul.f32.gmra.mxu2 %v6247_v35  ;;  %v2668_v35 = vpop.f32.mrf.mxu3 }
 0x3e9   : > { %v2571_v8 = vpop.f32.mrf.mxu1 }
 0x3ea   : > { %v2572_v16 = vadd.f32 %v2571_v8, %v6257_v46  ;;  %v2630_v52 = vpop.f32.mrf.mxu2  ;;  %v2727_v46 = vpop.f32.mrf.mxu0 }
 0x3eb   : > { %v6349_v30 = vadd.f32 %v2630_v52, %v2566_v29  ;;  %v2728_v55 = vadd.f32 %v2727_v46, %v2663_v54  ;;  %v2669_v52 = vadd.f32 %v2668_v35, %v6296_v48 }
 0x3ec   : > { %2830 = vmatmul.f32.gmra.mxu1 %v2160_v12 }
 0x3ef   : > { %2892 = vmatmul.f32.gmra.mxu2 %v2165_v34  ;;  %v2671_v56 = vpop.f32.mrf.mxu3 }
 0x3f0   : > { %v2672_v37 = vadd.f32 %v2671_v56, %v6301_v41 }
 0x3f1   : > { %v2786_v18 = vpop.f32.mrf.mxu1 }
 0x3f2   : > { %v2633_v17 = vpop.f32.mrf.mxu2  ;;  %v2787_v42 = vadd.f32 %v2786_v18, %v2722_v38  ;;  %v2730_v3 = vpop.f32.mrf.mxu0 }
 0x3f3   : > { %v6353_v58 = vadd.f32 %v2633_v17, %v2569_v4  ;;  %v2902_v4 = vld [vmem:[#allocation2 + $0x49] sm:$0xff]  ;;  %v2731_v61 = vadd.f32 %v2730_v3, %v2666_v6  ;;  %v2904_v17 = vld [vmem:[#allocation2 + $0x61] sm:$0xff]  ;;  %v2908_v6 = vld [vmem:[#allocation2 + $0x91] sm:$0xff] }
 0x3f7   : > { %2895 = vmatmul.f32.gmra.mxu2 %v2167_v20  ;;  %v2674_v5 = vpop.f32.mrf.mxu3 }
 0x3f9   : > { %v2789_v31 = vpop.f32.mrf.mxu1 }
 0x3fa   : > { %v2636_v26 = vpop.f32.mrf.mxu2  ;;  %v2790_v36 = vadd.f32 %v2789_v31, %v2725_v62  ;;  %v2733_v59 = vpop.f32.mrf.mxu0 }
 0x3fb   : > { %v6357_v47 = vadd.f32 %v2636_v26, %v2572_v16  ;;  %v2903_v16 = vld [vmem:[#allocation2 + $0x51] sm:$0xff]  ;;  %v2734_v60 = vadd.f32 %v2733_v59, %v2669_v52  ;;  %v2907_v59 = vld [vmem:[#allocation2 + $0x81] sm:$0xff] }
 0x3ff   : > { %v2677_v15 = vpop.f32.mrf.mxu3 }
 0x400   : > { %v2678_v62 = vadd.f32 %v2677_v15, %v6313_v2 }
 0x401   : > { %v2792_v13 = vpop.f32.mrf.mxu1 }
 0x402   : > { %v2851_v23 = vpop.f32.mrf.mxu2  ;;  %v2793_v21 = vadd.f32 %v2792_v13, %v2728_v55  ;;  %v2736_v9 = vpop.f32.mrf.mxu0  ;;  %v2675_v13 = vadd.f32 %v2674_v5, %v6307_v11 }
 0x403   : > { %v2852_v44 = vadd.f32 %v2851_v23, %v2787_v42  ;;  %v2737_v26 = vadd.f32 %v2736_v9, %v2672_v37  ;;  %v2905_v42 = vld [vmem:[#allocation2 + $0x69] sm:$0xff] }
 0x405   : > { %v2916_v39 = vadd.f32 %v2900_v57, %v2852_v44 }
 0x407   : > { %2932 = vst [vmem:[%s3660_s8] sm:$0xff] %v2916_v39  ;;  %v2680_v8 = vpop.f32.mrf.mxu3  ;;  %v2906_v39 = vld [vmem:[#allocation2 + $0x79] sm:$0xff] }
 0x409   : > { %v2795_v33 = vpop.f32.mrf.mxu1 }
 0x40a   : > { %v2854_v24 = vpop.f32.mrf.mxu2  ;;  %v2796_v22 = vadd.f32 %v2795_v33, %v2731_v61  ;;  %v2739_v34 = vpop.f32.mrf.mxu0 }
 0x40b   : > { %v2855_v29 = vadd.f32 %v2854_v24, %v2790_v36  ;;  %v2740_v0 = vadd.f32 %v2739_v34, %v2675_v13 }
 0x40d   : > { %v2917_v40 = vadd.f32 %v2901_v63, %v2855_v29 }
 0x40f   : > { %2933 = vst [vmem:[%s3660_s8 + $0x8] sm:$0xff] %v2917_v40  ;;  %v2683_v46 = vpop.f32.mrf.mxu3  ;;  %v2681_v40 = vadd.f32 %v2680_v8, %v6318_v28  ;;  %v2909_v8 = vld [vmem:[#allocation2 + $0x99] sm:$0xff] }
 0x411   : > { %v2798_v14 = vpop.f32.mrf.mxu1 }
 0x412   : > { %v2857_v27 = vpop.f32.mrf.mxu2  ;;  %v2799_v18 = vadd.f32 %v2798_v14, %v2734_v60  ;;  %v2742_v48 = vpop.f32.mrf.mxu0 }
 0x413   : > { %v2858_v19 = vadd.f32 %v2857_v27, %v2793_v21  ;;  %v2743_v63 = vadd.f32 %v2742_v48, %v2678_v62 }
 0x415   : > { %v2918_v43 = vadd.f32 %v2902_v4, %v2858_v19  ;;  %v2684_v19 = vadd.f32 %v2683_v46, %v6323_v53 }
 0x417   : > { %2934 = vst [vmem:[%s3660_s8 + $0x10] sm:$0xff] %v2918_v43  ;;  %v2686_v57 = vpop.f32.mrf.mxu3 }
 0x419   : > { %v2801_v1 = vpop.f32.mrf.mxu1 }
 0x41a   : > { %v2860_v49 = vpop.f32.mrf.mxu2  ;;  %v2802_v7 = vadd.f32 %v2801_v1, %v2737_v26  ;;  %v2745_v33 = vpop.f32.mrf.mxu0 }
 0x41b   : > { %v2861_v12 = vadd.f32 %v2860_v49, %v2796_v22  ;;  %v2746_v27 = vadd.f32 %v2745_v33, %v2681_v40 }
 0x41d   : > { %v2919_v50 = vadd.f32 %v2903_v16, %v2861_v12  ;;  %v2687_v16 = vadd.f32 %v2686_v57, %v6328_v10 }
 0x41f   : > { %2935 = vst [vmem:[%s3660_s8 + $0x18] sm:$0xff] %v2919_v50  ;;  %v2689_v54 = vpop.f32.mrf.mxu3 }
 0x421   : > { %v2804_v32 = vpop.f32.mrf.mxu1 }
 0x422   : > { %v2863_v51 = vpop.f32.mrf.mxu2  ;;  %v2805_v41 = vadd.f32 %v2804_v32, %v2740_v0  ;;  %v2748_v14 = vpop.f32.mrf.mxu0 }
 0x423   : > { %v2864_v20 = vadd.f32 %v2863_v51, %v2799_v18  ;;  %v2749_v22 = vadd.f32 %v2748_v14, %v2684_v19  ;;  %v2910_v51 = vld [vmem:[#allocation2 + $0xa9] sm:$0xff]  ;;  %v2915_v19 = vld [vmem:[#allocation2 + $0xe1] sm:$0xff] }
 0x425   : > { %v2920_v31 = vadd.f32 %v2904_v17, %v2864_v20  ;;  %v2690_v17 = vadd.f32 %v2689_v54, %v6333_v25 }
 0x427   : > { %2936 = vst [vmem:[%s3660_s8 + $0x20] sm:$0xff] %v2920_v31  ;;  %v2692_v15 = vpop.f32.mrf.mxu3 }
 0x428   : > { %v2693_v48 = vadd.f32 %v2692_v15, %v6341_v45 }
 0x429   : > { %v2807_v38 = vpop.f32.mrf.mxu1 }
 0x42a   : > { %v2866_v35 = vpop.f32.mrf.mxu2  ;;  %v2808_v29 = vadd.f32 %v2807_v38, %v2743_v63  ;;  %v2751_v1 = vpop.f32.mrf.mxu0  ;;  %v2911_v38 = vld [vmem:[#allocation2 + $0xb1] sm:$0xff]  ;;  %v2913_v63 = vld [vmem:[#allocation2 + $0xc9] sm:$0xff] }
 0x42b   : > { %v2867_v3 = vadd.f32 %v2866_v35, %v2802_v7  ;;  %v2752_v34 = vadd.f32 %v2751_v1, %v2687_v16 }
 0x42d   : > { %v2921_v23 = vadd.f32 %v2905_v42, %v2867_v3 }
 0x42f   : > { %2937 = vst [vmem:[%s3660_s8 + $0x28] sm:$0xff] %v2921_v23  ;;  %v2695_v12 = vpop.f32.mrf.mxu3 }
 0x431   : > { %v2810_v56 = vpop.f32.mrf.mxu1 }
 0x432   : > { %v2869_v44 = vpop.f32.mrf.mxu2  ;;  %v2811_v2 = vadd.f32 %v2810_v56, %v2746_v27  ;;  %v2754_v18 = vpop.f32.mrf.mxu0  ;;  %v2696_v56 = vadd.f32 %v2695_v12, %v6349_v30 }
 0x433   : > { %v2870_v36 = vadd.f32 %v2869_v44, %v2805_v41  ;;  %v2755_v31 = vadd.f32 %v2754_v18, %v2690_v17  ;;  %v2912_v41 = vld [vmem:[#allocation2 + $0xc1] sm:$0xff] }
 0x435   : > { %v2922_v24 = vadd.f32 %v2906_v39, %v2870_v36 }
 0x437   : > { %2938 = vst [vmem:[%s3660_s8 + $0x30] sm:$0xff] %v2922_v24  ;;  %v2698_v46 = vpop.f32.mrf.mxu3 }
 0x439   : > { %v2813_v11 = vpop.f32.mrf.mxu1 }
 0x43a   : > { %v2872_v5 = vpop.f32.mrf.mxu2  ;;  %v2814_v49 = vadd.f32 %v2813_v11, %v2749_v22  ;;  %v2757_v42 = vpop.f32.mrf.mxu0  ;;  %v2699_v11 = vadd.f32 %v2698_v46, %v6353_v58 }
 0x43b   : > { %v2873_v55 = vadd.f32 %v2872_v5, %v2808_v29  ;;  %v2758_v3 = vadd.f32 %v2757_v42, %v2693_v48 }
 0x43d   : > { %v2923_v21 = vadd.f32 %v2907_v59, %v2873_v55  ;;  %v2914_v55 = vld [vmem:[#allocation2 + $0xd9] sm:$0xff] }
 0x43f   : > { %2939 = vst [vmem:[%s3660_s8 + $0x38] sm:$0xff] %v2923_v21  ;;  %v2701_v23 = vpop.f32.mrf.mxu3 }
 0x440   : > { %v2702_v27 = vadd.f32 %v2701_v23, %v6357_v47 }
 0x441   : > { %v2816_v9 = vpop.f32.mrf.mxu1 }
 0x442   : > { %v2875_v4 = vpop.f32.mrf.mxu2  ;;  %v2817_v53 = vadd.f32 %v2816_v9, %v2752_v34  ;;  %v2760_v62 = vpop.f32.mrf.mxu0 }
 0x443   : > { %v2876_v43 = vadd.f32 %v2875_v4, %v2811_v2  ;;  %v2761_v45 = vadd.f32 %v2760_v62, %v2696_v56 }
 0x445   : > { %v2924_v61 = vadd.f32 %v2908_v6, %v2876_v43 }
 0x447   : > { %2940 = vst [vmem:[%s3660_s8 + $0x40] sm:$0xff] %v2924_v61  ;;  %v2763_v33 = vpop.f32.mrf.mxu3 }
 0x448   : > { %v2764_v59 = vadd.f32 %v2763_v33, %v2699_v11 }
 0x449   : > { %v2819_v60 = vpop.f32.mrf.mxu1 }
 0x44a   : > { %v2878_v28 = vpop.f32.mrf.mxu2  ;;  %v2820_v26 = vadd.f32 %v2819_v60, %v2755_v31 }
 0x44b   : > { %v2879_v52 = vadd.f32 %v2878_v28, %v2814_v49 }
 0x44d   : > { %v2925_v50 = vadd.f32 %v2909_v8, %v2879_v52 }
 0x44f   : > { %2941 = vst [vmem:[%s3660_s8 + $0x48] sm:$0xff] %v2925_v50  ;;  %v2766_v14 = vpop.f32.mrf.mxu3 }
 0x450   : > { %v2767_v15 = vadd.f32 %v2766_v14, %v2702_v27 }
 0x451   : > { %v2822_v10 = vpop.f32.mrf.mxu1 }
 0x452   : > { %v2881_v32 = vpop.f32.mrf.mxu2  ;;  %v2823_v57 = vadd.f32 %v2822_v10, %v2758_v3 }
 0x453   : > { %v2882_v37 = vadd.f32 %v2881_v32, %v2817_v53 }
 0x455   : > { %v2926_v20 = vadd.f32 %v2910_v51, %v2882_v37 }
 0x457   : > { %2942 = vst [vmem:[%s3660_s8 + $0x50] sm:$0xff] %v2926_v20 }
 0x459   : > { %v2825_v25 = vpop.f32.mrf.mxu1 }
 0x45a   : > { %v2884_v7 = vpop.f32.mrf.mxu2  ;;  %v2826_v36 = vadd.f32 %v2825_v25, %v2761_v45 }
 0x45b   : > { %v2885_v35 = vadd.f32 %v2884_v7, %v2820_v26 }
 0x45d   : > { %v2927_v13 = vadd.f32 %v2911_v38, %v2885_v35 }
 0x45f   : > { %2943 = vst [vmem:[%s3660_s8 + $0x58] sm:$0xff] %v2927_v13 }
 0x461   : > { %v2828_v29 = vpop.f32.mrf.mxu1 }
 0x462   : > { %v2887_v0 = vpop.f32.mrf.mxu2  ;;  %v2829_v30 = vadd.f32 %v2828_v29, %v2764_v59 }
 0x463   : > { %v2888_v44 = vadd.f32 %v2887_v0, %v2823_v57 }
 0x465   : > { %v2928_v39 = vadd.f32 %v2912_v41, %v2888_v44 }
 0x467   : > { %2944 = vst [vmem:[%s3660_s8 + $0x60] sm:$0xff] %v2928_v39 }
 0x469   : > { %v2831_v58 = vpop.f32.mrf.mxu1 }
 0x46a   : > { %v2890_v24 = vpop.f32.mrf.mxu2  ;;  %v2832_v4 = vadd.f32 %v2831_v58, %v2767_v15 }
 0x46b   : > { %v2891_v54 = vadd.f32 %v2890_v24, %v2826_v36 }
 0x46d   : > { %v2929_v5 = vadd.f32 %v2913_v63, %v2891_v54 }
 0x46f   : > { %2945 = vst [vmem:[%s3660_s8 + $0x68] sm:$0xff] %v2929_v5 }
 0x472   : > { %v2893_v40 = vpop.f32.mrf.mxu2 }
 0x473   : > { %v2894_v21 = vadd.f32 %v2893_v40, %v2829_v30 }
 0x475   : > { %v2930_v2 = vadd.f32 %v2914_v55, %v2894_v21 }
 0x477   : > { %2946 = vst [vmem:[%s3660_s8 + $0x70] sm:$0xff] %v2930_v2 }
 0x47a   : > { %v2896_v6 = vpop.f32.mrf.mxu2 }
 0x47b   : > { %v2897_v43 = vadd.f32 %v2896_v6, %v2832_v4 }
 0x47d   : > { %v2931_v9 = vadd.f32 %v2915_v19, %v2897_v43 }
 0x47f   : > { %2947 = vst [vmem:[%s3660_s8 + $0x78] sm:$0xff] %v2931_v9 }
 0x480   : > { %3411 = shalt.err (!%p3408_p9)
}
 0x481   : > { %s3489_s27 = smov 128   ;;  %s3490_s8 = smov 8  }
 0x482   : > { %3256 = dma.vmem_to_hbm [thread:$0]  (%p3568_p3), %s2965_s7, 2048, %s2967_s9, %s2949_s10, %s3489_s27, %s3489_s27, %s3490_s8  }
 0x483 PF: > { %p3268_p10 = scmp.ge.s32.totalorder %s3484_s22, 2  ;;  %s2981_s6 = sand.u32 1, %s3456_s15  }
 0x484   : > { %s2982_s18 = scalar_lea.sflag [#allocation6], %s2981_s6 }
 0x485   : > { %p3263_p11 = pnand %p3268_p10, %p3577_p8 }
 0x487   : > { %p3264_p12 = pneg %p3263_p11 }
 0x489   : > { %3451 = dma.done.wait (%p3264_p12), %s2982_s18, 2048  }
 0x48a   : > { %3453 = vsyncadd (%p3264_p12), %s2982_s18, 4294965248  ;;  %s18_s22 = sadd.s32 1, %s3484_s22   ;;  %s6942_s15 = smov %s3460_s16 }
 0x48b   : > { %p15_p13 = scmp.ge.s32.totalorder %s18_s22, 6   ;;  %s6943_s16 = smov %s3464_s17 }
 0x48c   : > { %s6944_s17 = smov %s3598_s12  ;;  %s6945_s18 = smov %s3476_s20 }
 0x48d   : > { %s6946_s19 = smov %s3480_s21  ;;  %s6947_s20 = smov %s6950_s25 }
 0x48e   : > { %s6948_s21 = smov %s6954_s26  ;;  %17 = sbr.rel (!%p15_p13) target bundleno = 6 (0x6), region = 103 }
 0x493   :  { %2988 = vsyncpa [#allocation5], 1 }
 0x494   :  { %2990 = vsyncpa [#allocation5 + $0x1], 1 }
 0x495   :  { %2991 = vsyncpa [#allocation6], 1 }
 0x496   :  { %2993 = vsyncpa [#allocation6 + $0x1], 1 }
 0x497   :  { %2994 = vsyncmov [#allocation3] }
 0x49a   :  { %s2995_s29 = vpop.sfrf %2994 }
 0x49b   :  { %p3202_p3 = scmp.ne.s32.totalorder %s2995_s29, 0 }
 0x49d   :  { %2999 = shalt.err (%p3202_p3)  }

</bundles_post_ra>
